<compile_context>
chip_gen: v7x
topology: tpu7x:2x2x1
jax: 0.10.0
libtpu: 0.0.40
codegen_flags: <defaults>
</compile_context>

<pallas_src>
import math
import functools

import jax
import jax.numpy as jnp
from jax import lax
from jax.experimental import pallas as pl
from jax.experimental.pallas import tpu as pltpu

_VMEM_LIMIT = 32 * 1024 * 1024  # safe scoped limit on v5e/v6e/v7x for these tiles


# ----------------------------- tiling helpers -----------------------------

def _round_up(x, m):
    return (x + m - 1) // m * m


def _fit(dim, target):
    """Return (padded_dim, tile). tile==dim (full block) when dim<=target,
    otherwise tile==target (8/128-aligned) and dim is padded to a multiple."""
    if dim <= target:
        return dim, dim
    return _round_up(dim, target), target


def _pad2(a, rows, cols):
    pr, pc = rows - a.shape[0], cols - a.shape[1]
    if pr == 0 and pc == 0:
        return a
    return jnp.pad(a, ((0, pr), (0, pc)))


def _pad1(a, n):
    p = n - a.shape[0]
    if p == 0:
        return a
    return jnp.pad(a, ((0, p),))


# ----------------------------- tiled matmul (+bias, +ReLU) -----------------------------

def _matmul_kernel(x_ref, w_ref, b_ref, o_ref, acc_ref, *, relu):
    @pl.when(pl.program_id(2) == 0)
    def _():
        acc_ref[...] = jnp.zeros_like(acc_ref)

    # bf16 MXU operands, f32 accumulation (small numeric divergence vs f32 ref).
    acc_ref[...] += jnp.dot(x_ref[...].astype(jnp.bfloat16),
                            w_ref[...].astype(jnp.bfloat16),
                            preferred_element_type=jnp.float32)

    @pl.when(pl.program_id(2) == pl.num_programs(2) - 1)
    def _():
        y = acc_ref[...] + b_ref[...]
        if relu:
            y = jnp.maximum(y, 0.0)
        o_ref[...] = y.astype(o_ref.dtype)


def matmul(x, w, b, relu=False, *, tm_target=512, tn_target=512, tk_target=512):
    """x: [M, K] @ w: [K, N] + b: [N], optional ReLU. Tiled + pipelined."""
    M, K = x.shape
    N = w.shape[1]
    Mp, tm = _fit(M, tm_target)
    Np, tn = _fit(N, tn_target)
    Kp, tk = _fit(K, tk_target)

    xp = _pad2(x, Mp, Kp)
    wp = _pad2(w, Kp, Np)
    bp = _pad1(b, Np).reshape(1, Np)

    out = pl.pallas_call(
        functools.partial(_matmul_kernel, relu=relu),
        out_shape=jax.ShapeDtypeStruct((Mp, Np), jnp.float32),
        grid=(Mp // tm, Np // tn, Kp // tk),
        in_specs=[pl.BlockSpec((tm, tk), lambda i, j, k: (i, k)),
                  pl.BlockSpec((tk, tn), lambda i, j, k: (k, j)),
                  pl.BlockSpec((1, tn), lambda i, j, k: (0, j))],
        out_specs=pl.BlockSpec((tm, tn), lambda i, j, k: (i, j)),
        scratch_shapes=[pltpu.VMEM((tm, tn), jnp.float32)],
        compiler_params=pltpu.CompilerParams(
            dimension_semantics=("parallel", "parallel", "arbitrary"),
            vmem_limit_bytes=_VMEM_LIMIT),
    )(xp, wp, bp)
    if Mp != M or Np != N:
        out = out[:M, :N]
    return out


# ------------------ matmul + bias + residual + LayerNorm (fused epilogue) ------------------

def _matmul_ln_kernel(x_ref, w_ref, b_ref, r_ref, g_ref, bt_ref, o_ref, acc_ref):
    @pl.when(pl.program_id(1) == 0)
    def _():
        acc_ref[...] = jnp.zeros_like(acc_ref)

    acc_ref[...] += jnp.dot(x_ref[...].astype(jnp.bfloat16),
                            w_ref[...].astype(jnp.bfloat16),
                            preferred_element_type=jnp.float32)

    @pl.when(pl.program_id(1) == pl.num_programs(1) - 1)
    def _():
        h = acc_ref[...] + b_ref[...] + r_ref[...]          # bias + residual (f32)
        mean = jnp.mean(h, axis=-1, keepdims=True)
        var = jnp.mean(jnp.square(h - mean), axis=-1, keepdims=True)
        o_ref[...] = ((h - mean) * lax.rsqrt(var + 1e-5)) * g_ref[...] + bt_ref[...]


def matmul_add_ln(x, w, b, residual, gamma, beta, *, tm_target=512, tk_target=512):
    """(x @ w + b + residual) -> LayerNorm over the last axis (N kept whole)."""
    M, K = x.shape
    N = w.shape[1]
    Mp, tm = _fit(M, tm_target)
    Kp, tk = _fit(K, tk_target)

    xp = _pad2(x, Mp, Kp)
    wp = _pad2(w, Kp, N)
    rp = _pad2(residual, Mp, N)
    bp = b.reshape(1, N)
    gp = gamma.reshape(1, N)
    btp = beta.reshape(1, N)

    out = pl.pallas_call(
        _matmul_ln_kernel,
        out_shape=jax.ShapeDtypeStruct((Mp, N), jnp.float32),
        grid=(Mp // tm, Kp // tk),
        in_specs=[pl.BlockSpec((tm, tk), lambda i, k: (i, k)),
                  pl.BlockSpec((tk, N), lambda i, k: (k, 0)),
                  pl.BlockSpec((1, N), lambda i, k: (0, 0)),
                  pl.BlockSpec((tm, N), lambda i, k: (i, 0)),
                  pl.BlockSpec((1, N), lambda i, k: (0, 0)),
                  pl.BlockSpec((1, N), lambda i, k: (0, 0))],
        out_specs=pl.BlockSpec((tm, N), lambda i, k: (i, 0)),
        scratch_shapes=[pltpu.VMEM((tm, N), jnp.float32)],
        compiler_params=pltpu.CompilerParams(
            dimension_semantics=("parallel", "arbitrary"),
            vmem_limit_bytes=_VMEM_LIMIT),
    )(xp, wp, bp, rp, gp, btp)
    if Mp != M:
        out = out[:M]
    return out


# ----------------------------- multi-head attention core -----------------------------

def _mha_kernel(q_ref, k_ref, v_ref, m_ref, o_ref, *, heads, dh, scale):
    # q_ref: [1, tq, HD], k_ref/v_ref: [1, Sk, HD], m_ref: [1, tq, Sk] int8.
    q = q_ref[0].astype(jnp.bfloat16)            # [tq, HD]
    # Transpose K once per tile (f32 transpose, then bf16) and reuse for all heads
    # instead of per-head dot_general relayouts.
    kt = k_ref[0].T.astype(jnp.bfloat16)         # [HD, Sk]
    v = v_ref[0].astype(jnp.bfloat16)            # [Sk, HD]
    attend = m_ref[0].astype(jnp.float32) != 0.0  # [tq, Sk]

    for h in range(heads):
        sl = slice(h * dh, (h + 1) * dh)
        s = jnp.dot(q[:, sl], kt[sl, :],
                    preferred_element_type=jnp.float32) * scale   # [tq, Sk] f32
        s = jnp.where(attend, s, -1e9)
        s = s - jnp.max(s, axis=-1, keepdims=True)
        p = jnp.exp(s)
        p = p / jnp.sum(p, axis=-1, keepdims=True)
        # Store this head's result straight into its lane slot of the output
        # VMEM tile -> bounds live ranges; the HBM writeback stays one
        # lane-dense [tq, HD] store per grid step.
        o_ref[0, :, sl] = jnp.dot(p.astype(jnp.bfloat16), v[:, sl],
                                  preferred_element_type=jnp.float32)


def _mha_call(q_arr, q_bi, k_arr, k_bi, v_arr, v_bi, mask_i8, heads, HD,
              *, tq_target=256):
    """q_arr: [B, Sq, *], Q at block index `q_bi` (width HD) of its last dim;
    k_arr/v_arr: [B, Sk, *] likewise.  mask_i8: [B, Sq, Sk] int8 (1=attend)."""
    B, Sq = q_arr.shape[0], q_arr.shape[1]
    Sk = k_arr.shape[1]
    dh = HD // heads

    Sqp, tq = _fit(Sq, tq_target)
    if Sqp != Sq:
        q_arr = jnp.pad(q_arr, ((0, 0), (0, Sqp - Sq), (0, 0)))
        mask_i8 = jnp.pad(mask_i8, ((0, 0), (0, Sqp - Sq), (0, 0)))

    out = pl.pallas_call(
        functools.partial(_mha_kernel, heads=heads, dh=dh,
                          scale=1.0 / math.sqrt(dh)),
        out_shape=jax.ShapeDtypeStruct((B, Sqp, HD), jnp.float32),
        grid=(B, Sqp // tq),
        in_specs=[pl.BlockSpec((1, tq, HD), lambda b, s, bi=q_bi: (b, s, bi)),
                  pl.BlockSpec((1, Sk, HD), lambda b, s, bi=k_bi: (b, 0, bi)),
                  pl.BlockSpec((1, Sk, HD), lambda b, s, bi=v_bi: (b, 0, bi)),
                  pl.BlockSpec((1, tq, Sk), lambda b, s: (b, s, 0))],
        out_specs=pl.BlockSpec((1, tq, HD), lambda b, s: (b, s, 0)),
        compiler_params=pltpu.CompilerParams(
            dimension_semantics=("parallel", "parallel"),
            vmem_limit_bytes=_VMEM_LIMIT),
    )(q_arr, k_arr, v_arr, mask_i8)
    if Sqp != Sq:
        out = out[:, :Sq]
    return out


def mha_self(qkv, mask_i8, heads, HD):
    """qkv: [B, S, 3*HD] fused Q|K|V straight from the projection matmul."""
    if HD % 128 == 0:
        # BlockSpec index_maps pick Q/K/V out of the fused tensor: no XLA slices.
        return _mha_call(qkv, 0, qkv, 1, qkv, 2, mask_i8, heads, HD)
    # Fallback for non-lane-aligned head widths (e.g. tiny debug configs).
    q, k, v = qkv[..., :HD], qkv[..., HD:2 * HD], qkv[..., 2 * HD:]
    return _mha_call(q, 0, k, 0, v, 0, mask_i8, heads, HD)


def mha_cross(q, kv, mask_i8, heads, HD):
    """q: [B, St, HD]; kv: [B, Ss, 2*HD] fused K|V over the encoder output."""
    if HD % 128 == 0:
        return _mha_call(q, 0, kv, 0, kv, 1, mask_i8, heads, HD)
    k, v = kv[..., :HD], kv[..., HD:]
    return _mha_call(q, 0, k, 0, v, 0, mask_i8, heads, HD)


# ----------------------------- transformer blocks -----------------------------

def encoder_block(x, mask_i8, p, heads):
    B, S, Dm = x.shape
    M = B * S
    x2 = x.reshape(M, Dm)

    ap = p["self_attn"]
    HD = ap["wo"].shape[0]
    qkv = matmul(x2, ap["wqkv"], ap["bqkv"]).reshape(B, S, 3 * HD)   # fused Q|K|V
    ctx = mha_self(qkv, mask_i8, heads, HD).reshape(M, HD)
    x2 = matmul_add_ln(ctx, ap["wo"], ap["bo"], x2, p["ln1_g"], p["ln1_b"])

    fp = p["ffn"]
    h = matmul(x2, fp["w1"], fp["b1"], relu=True)
    x2 = matmul_add_ln(h, fp["w2"], fp["b2"], x2, p["ln2_g"], p["ln2_b"])
    return x2.reshape(B, S, Dm)


def decoder_block(y, enc_out, mask_tgt_i8, mask_src_i8, p, heads):
    B, St, Dm = y.shape
    Bs, Ss, _ = enc_out.shape
    M = B * St
    y2 = y.reshape(M, Dm)

    # masked self-attention
    ap = p["self_attn"]
    HD = ap["wo"].shape[0]
    qkv = matmul(y2, ap["wqkv"], ap["bqkv"]).reshape(B, St, 3 * HD)
    ctx = mha_self(qkv, mask_tgt_i8, heads, HD).reshape(M, HD)
    y2 = matmul_add_ln(ctx, ap["wo"], ap["bo"], y2, p["ln1_g"], p["ln1_b"])

    # cross-attention (K|V fused over encoder output)
    cp = p["cross_attn"]
    HD = cp["wo"].shape[0]
    q = matmul(y2, cp["wq"], cp["bq"]).reshape(B, St, HD)
    kv = matmul(enc_out.reshape(Bs * Ss, Dm), cp["wkv"], cp["bkv"]).reshape(B, Ss, 2 * HD)
    ctx = mha_cross(q, kv, mask_src_i8, heads, HD).reshape(M, HD)
    y2 = matmul_add_ln(ctx, cp["wo"], cp["bo"], y2, p["ln2_g"], p["ln2_b"])

    # feed-forward
    fp = p["ffn"]
    h = matmul(y2, fp["w1"], fp["b1"], relu=True)
    y2 = matmul_add_ln(h, fp["w2"], fp["b2"], y2, p["ln3_g"], p["ln3_b"])
    return y2.reshape(B, St, Dm)


def transformer_forward(params, x_tok, y_tok, mask_encoder, mask_decoder,
                        heads, block_nums):
    # embedding lookups + positional embedding (glue, not a Pallas hot path)
    x = params["src_emb"][x_tok] + params["pos_emb"][: x_tok.shape[-1]]
    y = params["tgt_emb"][y_tok] + params["pos_emb"][: y_tok.shape[-1]]

    # int8 masks: 4x less DMA into every attention kernel (widened in-kernel)
    mask_enc_i8 = (mask_encoder != 0).astype(jnp.int8)
    mask_dec_i8 = (mask_decoder != 0).astype(jnp.int8)
    mask_src_i8 = mask_enc_i8[:, : mask_decoder.shape[-2], :]

    for i in range(block_nums):
        x = encoder_block(x, mask_enc_i8, params["enc"][i], heads)

    for i in range(block_nums):
        y = decoder_block(y, x, mask_dec_i8, mask_src_i8, params["dec"][i], heads)

    B, St, Dm = y.shape
    vocab = params["w_out"].shape[1]
    out = matmul(y.reshape(B * St, Dm), params["w_out"], params["b_out"])
    return out.reshape(B, St, vocab)


# ----------------------------- parameter init -----------------------------

def init_params(key, d_model, d_head, heads, d_ff, vocab_src, vocab_tgt,
                max_len, block_nums):
    keys = iter(jax.random.split(key, 4096))

    def dense(din, dout):
        w = 0.02 * jax.random.normal(next(keys), (din, dout), jnp.float32)
        b = jnp.zeros((dout,), jnp.float32)
        return w, b

    def attn_self_params():
        wq, bq = dense(d_model, heads * d_head)
        wk, bk = dense(d_model, heads * d_head)
        wv, bv = dense(d_model, heads * d_head)
        wo, bo = dense(heads * d_head, d_model)
        return dict(wqkv=jnp.concatenate([wq, wk, wv], axis=1),
                    bqkv=jnp.concatenate([bq, bk, bv]),
                    wo=wo, bo=bo)

    def attn_cross_params():
        wq, bq = dense(d_model, heads * d_head)
        wk, bk = dense(d_model, heads * d_head)
        wv, bv = dense(d_model, heads * d_head)
        wo, bo = dense(heads * d_head, d_model)
        return dict(wq=wq, bq=bq,
                    wkv=jnp.concatenate([wk, wv], axis=1),
                    bkv=jnp.concatenate([bk, bv]),
                    wo=wo, bo=bo)

    def ffn_params():
        w1, b1 = dense(d_model, d_ff)
        w2, b2 = dense(d_ff, d_model)
        return dict(w1=w1, b1=b1, w2=w2, b2=b2)

    def ln():
        return jnp.ones((d_model,), jnp.float32), jnp.zeros((d_model,), jnp.float32)

    enc_blocks, dec_blocks = [], []
    for _ in range(block_nums):
        g1, b1 = ln(); g2, b2 = ln()
        enc_blocks.append(dict(self_attn=attn_self_params(), ffn=ffn_params(),
                               ln1_g=g1, ln1_b=b1, ln2_g=g2, ln2_b=b2))
        g1, b1 = ln(); g2, b2 = ln(); g3, b3 = ln()
        dec_blocks.append(dict(self_attn=attn_self_params(),
                               cross_attn=attn_cross_params(),
                               ffn=ffn_params(),
                               ln1_g=g1, ln1_b=b1, ln2_g=g2, ln2_b=b2,
                               ln3_g=g3, ln3_b=b3))

    # sinusoidal positional embedding (same recipe as the PyTorch __init__)
    position = jnp.arange(max_len, dtype=jnp.float32)[:, None]
    div_term = jnp.exp(jnp.arange(0, d_model, 2, dtype=jnp.float32)
                       * -(math.log(10000.0) / d_model))
    pe_arg = position * div_term
    pos_emb = jnp.zeros((max_len, d_model), jnp.float32)
    pos_emb = pos_emb.at[:, 0::2].set(jnp.sin(pe_arg))
    pos_emb = pos_emb.at[:, 1::2].set(jnp.cos(pe_arg))

    w_out, b_out = dense(d_model, vocab_tgt)
    return dict(
        src_emb=0.02 * jax.random.normal(next(keys), (vocab_src, d_model), jnp.float32),
        tgt_emb=0.02 * jax.random.normal(next(keys), (vocab_tgt, d_model), jnp.float32),
        pos_emb=pos_emb,
        enc=enc_blocks, dec=dec_blocks,
        w_out=w_out, b_out=b_out,
    )


# ----------------------------- main -----------------------------

if __name__ == "__main__":
    # Small, lane-aligned shapes consistent with the module (scaled down from
    # 512/2048/8/6).  heads*d_head = 128 keeps the fused-QKV BlockSpec path on.
    d_model, heads = 128, 4
    d_head = d_model // heads
    d_ff = 256
    vocab_src = vocab_tgt = 100
    max_len = 64
    block_nums = 2
    batch, seq_src, seq_tgt = 2, 8, 8

    key = jax.random.PRNGKey(0)
    k_param, k_x, k_y = jax.random.split(key, 3)

    params = init_params(k_param, d_model, d_head, heads, d_ff,
                         vocab_src, vocab_tgt, max_len, block_nums)

    x_tok = jax.random.randint(k_x, (batch, seq_src), 0, vocab_src, dtype=jnp.int32)
    y_tok = jax.random.randint(k_y, (batch, seq_tgt), 0, vocab_tgt, dtype=jnp.int32)

    # mask convention: 1.0 = attend, 0.0 = blocked (filled with -1e9 in-kernel)
    mask_encoder = jnp.ones((batch, seq_src, seq_src), jnp.float32)
    mask_decoder = jnp.tril(jnp.ones((seq_tgt, seq_tgt), jnp.float32))[None]
    mask_decoder = jnp.broadcast_to(mask_decoder, (batch, seq_tgt, seq_tgt))

    fwd = jax.jit(functools.partial(transformer_forward,
                                    heads=heads, block_nums=block_nums))
    out = fwd(params, x_tok, y_tok, mask_encoder, mask_decoder)
    out = jax.block_until_ready(out)
    assert out.shape == (batch, seq_tgt, vocab_tgt)
    assert bool(jnp.all(jnp.isfinite(out)))
    print("KERNEL_OK")
</pallas_src>

<mosaic_0001>
module attributes {stable_mosaic.version = 11 : i64} {
  func.func @_matmul_kernel(%arg0: i32, %arg1: i32, %arg2: i32, %arg3: memref<16x128xf32, #tpu.memory_space<vmem>>, %arg4: memref<128x384xf32, #tpu.memory_space<vmem>>, %arg5: memref<1x384xf32, #tpu.memory_space<vmem>>, %arg6: memref<16x384xf32, #tpu.memory_space<vmem>>, %arg7: memref<16x384xf32, #tpu.memory_space<vmem>>) attributes {dimension_semantics = [#tpu.dimension_semantics<parallel>, #tpu.dimension_semantics<parallel>, #tpu.dimension_semantics<arbitrary>], iteration_bounds = array<i64: 1, 1, 1>, scalar_prefetch = 0 : i64, scratch_operands = 1 : i64, tpu.core_type = #tpu.core_type<tc>, window_params = [{transform_indices = @transform_0, window_bounds = array<i64: 16, 128>}, {transform_indices = @transform_1, window_bounds = array<i64: 128, 384>}, {transform_indices = @transform_2, window_bounds = array<i64: 1, 384>}, {transform_indices = @transform_3, window_bounds = array<i64: 16, 384>}]} {
    %c0_i32 = arith.constant 0 : i32
    %0 = arith.cmpi eq, %arg2, %c0_i32 : i32
    %1 = arith.extui %0 : i1 to i32
    %c0_i32_0 = arith.constant 0 : i32
    %2 = arith.cmpi ne, %1, %c0_i32_0 : i32
    scf.if %2 {
      %cst_10 = arith.constant 0.000000e+00 : f32
      %14 = vector.broadcast %cst_10 : f32 to vector<16x384xf32>
      %c0_11 = arith.constant 0 : index
      %c0_12 = arith.constant 0 : index
      %15 = vector.load %arg7[%c0_11, %c0_12] : memref<16x384xf32, #tpu.memory_space<vmem>>, vector<16x384xf32>
      tpu.vector_store %arg7[%c0_11, %c0_12], %14 {strides = array<i32>} : memref<16x384xf32, #tpu.memory_space<vmem>>, vector<16x384xf32>,
    } else {
    }
    %c0 = arith.constant 0 : index
    %c0_1 = arith.constant 0 : index
    %3 = vector.load %arg7[%c0, %c0_1] : memref<16x384xf32, #tpu.memory_space<vmem>>, vector<16x384xf32>
    %c0_2 = arith.constant 0 : index
    %c0_3 = arith.constant 0 : index
    %4 = vector.load %arg3[%c0_2, %c0_3] : memref<16x128xf32, #tpu.memory_space<vmem>>, vector<16x128xf32>
    %5 = arith.truncf %4 : vector<16x128xf32> to vector<16x128xbf16>
    %c0_4 = arith.constant 0 : index
    %c0_5 = arith.constant 0 : index
    %6 = vector.load %arg4[%c0_4, %c0_5] : memref<128x384xf32, #tpu.memory_space<vmem>>, vector<128x384xf32>
    %7 = arith.truncf %6 : vector<128x384xf32> to vector<128x384xbf16>
    %cst = arith.constant dense<0.000000e+00> : vector<16x384xf32>
    %8 = tpu.matmul %5, %7, %cst {dimension_numbers = #tpu.dot_dimension_numbers<[1], [0], [0], [1], [0, 0, 1, 1], [], []>} : vector<16x128xbf16>, vector<128x384xbf16>, vector<16x384xf32> -> vector<16x384xf32>
    %9 = arith.addf %3, %8 : vector<16x384xf32>
    %c0_6 = arith.constant 0 : index
    %c0_7 = arith.constant 0 : index
    %10 = vector.load %arg7[%c0_6, %c0_7] : memref<16x384xf32, #tpu.memory_space<vmem>>, vector<16x384xf32>
    tpu.vector_store %arg7[%c0_6, %c0_7], %9 {strides = array<i32>} : memref<16x384xf32, #tpu.memory_space<vmem>>, vector<16x384xf32>,
    %c0_i32_8 = arith.constant 0 : i32
    %11 = arith.cmpi eq, %arg2, %c0_i32_8 : i32
    %12 = arith.extui %11 : i1 to i32
    %c0_i32_9 = arith.constant 0 : i32
    %13 = arith.cmpi ne, %12, %c0_i32_9 : i32
    scf.if %13 {
      %c0_10 = arith.constant 0 : index
      %c0_11 = arith.constant 0 : index
      %14 = vector.load %arg7[%c0_10, %c0_11] : memref<16x384xf32, #tpu.memory_space<vmem>>, vector<16x384xf32>
      %c0_12 = arith.constant 0 : index
      %c0_13 = arith.constant 0 : index
      %15 = vector.load %arg5[%c0_12, %c0_13] : memref<1x384xf32, #tpu.memory_space<vmem>>, vector<1x384xf32>
      %16 = vector.broadcast %15 : vector<1x384xf32> to vector<16x384xf32>
      %17 = arith.addf %14, %16 : vector<16x384xf32>
      %c0_14 = arith.constant 0 : index
      %c0_15 = arith.constant 0 : index
      %18 = vector.load %arg6[%c0_14, %c0_15] : memref<16x384xf32, #tpu.memory_space<vmem>>, vector<16x384xf32>
      tpu.vector_store %arg6[%c0_14, %c0_15], %17 {strides = array<i32>} : memref<16x384xf32, #tpu.memory_space<vmem>>, vector<16x384xf32>,
    } else {
    }
    return
  }
  func.func @transform_0(%arg0: i32, %arg1: i32, %arg2: i32) -> (i32, i32) {
    %c0_i32 = arith.constant 0 : i32
    return %arg0, %arg2 : i32, i32
  }
  func.func @transform_1(%arg0: i32, %arg1: i32, %arg2: i32) -> (i32, i32) {
    %c0_i32 = arith.constant 0 : i32
    return %arg2, %arg1 : i32, i32
  }
  func.func @transform_2(%arg0: i32, %arg1: i32, %arg2: i32) -> (i32, i32) {
    %c0_i32 = arith.constant 0 : i32
    %c0_i32_0 = arith.constant 0 : i32
    return %c0_i32, %arg1 : i32, i32
  }
  func.func @transform_3(%arg0: i32, %arg1: i32, %arg2: i32) -> (i32, i32) {
    %c0_i32 = arith.constant 0 : i32
    return %arg0, %arg1 : i32, i32
  }
}

module attributes {stable_mosaic.version = 11 : i64} {
  func.func @_mha_kernel(%arg0: i32, %arg1: i32, %arg2: memref<1x8x128xf32, #tpu.memory_space<vmem>>, %arg3: memref<1x8x128xf32, #tpu.memory_space<vmem>>, %arg4: memref<1x8x128xf32, #tpu.memory_space<vmem>>, %arg5: memref<1x8x8xi8, #tpu.memory_space<vmem>>, %arg6: memref<1x8x128xf32, #tpu.memory_space<vmem>>) attributes {dimension_semantics = [#tpu.dimension_semantics<parallel>, #tpu.dimension_semantics<parallel>], iteration_bounds = array<i64: 2, 1>, scalar_prefetch = 0 : i64, scratch_operands = 0 : i64, tpu.core_type = #tpu.core_type<tc>, window_params = [{transform_indices = @transform_0, window_bounds = array<i64: 1, 8, 128>}, {transform_indices = @transform_1, window_bounds = array<i64: 1, 8, 128>}, {transform_indices = @transform_2, window_bounds = array<i64: 1, 8, 128>}, {transform_indices = @transform_3, window_bounds = array<i64: 1, 8, 8>}, {transform_indices = @transform_4, window_bounds = array<i64: 1, 8, 128>}]} {
    %c0 = arith.constant 0 : index
    %c0_0 = arith.constant 0 : index
    %c0_1 = arith.constant 0 : index
    %0 = vector.load %arg2[%c0, %c0_0, %c0_1] : memref<1x8x128xf32, #tpu.memory_space<vmem>>, vector<1x8x128xf32>
    %1 = vector.shape_cast %0 : vector<1x8x128xf32> to vector<8x128xf32>
    %2 = arith.truncf %1 : vector<8x128xf32> to vector<8x128xbf16>
    %c0_2 = arith.constant 0 : index
    %c0_3 = arith.constant 0 : index
    %c0_4 = arith.constant 0 : index
    %3 = vector.load %arg3[%c0_2, %c0_3, %c0_4] : memref<1x8x128xf32, #tpu.memory_space<vmem>>, vector<1x8x128xf32>
    %4 = vector.shape_cast %3 : vector<1x8x128xf32> to vector<8x128xf32>
    %5 = tpu.transpose %4, [1, 0] : vector<8x128xf32> -> vector<128x8xf32>
    %6 = arith.truncf %5 : vector<128x8xf32> to vector<128x8xbf16>
    %c0_5 = arith.constant 0 : index
    %c0_6 = arith.constant 0 : index
    %c0_7 = arith.constant 0 : index
    %7 = vector.load %arg4[%c0_5, %c0_6, %c0_7] : memref<1x8x128xf32, #tpu.memory_space<vmem>>, vector<1x8x128xf32>
    %8 = vector.shape_cast %7 : vector<1x8x128xf32> to vector<8x128xf32>
    %9 = arith.truncf %8 : vector<8x128xf32> to vector<8x128xbf16>
    %c0_8 = arith.constant 0 : index
    %c0_9 = arith.constant 0 : index
    %c0_10 = arith.constant 0 : index
    %10 = vector.load %arg5[%c0_8, %c0_9, %c0_10] : memref<1x8x8xi8, #tpu.memory_space<vmem>>, vector<1x8x8xi8>
    %11 = vector.shape_cast %10 : vector<1x8x8xi8> to vector<8x8xi8>
    %12 = arith.sitofp %11 : vector<8x8xi8> to vector<8x8xf32>
    %cst = arith.constant 0.000000e+00 : f32
    %13 = vector.broadcast %cst : f32 to vector<8x8xf32>
    %14 = arith.cmpf one, %12, %13 : vector<8x8xf32>
    %15 = vector.extract_strided_slice %2 {offsets = [0, 0], sizes = [8, 32], strides = [1, 1]} : vector<8x128xbf16> to vector<8x32xbf16>
    %16 = vector.extract_strided_slice %6 {offsets = [0, 0], sizes = [32, 8], strides = [1, 1]} : vector<128x8xbf16> to vector<32x8xbf16>
    %cst_11 = arith.constant dense<0.000000e+00> : vector<8x8xf32>
    %17 = tpu.matmul %15, %16, %cst_11 {dimension_numbers = #tpu.dot_dimension_numbers<[1], [0], [0], [1], [0, 0, 1, 1], [], []>} : vector<8x32xbf16>, vector<32x8xbf16>, vector<8x8xf32> -> vector<8x8xf32>
    %cst_12 = arith.constant 0.176776692 : f32
    %18 = vector.broadcast %cst_12 : f32 to vector<8x8xf32>
    %19 = arith.mulf %17, %18 : vector<8x8xf32>
    %cst_13 = arith.constant -1.000000e+09 : f32
    %20 = vector.broadcast %cst_13 : f32 to vector<8x8xf32>
    %21 = arith.select %14, %19, %20 : vector<8x8xi1>, vector<8x8xf32>
    %cst_14 = arith.constant dense<0xFF800000> : vector<8xf32>
    %22 = vector.multi_reduction <maximumf>, %21, %cst_14 [1] : vector<8x8xf32> to vector<8xf32>
    %23 = vector.shape_cast %22 : vector<8xf32> to vector<8x1xf32>
    %24 = vector.broadcast %23 : vector<8x1xf32> to vector<8x8xf32>
    %25 = arith.subf %21, %24 : vector<8x8xf32>
    %26 = math.exp %25 : vector<8x8xf32>
    %cst_15 = arith.constant dense<0.000000e+00> : vector<8xf32>
    %27 = vector.multi_reduction <add>, %26, %cst_15 [1] : vector<8x8xf32> to vector<8xf32>
    %28 = vector.shape_cast %27 : vector<8xf32> to vector<8x1xf32>
    %29 = vector.broadcast %28 : vector<8x1xf32> to vector<8x8xf32>
    %30 = arith.divf %26, %29 : vector<8x8xf32>
    %31 = arith.truncf %30 : vector<8x8xf32> to vector<8x8xbf16>
    %32 = vector.extract_strided_slice %9 {offsets = [0, 0], sizes = [8, 32], strides = [1, 1]} : vector<8x128xbf16> to vector<8x32xbf16>
    %cst_16 = arith.constant dense<0.000000e+00> : vector<8x32xf32>
    %33 = tpu.matmul %31, %32, %cst_16 {dimension_numbers = #tpu.dot_dimension_numbers<[1], [0], [0], [1], [0, 0, 1, 1], [], []>} : vector<8x8xbf16>, vector<8x32xbf16>, vector<8x32xf32> -> vector<8x32xf32>
    %c0_17 = arith.constant 0 : index
    %c0_18 = arith.constant 0 : index
    %c0_19 = arith.constant 0 : index
    %34 = vector.load %arg6[%c0_17, %c0_18, %c0_19] : memref<1x8x128xf32, #tpu.memory_space<vmem>>, vector<1x8x32xf32>
    %35 = vector.shape_cast %34 : vector<1x8x32xf32> to vector<8x32xf32>
    %36 = vector.shape_cast %33 : vector<8x32xf32> to vector<1x8x32xf32>
    tpu.vector_store %arg6[%c0_17, %c0_18, %c0_19], %36 {strides = array<i32>} : memref<1x8x128xf32, #tpu.memory_space<vmem>>, vector<1x8x32xf32>,
    %37 = vector.extract_strided_slice %2 {offsets = [0, 32], sizes = [8, 32], strides = [1, 1]} : vector<8x128xbf16> to vector<8x32xbf16>
    %38 = vector.extract_strided_slice %6 {offsets = [32, 0], sizes = [32, 8], strides = [1, 1]} : vector<128x8xbf16> to vector<32x8xbf16>
    %cst_20 = arith.constant dense<0.000000e+00> : vector<8x8xf32>
    %39 = tpu.matmul %37, %38, %cst_20 {dimension_numbers = #tpu.dot_dimension_numbers<[1], [0], [0], [1], [0, 0, 1, 1], [], []>} : vector<8x32xbf16>, vector<32x8xbf16>, vector<8x8xf32> -> vector<8x8xf32>
    %cst_21 = arith.constant 0.176776692 : f32
    %40 = vector.broadcast %cst_21 : f32 to vector<8x8xf32>
    %41 = arith.mulf %39, %40 : vector<8x8xf32>
    %cst_22 = arith.constant -1.000000e+09 : f32
    %42 = vector.broadcast %cst_22 : f32 to vector<8x8xf32>
    %43 = arith.select %14, %41, %42 : vector<8x8xi1>, vector<8x8xf32>
    %cst_23 = arith.constant dense<0xFF800000> : vector<8xf32>
    %44 = vector.multi_reduction <maximumf>, %43, %cst_23 [1] : vector<8x8xf32> to vector<8xf32>
    %45 = vector.shape_cast %44 : vector<8xf32> to vector<8x1xf32>
    %46 = vector.broadcast %45 : vector<8x1xf32> to vector<8x8xf32>
    %47 = arith.subf %43, %46 : vector<8x8xf32>
    %48 = math.exp %47 : vector<8x8xf32>
    %cst_24 = arith.constant dense<0.000000e+00> : vector<8xf32>
    %49 = vector.multi_reduction <add>, %48, %cst_24 [1] : vector<8x8xf32> to vector<8xf32>
    %50 = vector.shape_cast %49 : vector<8xf32> to vector<8x1xf32>
    %51 = vector.broadcast %50 : vector<8x1xf32> to vector<8x8xf32>
    %52 = arith.divf %48, %51 : vector<8x8xf32>
    %53 = arith.truncf %52 : vector<8x8xf32> to vector<8x8xbf16>
    %54 = vector.extract_strided_slice %9 {offsets = [0, 32], sizes = [8, 32], strides = [1, 1]} : vector<8x128xbf16> to vector<8x32xbf16>
    %cst_25 = arith.constant dense<0.000000e+00> : vector<8x32xf32>
    %55 = tpu.matmul %53, %54, %cst_25 {dimension_numbers = #tpu.dot_dimension_numbers<[1], [0], [0], [1], [0, 0, 1, 1], [], []>} : vector<8x8xbf16>, vector<8x32xbf16>, vector<8x32xf32> -> vector<8x32xf32>
    %c0_26 = arith.constant 0 : index
    %c0_27 = arith.constant 0 : index
    %c32 = arith.constant 32 : index
    %56 = vector.load %arg6[%c0_26, %c0_27, %c32] : memref<1x8x128xf32, #tpu.memory_space<vmem>>, vector<1x8x32xf32>
    %57 = vector.shape_cast %56 : vector<1x8x32xf32> to vector<8x32xf32>
    %58 = vector.shape_cast %55 : vector<8x32xf32> to vector<1x8x32xf32>
    tpu.vector_store %arg6[%c0_26, %c0_27, %c32], %58 {strides = array<i32>} : memref<1x8x128xf32, #tpu.memory_space<vmem>>, vector<1x8x32xf32>,
    %59 = vector.extract_strided_slice %2 {offsets = [0, 64], sizes = [8, 32], strides = [1, 1]} : vector<8x128xbf16> to vector<8x32xbf16>
    %60 = vector.extract_strided_slice %6 {offsets = [64, 0], sizes = [32, 8], strides = [1, 1]} : vector<128x8xbf16> to vector<32x8xbf16>
    %cst_28 = arith.constant dense<0.000000e+00> : vector<8x8xf32>
    %61 = tpu.matmul %59, %60, %cst_28 {dimension_numbers = #tpu.dot_dimension_numbers<[1], [0], [0], [1], [0, 0, 1, 1], [], []>} : vector<8x32xbf16>, vector<32x8xbf16>, vector<8x8xf32> -> vector<8x8xf32>
    %cst_29 = arith.constant 0.176776692 : f32
    %62 = vector.broadcast %cst_29 : f32 to vector<8x8xf32>
    %63 = arith.mulf %61, %62 : vector<8x8xf32>
    %cst_30 = arith.constant -1.000000e+09 : f32
    %64 = vector.broadcast %cst_30 : f32 to vector<8x8xf32>
    %65 = arith.select %14, %63, %64 : vector<8x8xi1>, vector<8x8xf32>
    %cst_31 = arith.constant dense<0xFF800000> : vector<8xf32>
    %66 = vector.multi_reduction <maximumf>, %65, %cst_31 [1] : vector<8x8xf32> to vector<8xf32>
    %67 = vector.shape_cast %66 : vector<8xf32> to vector<8x1xf32>
    %68 = vector.broadcast %67 : vector<8x1xf32> to vector<8x8xf32>
    %69 = arith.subf %65, %68 : vector<8x8xf32>
    %70 = math.exp %69 : vector<8x8xf32>
    %cst_32 = arith.constant dense<0.000000e+00> : vector<8xf32>
    %71 = vector.multi_reduction <add>, %70, %cst_32 [1] : vector<8x8xf32> to vector<8xf32>
    %72 = vector.shape_cast %71 : vector<8xf32> to vector<8x1xf32>
    %73 = vector.broadcast %72 : vector<8x1xf32> to vector<8x8xf32>
    %74 = arith.divf %70, %73 : vector<8x8xf32>
    %75 = arith.truncf %74 : vector<8x8xf32> to vector<8x8xbf16>
    %76 = vector.extract_strided_slice %9 {offsets = [0, 64], sizes = [8, 32], strides = [1, 1]} : vector<8x128xbf16> to vector<8x32xbf16>
    %cst_33 = arith.constant dense<0.000000e+00> : vector<8x32xf32>
    %77 = tpu.matmul %75, %76, %cst_33 {dimension_numbers = #tpu.dot_dimension_numbers<[1], [0], [0], [1], [0, 0, 1, 1], [], []>} : vector<8x8xbf16>, vector<8x32xbf16>, vector<8x32xf32> -> vector<8x32xf32>
    %c0_34 = arith.constant 0 : index
    %c0_35 = arith.constant 0 : index
    %c64 = arith.constant 64 : index
    %78 = vector.load %arg6[%c0_34, %c0_35, %c64] : memref<1x8x128xf32, #tpu.memory_space<vmem>>, vector<1x8x32xf32>
    %79 = vector.shape_cast %78 : vector<1x8x32xf32> to vector<8x32xf32>
    %80 = vector.shape_cast %77 : vector<8x32xf32> to vector<1x8x32xf32>
    tpu.vector_store %arg6[%c0_34, %c0_35, %c64], %80 {strides = array<i32>} : memref<1x8x128xf32, #tpu.memory_space<vmem>>, vector<1x8x32xf32>,
    %81 = vector.extract_strided_slice %2 {offsets = [0, 96], sizes = [8, 32], strides = [1, 1]} : vector<8x128xbf16> to vector<8x32xbf16>
    %82 = vector.extract_strided_slice %6 {offsets = [96, 0], sizes = [32, 8], strides = [1, 1]} : vector<128x8xbf16> to vector<32x8xbf16>
    %cst_36 = arith.constant dense<0.000000e+00> : vector<8x8xf32>
    %83 = tpu.matmul %81, %82, %cst_36 {dimension_numbers = #tpu.dot_dimension_numbers<[1], [0], [0], [1], [0, 0, 1, 1], [], []>} : vector<8x32xbf16>, vector<32x8xbf16>, vector<8x8xf32> -> vector<8x8xf32>
    %cst_37 = arith.constant 0.176776692 : f32
    %84 = vector.broadcast %cst_37 : f32 to vector<8x8xf32>
    %85 = arith.mulf %83, %84 : vector<8x8xf32>
    %cst_38 = arith.constant -1.000000e+09 : f32
    %86 = vector.broadcast %cst_38 : f32 to vector<8x8xf32>
    %87 = arith.select %14, %85, %86 : vector<8x8xi1>, vector<8x8xf32>
    %cst_39 = arith.constant dense<0xFF800000> : vector<8xf32>
    %88 = vector.multi_reduction <maximumf>, %87, %cst_39 [1] : vector<8x8xf32> to vector<8xf32>
    %89 = vector.shape_cast %88 : vector<8xf32> to vector<8x1xf32>
    %90 = vector.broadcast %89 : vector<8x1xf32> to vector<8x8xf32>
    %91 = arith.subf %87, %90 : vector<8x8xf32>
    %92 = math.exp %91 : vector<8x8xf32>
    %cst_40 = arith.constant dense<0.000000e+00> : vector<8xf32>
    %93 = vector.multi_reduction <add>, %92, %cst_40 [1] : vector<8x8xf32> to vector<8xf32>
    %94 = vector.shape_cast %93 : vector<8xf32> to vector<8x1xf32>
    %95 = vector.broadcast %94 : vector<8x1xf32> to vector<8x8xf32>
    %96 = arith.divf %92, %95 : vector<8x8xf32>
    %97 = arith.truncf %96 : vector<8x8xf32> to vector<8x8xbf16>
    %98 = vector.extract_strided_slice %9 {offsets = [0, 96], sizes = [8, 32], strides = [1, 1]} : vector<8x128xbf16> to vector<8x32xbf16>
    %cst_41 = arith.constant dense<0.000000e+00> : vector<8x32xf32>
    %99 = tpu.matmul %97, %98, %cst_41 {dimension_numbers = #tpu.dot_dimension_numbers<[1], [0], [0], [1], [0, 0, 1, 1], [], []>} : vector<8x8xbf16>, vector<8x32xbf16>, vector<8x32xf32> -> vector<8x32xf32>
    %c0_42 = arith.constant 0 : index
    %c0_43 = arith.constant 0 : index
    %c96 = arith.constant 96 : index
    %100 = vector.load %arg6[%c0_42, %c0_43, %c96] : memref<1x8x128xf32, #tpu.memory_space<vmem>>, vector<1x8x32xf32>
    %101 = vector.shape_cast %100 : vector<1x8x32xf32> to vector<8x32xf32>
    %102 = vector.shape_cast %99 : vector<8x32xf32> to vector<1x8x32xf32>
    tpu.vector_store %arg6[%c0_42, %c0_43, %c96], %102 {strides = array<i32>} : memref<1x8x128xf32, #tpu.memory_space<vmem>>, vector<1x8x32xf32>,
    return
  }
  func.func @transform_0(%arg0: i32, %arg1: i32) -> (i32, i32, i32) {
    %c0_i32 = arith.constant 0 : i32
    %c0_i32_0 = arith.constant 0 : i32
    return %arg0, %arg1, %c0_i32 : i32, i32, i32
  }
  func.func @transform_1(%arg0: i32, %arg1: i32) -> (i32, i32, i32) {
    %c0_i32 = arith.constant 0 : i32
    %c1_i32 = arith.constant 1 : i32
    %c0_i32_0 = arith.constant 0 : i32
    return %arg0, %c0_i32, %c1_i32 : i32, i32, i32
  }
  func.func @transform_2(%arg0: i32, %arg1: i32) -> (i32, i32, i32) {
    %c0_i32 = arith.constant 0 : i32
    %c2_i32 = arith.constant 2 : i32
    %c0_i32_0 = arith.constant 0 : i32
    return %arg0, %c0_i32, %c2_i32 : i32, i32, i32
  }
  func.func @transform_3(%arg0: i32, %arg1: i32) -> (i32, i32, i32) {
    %c0_i32 = arith.constant 0 : i32
    %c0_i32_0 = arith.constant 0 : i32
    return %arg0, %arg1, %c0_i32 : i32, i32, i32
  }
  func.func @transform_4(%arg0: i32, %arg1: i32) -> (i32, i32, i32) {
    %c0_i32 = arith.constant 0 : i32
    %c0_i32_0 = arith.constant 0 : i32
    return %arg0, %arg1, %c0_i32 : i32, i32, i32
  }
}

module attributes {stable_mosaic.version = 11 : i64} {
  func.func @_matmul_ln_kernel(%arg0: i32, %arg1: i32, %arg2: memref<16x128xf32, #tpu.memory_space<vmem>>, %arg3: memref<128x128xf32, #tpu.memory_space<vmem>>, %arg4: memref<1x128xf32, #tpu.memory_space<vmem>>, %arg5: memref<16x128xf32, #tpu.memory_space<vmem>>, %arg6: memref<1x128xf32, #tpu.memory_space<vmem>>, %arg7: memref<1x128xf32, #tpu.memory_space<vmem>>, %arg8: memref<16x128xf32, #tpu.memory_space<vmem>>, %arg9: memref<16x128xf32, #tpu.memory_space<vmem>>) attributes {dimension_semantics = [#tpu.dimension_semantics<parallel>, #tpu.dimension_semantics<arbitrary>], iteration_bounds = array<i64: 1, 1>, scalar_prefetch = 0 : i64, scratch_operands = 1 : i64, tpu.core_type = #tpu.core_type<tc>, window_params = [{transform_indices = @transform_0, window_bounds = array<i64: 16, 128>}, {transform_indices = @transform_1, window_bounds = array<i64: 128, 128>}, {pipeline_mode = #tpu.pipeline_mode<synchronous>, transform_indices = @transform_2, window_bounds = array<i64: 1, 128>}, {transform_indices = @transform_3, window_bounds = array<i64: 16, 128>}, {pipeline_mode = #tpu.pipeline_mode<synchronous>, transform_indices = @transform_4, window_bounds = array<i64: 1, 128>}, {pipeline_mode = #tpu.pipeline_mode<synchronous>, transform_indices = @transform_5, window_bounds = array<i64: 1, 128>}, {transform_indices = @transform_6, window_bounds = array<i64: 16, 128>}]} {
    %c0_i32 = arith.constant 0 : i32
    %0 = arith.cmpi eq, %arg1, %c0_i32 : i32
    %1 = arith.extui %0 : i1 to i32
    %c0_i32_0 = arith.constant 0 : i32
    %2 = arith.cmpi ne, %1, %c0_i32_0 : i32
    scf.if %2 {
      %cst_10 = arith.constant 0.000000e+00 : f32
      %14 = vector.broadcast %cst_10 : f32 to vector<16x128xf32>
      %c0_11 = arith.constant 0 : index
      %c0_12 = arith.constant 0 : index
      %15 = vector.load %arg9[%c0_11, %c0_12] : memref<16x128xf32, #tpu.memory_space<vmem>>, vector<16x128xf32>
      tpu.vector_store %arg9[%c0_11, %c0_12], %14 {strides = array<i32>} : memref<16x128xf32, #tpu.memory_space<vmem>>, vector<16x128xf32>,
    } else {
    }
    %c0 = arith.constant 0 : index
    %c0_1 = arith.constant 0 : index
    %3 = vector.load %arg9[%c0, %c0_1] : memref<16x128xf32, #tpu.memory_space<vmem>>, vector<16x128xf32>
    %c0_2 = arith.constant 0 : index
    %c0_3 = arith.constant 0 : index
    %4 = vector.load %arg2[%c0_2, %c0_3] : memref<16x128xf32, #tpu.memory_space<vmem>>, vector<16x128xf32>
    %5 = arith.truncf %4 : vector<16x128xf32> to vector<16x128xbf16>
    %c0_4 = arith.constant 0 : index
    %c0_5 = arith.constant 0 : index
    %6 = vector.load %arg3[%c0_4, %c0_5] : memref<128x128xf32, #tpu.memory_space<vmem>>, vector<128x128xf32>
    %7 = arith.truncf %6 : vector<128x128xf32> to vector<128x128xbf16>
    %cst = arith.constant dense<0.000000e+00> : vector<16x128xf32>
    %8 = tpu.matmul %5, %7, %cst {dimension_numbers = #tpu.dot_dimension_numbers<[1], [0], [0], [1], [0, 0, 1, 1], [], []>} : vector<16x128xbf16>, vector<128x128xbf16>, vector<16x128xf32> -> vector<16x128xf32>
    %9 = arith.addf %3, %8 : vector<16x128xf32>
    %c0_6 = arith.constant 0 : index
    %c0_7 = arith.constant 0 : index
    %10 = vector.load %arg9[%c0_6, %c0_7] : memref<16x128xf32, #tpu.memory_space<vmem>>, vector<16x128xf32>
    tpu.vector_store %arg9[%c0_6, %c0_7], %9 {strides = array<i32>} : memref<16x128xf32, #tpu.memory_space<vmem>>, vector<16x128xf32>,
    %c0_i32_8 = arith.constant 0 : i32
    %11 = arith.cmpi eq, %arg1, %c0_i32_8 : i32
    %12 = arith.extui %11 : i1 to i32
    %c0_i32_9 = arith.constant 0 : i32
    %13 = arith.cmpi ne, %12, %c0_i32_9 : i32
    scf.if %13 {
      %c0_10 = arith.constant 0 : index
      %c0_11 = arith.constant 0 : index
      %14 = vector.load %arg9[%c0_10, %c0_11] : memref<16x128xf32, #tpu.memory_space<vmem>>, vector<16x128xf32>
      %c0_12 = arith.constant 0 : index
      %c0_13 = arith.constant 0 : index
      %15 = vector.load %arg4[%c0_12, %c0_13] : memref<1x128xf32, #tpu.memory_space<vmem>>, vector<1x128xf32>
      %16 = vector.broadcast %15 : vector<1x128xf32> to vector<16x128xf32>
      %17 = arith.addf %14, %16 : vector<16x128xf32>
      %c0_14 = arith.constant 0 : index
      %c0_15 = arith.constant 0 : index
      %18 = vector.load %arg5[%c0_14, %c0_15] : memref<16x128xf32, #tpu.memory_space<vmem>>, vector<16x128xf32>
      %19 = arith.addf %17, %18 : vector<16x128xf32>
      %cst_16 = arith.constant dense<0.000000e+00> : vector<16xf32>
      %20 = vector.multi_reduction <add>, %19, %cst_16 [1] : vector<16x128xf32> to vector<16xf32>
      %21 = vector.shape_cast %20 : vector<16xf32> to vector<16x1xf32>
      %cst_17 = arith.constant 1.280000e+02 : f32
      %22 = vector.broadcast %cst_17 : f32 to vector<16x1xf32>
      %23 = arith.divf %21, %22 : vector<16x1xf32>
      %24 = vector.broadcast %23 : vector<16x1xf32> to vector<16x128xf32>
      %25 = arith.subf %19, %24 : vector<16x128xf32>
      %26 = arith.mulf %25, %25 : vector<16x128xf32>
      %cst_18 = arith.constant dense<0.000000e+00> : vector<16xf32>
      %27 = vector.multi_reduction <add>, %26, %cst_18 [1] : vector<16x128xf32> to vector<16xf32>
      %28 = vector.shape_cast %27 : vector<16xf32> to vector<16x1xf32>
      %cst_19 = arith.constant 1.280000e+02 : f32
      %29 = vector.broadcast %cst_19 : f32 to vector<16x1xf32>
      %30 = arith.divf %28, %29 : vector<16x1xf32>
      %31 = vector.broadcast %23 : vector<16x1xf32> to vector<16x128xf32>
      %32 = arith.subf %19, %31 : vector<16x128xf32>
      %cst_20 = arith.constant 9.99999974E-6 : f32
      %33 = vector.broadcast %cst_20 : f32 to vector<16x1xf32>
      %34 = arith.addf %30, %33 : vector<16x1xf32>
      %35 = math.rsqrt %34 : vector<16x1xf32>
      %36 = vector.broadcast %35 : vector<16x1xf32> to vector<16x128xf32>
      %37 = arith.mulf %32, %36 : vector<16x128xf32>
      %c0_21 = arith.constant 0 : index
      %c0_22 = arith.constant 0 : index
      %38 = vector.load %arg6[%c0_21, %c0_22] : memref<1x128xf32, #tpu.memory_space<vmem>>, vector<1x128xf32>
      %39 = vector.broadcast %38 : vector<1x128xf32> to vector<16x128xf32>
      %40 = arith.mulf %37, %39 : vector<16x128xf32>
      %c0_23 = arith.constant 0 : index
      %c0_24 = arith.constant 0 : index
      %41 = vector.load %arg7[%c0_23, %c0_24] : memref<1x128xf32, #tpu.memory_space<vmem>>, vector<1x128xf32>
      %42 = vector.broadcast %41 : vector<1x128xf32> to vector<16x128xf32>
      %43 = arith.addf %40, %42 : vector<16x128xf32>
      %c0_25 = arith.constant 0 : index
      %c0_26 = arith.constant 0 : index
      %44 = vector.load %arg8[%c0_25, %c0_26] : memref<16x128xf32, #tpu.memory_space<vmem>>, vector<16x128xf32>
      tpu.vector_store %arg8[%c0_25, %c0_26], %43 {strides = array<i32>} : memref<16x128xf32, #tpu.memory_space<vmem>>, vector<16x128xf32>,
    } else {
    }
    return
  }
  func.func @transform_0(%arg0: i32, %arg1: i32) -> (i32, i32) {
    %c0_i32 = arith.constant 0 : i32
    return %arg0, %arg1 : i32, i32
  }
  func.func @transform_1(%arg0: i32, %arg1: i32) -> (i32, i32) {
    %c0_i32 = arith.constant 0 : i32
    %c0_i32_0 = arith.constant 0 : i32
    return %arg1, %c0_i32 : i32, i32
  }
  func.func @transform_2(%arg0: i32, %arg1: i32) -> (i32, i32) {
    %c0_i32 = arith.constant 0 : i32
    %c0_i32_0 = arith.constant 0 : i32
    %c0_i32_1 = arith.constant 0 : i32
    return %c0_i32, %c0_i32_0 : i32, i32
  }
  func.func @transform_3(%arg0: i32, %arg1: i32) -> (i32, i32) {
    %c0_i32 = arith.constant 0 : i32
    %c0_i32_0 = arith.constant 0 : i32
    return %arg0, %c0_i32 : i32, i32
  }
  func.func @transform_4(%arg0: i32, %arg1: i32) -> (i32, i32) {
    %c0_i32 = arith.constant 0 : i32
    %c0_i32_0 = arith.constant 0 : i32
    %c0_i32_1 = arith.constant 0 : i32
    return %c0_i32, %c0_i32_0 : i32, i32
  }
  func.func @transform_5(%arg0: i32, %arg1: i32) -> (i32, i32) {
    %c0_i32 = arith.constant 0 : i32
    %c0_i32_0 = arith.constant 0 : i32
    %c0_i32_1 = arith.constant 0 : i32
    return %c0_i32, %c0_i32_0 : i32, i32
  }
  func.func @transform_6(%arg0: i32, %arg1: i32) -> (i32, i32) {
    %c0_i32 = arith.constant 0 : i32
    %c0_i32_0 = arith.constant 0 : i32
    return %arg0, %c0_i32 : i32, i32
  }
}

module attributes {stable_mosaic.version = 11 : i64} {
  func.func @_matmul_kernel(%arg0: i32, %arg1: i32, %arg2: i32, %arg3: memref<16x128xf32, #tpu.memory_space<vmem>>, %arg4: memref<128x256xf32, #tpu.memory_space<vmem>>, %arg5: memref<1x256xf32, #tpu.memory_space<vmem>>, %arg6: memref<16x256xf32, #tpu.memory_space<vmem>>, %arg7: memref<16x256xf32, #tpu.memory_space<vmem>>) attributes {dimension_semantics = [#tpu.dimension_semantics<parallel>, #tpu.dimension_semantics<parallel>, #tpu.dimension_semantics<arbitrary>], iteration_bounds = array<i64: 1, 1, 1>, scalar_prefetch = 0 : i64, scratch_operands = 1 : i64, tpu.core_type = #tpu.core_type<tc>, window_params = [{transform_indices = @transform_0, window_bounds = array<i64: 16, 128>}, {transform_indices = @transform_1, window_bounds = array<i64: 128, 256>}, {transform_indices = @transform_2, window_bounds = array<i64: 1, 256>}, {transform_indices = @transform_3, window_bounds = array<i64: 16, 256>}]} {
    %c0_i32 = arith.constant 0 : i32
    %0 = arith.cmpi eq, %arg2, %c0_i32 : i32
    %1 = arith.extui %0 : i1 to i32
    %c0_i32_0 = arith.constant 0 : i32
    %2 = arith.cmpi ne, %1, %c0_i32_0 : i32
    scf.if %2 {
      %cst_10 = arith.constant 0.000000e+00 : f32
      %14 = vector.broadcast %cst_10 : f32 to vector<16x256xf32>
      %c0_11 = arith.constant 0 : index
      %c0_12 = arith.constant 0 : index
      %15 = vector.load %arg7[%c0_11, %c0_12] : memref<16x256xf32, #tpu.memory_space<vmem>>, vector<16x256xf32>
      tpu.vector_store %arg7[%c0_11, %c0_12], %14 {strides = array<i32>} : memref<16x256xf32, #tpu.memory_space<vmem>>, vector<16x256xf32>,
    } else {
    }
    %c0 = arith.constant 0 : index
    %c0_1 = arith.constant 0 : index
    %3 = vector.load %arg7[%c0, %c0_1] : memref<16x256xf32, #tpu.memory_space<vmem>>, vector<16x256xf32>
    %c0_2 = arith.constant 0 : index
    %c0_3 = arith.constant 0 : index
    %4 = vector.load %arg3[%c0_2, %c0_3] : memref<16x128xf32, #tpu.memory_space<vmem>>, vector<16x128xf32>
    %5 = arith.truncf %4 : vector<16x128xf32> to vector<16x128xbf16>
    %c0_4 = arith.constant 0 : index
    %c0_5 = arith.constant 0 : index
    %6 = vector.load %arg4[%c0_4, %c0_5] : memref<128x256xf32, #tpu.memory_space<vmem>>, vector<128x256xf32>
    %7 = arith.truncf %6 : vector<128x256xf32> to vector<128x256xbf16>
    %cst = arith.constant dense<0.000000e+00> : vector<16x256xf32>
    %8 = tpu.matmul %5, %7, %cst {dimension_numbers = #tpu.dot_dimension_numbers<[1], [0], [0], [1], [0, 0, 1, 1], [], []>} : vector<16x128xbf16>, vector<128x256xbf16>, vector<16x256xf32> -> vector<16x256xf32>
    %9 = arith.addf %3, %8 : vector<16x256xf32>
    %c0_6 = arith.constant 0 : index
    %c0_7 = arith.constant 0 : index
    %10 = vector.load %arg7[%c0_6, %c0_7] : memref<16x256xf32, #tpu.memory_space<vmem>>, vector<16x256xf32>
    tpu.vector_store %arg7[%c0_6, %c0_7], %9 {strides = array<i32>} : memref<16x256xf32, #tpu.memory_space<vmem>>, vector<16x256xf32>,
    %c0_i32_8 = arith.constant 0 : i32
    %11 = arith.cmpi eq, %arg2, %c0_i32_8 : i32
    %12 = arith.extui %11 : i1 to i32
    %c0_i32_9 = arith.constant 0 : i32
    %13 = arith.cmpi ne, %12, %c0_i32_9 : i32
    scf.if %13 {
      %c0_10 = arith.constant 0 : index
      %c0_11 = arith.constant 0 : index
      %14 = vector.load %arg7[%c0_10, %c0_11] : memref<16x256xf32, #tpu.memory_space<vmem>>, vector<16x256xf32>
      %c0_12 = arith.constant 0 : index
      %c0_13 = arith.constant 0 : index
      %15 = vector.load %arg5[%c0_12, %c0_13] : memref<1x256xf32, #tpu.memory_space<vmem>>, vector<1x256xf32>
      %16 = vector.broadcast %15 : vector<1x256xf32> to vector<16x256xf32>
      %17 = arith.addf %14, %16 : vector<16x256xf32>
      %cst_14 = arith.constant 0.000000e+00 : f32
      %18 = vector.broadcast %cst_14 : f32 to vector<16x256xf32>
      %19 = arith.maximumf %17, %18 : vector<16x256xf32>
      %c0_15 = arith.constant 0 : index
      %c0_16 = arith.constant 0 : index
      %20 = vector.load %arg6[%c0_15, %c0_16] : memref<16x256xf32, #tpu.memory_space<vmem>>, vector<16x256xf32>
      tpu.vector_store %arg6[%c0_15, %c0_16], %19 {strides = array<i32>} : memref<16x256xf32, #tpu.memory_space<vmem>>, vector<16x256xf32>,
    } else {
    }
    return
  }
  func.func @transform_0(%arg0: i32, %arg1: i32, %arg2: i32) -> (i32, i32) {
    %c0_i32 = arith.constant 0 : i32
    return %arg0, %arg2 : i32, i32
  }
  func.func @transform_1(%arg0: i32, %arg1: i32, %arg2: i32) -> (i32, i32) {
    %c0_i32 = arith.constant 0 : i32
    return %arg2, %arg1 : i32, i32
  }
  func.func @transform_2(%arg0: i32, %arg1: i32, %arg2: i32) -> (i32, i32) {
    %c0_i32 = arith.constant 0 : i32
    %c0_i32_0 = arith.constant 0 : i32
    return %c0_i32, %arg1 : i32, i32
  }
  func.func @transform_3(%arg0: i32, %arg1: i32, %arg2: i32) -> (i32, i32) {
    %c0_i32 = arith.constant 0 : i32
    return %arg0, %arg1 : i32, i32
  }
}

module attributes {stable_mosaic.version = 11 : i64} {
  func.func @_matmul_kernel(%arg0: i32, %arg1: i32, %arg2: i32, %arg3: memref<16x128xf32, #tpu.memory_space<vmem>>, %arg4: memref<128x256xf32, #tpu.memory_space<vmem>>, %arg5: memref<1x256xf32, #tpu.memory_space<vmem>>, %arg6: memref<16x256xf32, #tpu.memory_space<vmem>>, %arg7: memref<16x256xf32, #tpu.memory_space<vmem>>) attributes {dimension_semantics = [#tpu.dimension_semantics<parallel>, #tpu.dimension_semantics<parallel>, #tpu.dimension_semantics<arbitrary>], iteration_bounds = array<i64: 1, 1, 1>, scalar_prefetch = 0 : i64, scratch_operands = 1 : i64, tpu.core_type = #tpu.core_type<tc>, window_params = [{transform_indices = @transform_0, window_bounds = array<i64: 16, 128>}, {transform_indices = @transform_1, window_bounds = array<i64: 128, 256>}, {transform_indices = @transform_2, window_bounds = array<i64: 1, 256>}, {transform_indices = @transform_3, window_bounds = array<i64: 16, 256>}]} {
    %c0_i32 = arith.constant 0 : i32
    %0 = arith.cmpi eq, %arg2, %c0_i32 : i32
    %1 = arith.extui %0 : i1 to i32
    %c0_i32_0 = arith.constant 0 : i32
    %2 = arith.cmpi ne, %1, %c0_i32_0 : i32
    scf.if %2 {
      %cst_10 = arith.constant 0.000000e+00 : f32
      %14 = vector.broadcast %cst_10 : f32 to vector<16x256xf32>
      %c0_11 = arith.constant 0 : index
      %c0_12 = arith.constant 0 : index
      %15 = vector.load %arg7[%c0_11, %c0_12] : memref<16x256xf32, #tpu.memory_space<vmem>>, vector<16x256xf32>
      tpu.vector_store %arg7[%c0_11, %c0_12], %14 {strides = array<i32>} : memref<16x256xf32, #tpu.memory_space<vmem>>, vector<16x256xf32>,
    } else {
    }
    %c0 = arith.constant 0 : index
    %c0_1 = arith.constant 0 : index
    %3 = vector.load %arg7[%c0, %c0_1] : memref<16x256xf32, #tpu.memory_space<vmem>>, vector<16x256xf32>
    %c0_2 = arith.constant 0 : index
    %c0_3 = arith.constant 0 : index
    %4 = vector.load %arg3[%c0_2, %c0_3] : memref<16x128xf32, #tpu.memory_space<vmem>>, vector<16x128xf32>
    %5 = arith.truncf %4 : vector<16x128xf32> to vector<16x128xbf16>
    %c0_4 = arith.constant 0 : index
    %c0_5 = arith.constant 0 : index
    %6 = vector.load %arg4[%c0_4, %c0_5] : memref<128x256xf32, #tpu.memory_space<vmem>>, vector<128x256xf32>
    %7 = arith.truncf %6 : vector<128x256xf32> to vector<128x256xbf16>
    %cst = arith.constant dense<0.000000e+00> : vector<16x256xf32>
    %8 = tpu.matmul %5, %7, %cst {dimension_numbers = #tpu.dot_dimension_numbers<[1], [0], [0], [1], [0, 0, 1, 1], [], []>} : vector<16x128xbf16>, vector<128x256xbf16>, vector<16x256xf32> -> vector<16x256xf32>
    %9 = arith.addf %3, %8 : vector<16x256xf32>
    %c0_6 = arith.constant 0 : index
    %c0_7 = arith.constant 0 : index
    %10 = vector.load %arg7[%c0_6, %c0_7] : memref<16x256xf32, #tpu.memory_space<vmem>>, vector<16x256xf32>
    tpu.vector_store %arg7[%c0_6, %c0_7], %9 {strides = array<i32>} : memref<16x256xf32, #tpu.memory_space<vmem>>, vector<16x256xf32>,
    %c0_i32_8 = arith.constant 0 : i32
    %11 = arith.cmpi eq, %arg2, %c0_i32_8 : i32
    %12 = arith.extui %11 : i1 to i32
    %c0_i32_9 = arith.constant 0 : i32
    %13 = arith.cmpi ne, %12, %c0_i32_9 : i32
    scf.if %13 {
      %c0_10 = arith.constant 0 : index
      %c0_11 = arith.constant 0 : index
      %14 = vector.load %arg7[%c0_10, %c0_11] : memref<16x256xf32, #tpu.memory_space<vmem>>, vector<16x256xf32>
      %c0_12 = arith.constant 0 : index
      %c0_13 = arith.constant 0 : index
      %15 = vector.load %arg5[%c0_12, %c0_13] : memref<1x256xf32, #tpu.memory_space<vmem>>, vector<1x256xf32>
      %16 = vector.broadcast %15 : vector<1x256xf32> to vector<16x256xf32>
      %17 = arith.addf %14, %16 : vector<16x256xf32>
      %c0_14 = arith.constant 0 : index
      %c0_15 = arith.constant 0 : index
      %18 = vector.load %arg6[%c0_14, %c0_15] : memref<16x256xf32, #tpu.memory_space<vmem>>, vector<16x256xf32>
      tpu.vector_store %arg6[%c0_14, %c0_15], %17 {strides = array<i32>} : memref<16x256xf32, #tpu.memory_space<vmem>>, vector<16x256xf32>,
    } else {
    }
    return
  }
  func.func @transform_0(%arg0: i32, %arg1: i32, %arg2: i32) -> (i32, i32) {
    %c0_i32 = arith.constant 0 : i32
    return %arg0, %arg2 : i32, i32
  }
  func.func @transform_1(%arg0: i32, %arg1: i32, %arg2: i32) -> (i32, i32) {
    %c0_i32 = arith.constant 0 : i32
    return %arg2, %arg1 : i32, i32
  }
  func.func @transform_2(%arg0: i32, %arg1: i32, %arg2: i32) -> (i32, i32) {
    %c0_i32 = arith.constant 0 : i32
    %c0_i32_0 = arith.constant 0 : i32
    return %c0_i32, %arg1 : i32, i32
  }
  func.func @transform_3(%arg0: i32, %arg1: i32, %arg2: i32) -> (i32, i32) {
    %c0_i32 = arith.constant 0 : i32
    return %arg0, %arg1 : i32, i32
  }
}

module attributes {stable_mosaic.version = 11 : i64} {
  func.func @_matmul_ln_kernel(%arg0: i32, %arg1: i32, %arg2: memref<16x256xf32, #tpu.memory_space<vmem>>, %arg3: memref<256x128xf32, #tpu.memory_space<vmem>>, %arg4: memref<1x128xf32, #tpu.memory_space<vmem>>, %arg5: memref<16x128xf32, #tpu.memory_space<vmem>>, %arg6: memref<1x128xf32, #tpu.memory_space<vmem>>, %arg7: memref<1x128xf32, #tpu.memory_space<vmem>>, %arg8: memref<16x128xf32, #tpu.memory_space<vmem>>, %arg9: memref<16x128xf32, #tpu.memory_space<vmem>>) attributes {dimension_semantics = [#tpu.dimension_semantics<parallel>, #tpu.dimension_semantics<arbitrary>], iteration_bounds = array<i64: 1, 1>, scalar_prefetch = 0 : i64, scratch_operands = 1 : i64, tpu.core_type = #tpu.core_type<tc>, window_params = [{transform_indices = @transform_0, window_bounds = array<i64: 16, 256>}, {transform_indices = @transform_1, window_bounds = array<i64: 256, 128>}, {pipeline_mode = #tpu.pipeline_mode<synchronous>, transform_indices = @transform_2, window_bounds = array<i64: 1, 128>}, {transform_indices = @transform_3, window_bounds = array<i64: 16, 128>}, {pipeline_mode = #tpu.pipeline_mode<synchronous>, transform_indices = @transform_4, window_bounds = array<i64: 1, 128>}, {pipeline_mode = #tpu.pipeline_mode<synchronous>, transform_indices = @transform_5, window_bounds = array<i64: 1, 128>}, {transform_indices = @transform_6, window_bounds = array<i64: 16, 128>}]} {
    %c0_i32 = arith.constant 0 : i32
    %0 = arith.cmpi eq, %arg1, %c0_i32 : i32
    %1 = arith.extui %0 : i1 to i32
    %c0_i32_0 = arith.constant 0 : i32
    %2 = arith.cmpi ne, %1, %c0_i32_0 : i32
    scf.if %2 {
      %cst_10 = arith.constant 0.000000e+00 : f32
      %14 = vector.broadcast %cst_10 : f32 to vector<16x128xf32>
      %c0_11 = arith.constant 0 : index
      %c0_12 = arith.constant 0 : index
      %15 = vector.load %arg9[%c0_11, %c0_12] : memref<16x128xf32, #tpu.memory_space<vmem>>, vector<16x128xf32>
      tpu.vector_store %arg9[%c0_11, %c0_12], %14 {strides = array<i32>} : memref<16x128xf32, #tpu.memory_space<vmem>>, vector<16x128xf32>,
    } else {
    }
    %c0 = arith.constant 0 : index
    %c0_1 = arith.constant 0 : index
    %3 = vector.load %arg9[%c0, %c0_1] : memref<16x128xf32, #tpu.memory_space<vmem>>, vector<16x128xf32>
    %c0_2 = arith.constant 0 : index
    %c0_3 = arith.constant 0 : index
    %4 = vector.load %arg2[%c0_2, %c0_3] : memref<16x256xf32, #tpu.memory_space<vmem>>, vector<16x256xf32>
    %5 = arith.truncf %4 : vector<16x256xf32> to vector<16x256xbf16>
    %c0_4 = arith.constant 0 : index
    %c0_5 = arith.constant 0 : index
    %6 = vector.load %arg3[%c0_4, %c0_5] : memref<256x128xf32, #tpu.memory_space<vmem>>, vector<256x128xf32>
    %7 = arith.truncf %6 : vector<256x128xf32> to vector<256x128xbf16>
    %cst = arith.constant dense<0.000000e+00> : vector<16x128xf32>
    %8 = tpu.matmul %5, %7, %cst {dimension_numbers = #tpu.dot_dimension_numbers<[1], [0], [0], [1], [0, 0, 1, 1], [], []>} : vector<16x256xbf16>, vector<256x128xbf16>, vector<16x128xf32> -> vector<16x128xf32>
    %9 = arith.addf %3, %8 : vector<16x128xf32>
    %c0_6 = arith.constant 0 : index
    %c0_7 = arith.constant 0 : index
    %10 = vector.load %arg9[%c0_6, %c0_7] : memref<16x128xf32, #tpu.memory_space<vmem>>, vector<16x128xf32>
    tpu.vector_store %arg9[%c0_6, %c0_7], %9 {strides = array<i32>} : memref<16x128xf32, #tpu.memory_space<vmem>>, vector<16x128xf32>,
    %c0_i32_8 = arith.constant 0 : i32
    %11 = arith.cmpi eq, %arg1, %c0_i32_8 : i32
    %12 = arith.extui %11 : i1 to i32
    %c0_i32_9 = arith.constant 0 : i32
    %13 = arith.cmpi ne, %12, %c0_i32_9 : i32
    scf.if %13 {
      %c0_10 = arith.constant 0 : index
      %c0_11 = arith.constant 0 : index
      %14 = vector.load %arg9[%c0_10, %c0_11] : memref<16x128xf32, #tpu.memory_space<vmem>>, vector<16x128xf32>
      %c0_12 = arith.constant 0 : index
      %c0_13 = arith.constant 0 : index
      %15 = vector.load %arg4[%c0_12, %c0_13] : memref<1x128xf32, #tpu.memory_space<vmem>>, vector<1x128xf32>
      %16 = vector.broadcast %15 : vector<1x128xf32> to vector<16x128xf32>
      %17 = arith.addf %14, %16 : vector<16x128xf32>
      %c0_14 = arith.constant 0 : index
      %c0_15 = arith.constant 0 : index
      %18 = vector.load %arg5[%c0_14, %c0_15] : memref<16x128xf32, #tpu.memory_space<vmem>>, vector<16x128xf32>
      %19 = arith.addf %17, %18 : vector<16x128xf32>
      %cst_16 = arith.constant dense<0.000000e+00> : vector<16xf32>
      %20 = vector.multi_reduction <add>, %19, %cst_16 [1] : vector<16x128xf32> to vector<16xf32>
      %21 = vector.shape_cast %20 : vector<16xf32> to vector<16x1xf32>
      %cst_17 = arith.constant 1.280000e+02 : f32
      %22 = vector.broadcast %cst_17 : f32 to vector<16x1xf32>
      %23 = arith.divf %21, %22 : vector<16x1xf32>
      %24 = vector.broadcast %23 : vector<16x1xf32> to vector<16x128xf32>
      %25 = arith.subf %19, %24 : vector<16x128xf32>
      %26 = arith.mulf %25, %25 : vector<16x128xf32>
      %cst_18 = arith.constant dense<0.000000e+00> : vector<16xf32>
      %27 = vector.multi_reduction <add>, %26, %cst_18 [1] : vector<16x128xf32> to vector<16xf32>
      %28 = vector.shape_cast %27 : vector<16xf32> to vector<16x1xf32>
      %cst_19 = arith.constant 1.280000e+02 : f32
      %29 = vector.broadcast %cst_19 : f32 to vector<16x1xf32>
      %30 = arith.divf %28, %29 : vector<16x1xf32>
      %31 = vector.broadcast %23 : vector<16x1xf32> to vector<16x128xf32>
      %32 = arith.subf %19, %31 : vector<16x128xf32>
      %cst_20 = arith.constant 9.99999974E-6 : f32
      %33 = vector.broadcast %cst_20 : f32 to vector<16x1xf32>
      %34 = arith.addf %30, %33 : vector<16x1xf32>
      %35 = math.rsqrt %34 : vector<16x1xf32>
      %36 = vector.broadcast %35 : vector<16x1xf32> to vector<16x128xf32>
      %37 = arith.mulf %32, %36 : vector<16x128xf32>
      %c0_21 = arith.constant 0 : index
      %c0_22 = arith.constant 0 : index
      %38 = vector.load %arg6[%c0_21, %c0_22] : memref<1x128xf32, #tpu.memory_space<vmem>>, vector<1x128xf32>
      %39 = vector.broadcast %38 : vector<1x128xf32> to vector<16x128xf32>
      %40 = arith.mulf %37, %39 : vector<16x128xf32>
      %c0_23 = arith.constant 0 : index
      %c0_24 = arith.constant 0 : index
      %41 = vector.load %arg7[%c0_23, %c0_24] : memref<1x128xf32, #tpu.memory_space<vmem>>, vector<1x128xf32>
      %42 = vector.broadcast %41 : vector<1x128xf32> to vector<16x128xf32>
      %43 = arith.addf %40, %42 : vector<16x128xf32>
      %c0_25 = arith.constant 0 : index
      %c0_26 = arith.constant 0 : index
      %44 = vector.load %arg8[%c0_25, %c0_26] : memref<16x128xf32, #tpu.memory_space<vmem>>, vector<16x128xf32>
      tpu.vector_store %arg8[%c0_25, %c0_26], %43 {strides = array<i32>} : memref<16x128xf32, #tpu.memory_space<vmem>>, vector<16x128xf32>,
    } else {
    }
    return
  }
  func.func @transform_0(%arg0: i32, %arg1: i32) -> (i32, i32) {
    %c0_i32 = arith.constant 0 : i32
    return %arg0, %arg1 : i32, i32
  }
  func.func @transform_1(%arg0: i32, %arg1: i32) -> (i32, i32) {
    %c0_i32 = arith.constant 0 : i32
    %c0_i32_0 = arith.constant 0 : i32
    return %arg1, %c0_i32 : i32, i32
  }
  func.func @transform_2(%arg0: i32, %arg1: i32) -> (i32, i32) {
    %c0_i32 = arith.constant 0 : i32
    %c0_i32_0 = arith.constant 0 : i32
    %c0_i32_1 = arith.constant 0 : i32
    return %c0_i32, %c0_i32_0 : i32, i32
  }
  func.func @transform_3(%arg0: i32, %arg1: i32) -> (i32, i32) {
    %c0_i32 = arith.constant 0 : i32
    %c0_i32_0 = arith.constant 0 : i32
    return %arg0, %c0_i32 : i32, i32
  }
  func.func @transform_4(%arg0: i32, %arg1: i32) -> (i32, i32) {
    %c0_i32 = arith.constant 0 : i32
    %c0_i32_0 = arith.constant 0 : i32
    %c0_i32_1 = arith.constant 0 : i32
    return %c0_i32, %c0_i32_0 : i32, i32
  }
  func.func @transform_5(%arg0: i32, %arg1: i32) -> (i32, i32) {
    %c0_i32 = arith.constant 0 : i32
    %c0_i32_0 = arith.constant 0 : i32
    %c0_i32_1 = arith.constant 0 : i32
    return %c0_i32, %c0_i32_0 : i32, i32
  }
  func.func @transform_6(%arg0: i32, %arg1: i32) -> (i32, i32) {
    %c0_i32 = arith.constant 0 : i32
    %c0_i32_0 = arith.constant 0 : i32
    return %arg0, %c0_i32 : i32, i32
  }
}

module attributes {stable_mosaic.version = 11 : i64} {
  func.func @_matmul_kernel(%arg0: i32, %arg1: i32, %arg2: i32, %arg3: memref<16x128xf32, #tpu.memory_space<vmem>>, %arg4: memref<128x128xf32, #tpu.memory_space<vmem>>, %arg5: memref<1x128xf32, #tpu.memory_space<vmem>>, %arg6: memref<16x128xf32, #tpu.memory_space<vmem>>, %arg7: memref<16x128xf32, #tpu.memory_space<vmem>>) attributes {dimension_semantics = [#tpu.dimension_semantics<parallel>, #tpu.dimension_semantics<parallel>, #tpu.dimension_semantics<arbitrary>], iteration_bounds = array<i64: 1, 1, 1>, scalar_prefetch = 0 : i64, scratch_operands = 1 : i64, tpu.core_type = #tpu.core_type<tc>, window_params = [{transform_indices = @transform_0, window_bounds = array<i64: 16, 128>}, {transform_indices = @transform_1, window_bounds = array<i64: 128, 128>}, {transform_indices = @transform_2, window_bounds = array<i64: 1, 128>}, {transform_indices = @transform_3, window_bounds = array<i64: 16, 128>}]} {
    %c0_i32 = arith.constant 0 : i32
    %0 = arith.cmpi eq, %arg2, %c0_i32 : i32
    %1 = arith.extui %0 : i1 to i32
    %c0_i32_0 = arith.constant 0 : i32
    %2 = arith.cmpi ne, %1, %c0_i32_0 : i32
    scf.if %2 {
      %cst_10 = arith.constant 0.000000e+00 : f32
      %14 = vector.broadcast %cst_10 : f32 to vector<16x128xf32>
      %c0_11 = arith.constant 0 : index
      %c0_12 = arith.constant 0 : index
      %15 = vector.load %arg7[%c0_11, %c0_12] : memref<16x128xf32, #tpu.memory_space<vmem>>, vector<16x128xf32>
      tpu.vector_store %arg7[%c0_11, %c0_12], %14 {strides = array<i32>} : memref<16x128xf32, #tpu.memory_space<vmem>>, vector<16x128xf32>,
    } else {
    }
    %c0 = arith.constant 0 : index
    %c0_1 = arith.constant 0 : index
    %3 = vector.load %arg7[%c0, %c0_1] : memref<16x128xf32, #tpu.memory_space<vmem>>, vector<16x128xf32>
    %c0_2 = arith.constant 0 : index
    %c0_3 = arith.constant 0 : index
    %4 = vector.load %arg3[%c0_2, %c0_3] : memref<16x128xf32, #tpu.memory_space<vmem>>, vector<16x128xf32>
    %5 = arith.truncf %4 : vector<16x128xf32> to vector<16x128xbf16>
    %c0_4 = arith.constant 0 : index
    %c0_5 = arith.constant 0 : index
    %6 = vector.load %arg4[%c0_4, %c0_5] : memref<128x128xf32, #tpu.memory_space<vmem>>, vector<128x128xf32>
    %7 = arith.truncf %6 : vector<128x128xf32> to vector<128x128xbf16>
    %cst = arith.constant dense<0.000000e+00> : vector<16x128xf32>
    %8 = tpu.matmul %5, %7, %cst {dimension_numbers = #tpu.dot_dimension_numbers<[1], [0], [0], [1], [0, 0, 1, 1], [], []>} : vector<16x128xbf16>, vector<128x128xbf16>, vector<16x128xf32> -> vector<16x128xf32>
    %9 = arith.addf %3, %8 : vector<16x128xf32>
    %c0_6 = arith.constant 0 : index
    %c0_7 = arith.constant 0 : index
    %10 = vector.load %arg7[%c0_6, %c0_7] : memref<16x128xf32, #tpu.memory_space<vmem>>, vector<16x128xf32>
    tpu.vector_store %arg7[%c0_6, %c0_7], %9 {strides = array<i32>} : memref<16x128xf32, #tpu.memory_space<vmem>>, vector<16x128xf32>,
    %c0_i32_8 = arith.constant 0 : i32
    %11 = arith.cmpi eq, %arg2, %c0_i32_8 : i32
    %12 = arith.extui %11 : i1 to i32
    %c0_i32_9 = arith.constant 0 : i32
    %13 = arith.cmpi ne, %12, %c0_i32_9 : i32
    scf.if %13 {
      %c0_10 = arith.constant 0 : index
      %c0_11 = arith.constant 0 : index
      %14 = vector.load %arg7[%c0_10, %c0_11] : memref<16x128xf32, #tpu.memory_space<vmem>>, vector<16x128xf32>
      %c0_12 = arith.constant 0 : index
      %c0_13 = arith.constant 0 : index
      %15 = vector.load %arg5[%c0_12, %c0_13] : memref<1x128xf32, #tpu.memory_space<vmem>>, vector<1x128xf32>
      %16 = vector.broadcast %15 : vector<1x128xf32> to vector<16x128xf32>
      %17 = arith.addf %14, %16 : vector<16x128xf32>
      %c0_14 = arith.constant 0 : index
      %c0_15 = arith.constant 0 : index
      %18 = vector.load %arg6[%c0_14, %c0_15] : memref<16x128xf32, #tpu.memory_space<vmem>>, vector<16x128xf32>
      tpu.vector_store %arg6[%c0_14, %c0_15], %17 {strides = array<i32>} : memref<16x128xf32, #tpu.memory_space<vmem>>, vector<16x128xf32>,
    } else {
    }
    return
  }
  func.func @transform_0(%arg0: i32, %arg1: i32, %arg2: i32) -> (i32, i32) {
    %c0_i32 = arith.constant 0 : i32
    return %arg0, %arg2 : i32, i32
  }
  func.func @transform_1(%arg0: i32, %arg1: i32, %arg2: i32) -> (i32, i32) {
    %c0_i32 = arith.constant 0 : i32
    return %arg2, %arg1 : i32, i32
  }
  func.func @transform_2(%arg0: i32, %arg1: i32, %arg2: i32) -> (i32, i32) {
    %c0_i32 = arith.constant 0 : i32
    %c0_i32_0 = arith.constant 0 : i32
    return %c0_i32, %arg1 : i32, i32
  }
  func.func @transform_3(%arg0: i32, %arg1: i32, %arg2: i32) -> (i32, i32) {
    %c0_i32 = arith.constant 0 : i32
    return %arg0, %arg1 : i32, i32
  }
}

module attributes {stable_mosaic.version = 11 : i64} {
  func.func @_mha_kernel(%arg0: i32, %arg1: i32, %arg2: memref<1x8x128xf32, #tpu.memory_space<vmem>>, %arg3: memref<1x8x128xf32, #tpu.memory_space<vmem>>, %arg4: memref<1x8x128xf32, #tpu.memory_space<vmem>>, %arg5: memref<1x8x8xi8, #tpu.memory_space<vmem>>, %arg6: memref<1x8x128xf32, #tpu.memory_space<vmem>>) attributes {dimension_semantics = [#tpu.dimension_semantics<parallel>, #tpu.dimension_semantics<parallel>], iteration_bounds = array<i64: 2, 1>, scalar_prefetch = 0 : i64, scratch_operands = 0 : i64, tpu.core_type = #tpu.core_type<tc>, window_params = [{transform_indices = @transform_0, window_bounds = array<i64: 1, 8, 128>}, {transform_indices = @transform_1, window_bounds = array<i64: 1, 8, 128>}, {transform_indices = @transform_2, window_bounds = array<i64: 1, 8, 128>}, {transform_indices = @transform_3, window_bounds = array<i64: 1, 8, 8>}, {transform_indices = @transform_4, window_bounds = array<i64: 1, 8, 128>}]} {
    %c0 = arith.constant 0 : index
    %c0_0 = arith.constant 0 : index
    %c0_1 = arith.constant 0 : index
    %0 = vector.load %arg2[%c0, %c0_0, %c0_1] : memref<1x8x128xf32, #tpu.memory_space<vmem>>, vector<1x8x128xf32>
    %1 = vector.shape_cast %0 : vector<1x8x128xf32> to vector<8x128xf32>
    %2 = arith.truncf %1 : vector<8x128xf32> to vector<8x128xbf16>
    %c0_2 = arith.constant 0 : index
    %c0_3 = arith.constant 0 : index
    %c0_4 = arith.constant 0 : index
    %3 = vector.load %arg3[%c0_2, %c0_3, %c0_4] : memref<1x8x128xf32, #tpu.memory_space<vmem>>, vector<1x8x128xf32>
    %4 = vector.shape_cast %3 : vector<1x8x128xf32> to vector<8x128xf32>
    %5 = tpu.transpose %4, [1, 0] : vector<8x128xf32> -> vector<128x8xf32>
    %6 = arith.truncf %5 : vector<128x8xf32> to vector<128x8xbf16>
    %c0_5 = arith.constant 0 : index
    %c0_6 = arith.constant 0 : index
    %c0_7 = arith.constant 0 : index
    %7 = vector.load %arg4[%c0_5, %c0_6, %c0_7] : memref<1x8x128xf32, #tpu.memory_space<vmem>>, vector<1x8x128xf32>
    %8 = vector.shape_cast %7 : vector<1x8x128xf32> to vector<8x128xf32>
    %9 = arith.truncf %8 : vector<8x128xf32> to vector<8x128xbf16>
    %c0_8 = arith.constant 0 : index
    %c0_9 = arith.constant 0 : index
    %c0_10 = arith.constant 0 : index
    %10 = vector.load %arg5[%c0_8, %c0_9, %c0_10] : memref<1x8x8xi8, #tpu.memory_space<vmem>>, vector<1x8x8xi8>
    %11 = vector.shape_cast %10 : vector<1x8x8xi8> to vector<8x8xi8>
    %12 = arith.sitofp %11 : vector<8x8xi8> to vector<8x8xf32>
    %cst = arith.constant 0.000000e+00 : f32
    %13 = vector.broadcast %cst : f32 to vector<8x8xf32>
    %14 = arith.cmpf one, %12, %13 : vector<8x8xf32>
    %15 = vector.extract_strided_slice %2 {offsets = [0, 0], sizes = [8, 32], strides = [1, 1]} : vector<8x128xbf16> to vector<8x32xbf16>
    %16 = vector.extract_strided_slice %6 {offsets = [0, 0], sizes = [32, 8], strides = [1, 1]} : vector<128x8xbf16> to vector<32x8xbf16>
    %cst_11 = arith.constant dense<0.000000e+00> : vector<8x8xf32>
    %17 = tpu.matmul %15, %16, %cst_11 {dimension_numbers = #tpu.dot_dimension_numbers<[1], [0], [0], [1], [0, 0, 1, 1], [], []>} : vector<8x32xbf16>, vector<32x8xbf16>, vector<8x8xf32> -> vector<8x8xf32>
    %cst_12 = arith.constant 0.176776692 : f32
    %18 = vector.broadcast %cst_12 : f32 to vector<8x8xf32>
    %19 = arith.mulf %17, %18 : vector<8x8xf32>
    %cst_13 = arith.constant -1.000000e+09 : f32
    %20 = vector.broadcast %cst_13 : f32 to vector<8x8xf32>
    %21 = arith.select %14, %19, %20 : vector<8x8xi1>, vector<8x8xf32>
    %cst_14 = arith.constant dense<0xFF800000> : vector<8xf32>
    %22 = vector.multi_reduction <maximumf>, %21, %cst_14 [1] : vector<8x8xf32> to vector<8xf32>
    %23 = vector.shape_cast %22 : vector<8xf32> to vector<8x1xf32>
    %24 = vector.broadcast %23 : vector<8x1xf32> to vector<8x8xf32>
    %25 = arith.subf %21, %24 : vector<8x8xf32>
    %26 = math.exp %25 : vector<8x8xf32>
    %cst_15 = arith.constant dense<0.000000e+00> : vector<8xf32>
    %27 = vector.multi_reduction <add>, %26, %cst_15 [1] : vector<8x8xf32> to vector<8xf32>
    %28 = vector.shape_cast %27 : vector<8xf32> to vector<8x1xf32>
    %29 = vector.broadcast %28 : vector<8x1xf32> to vector<8x8xf32>
    %30 = arith.divf %26, %29 : vector<8x8xf32>
    %31 = arith.truncf %30 : vector<8x8xf32> to vector<8x8xbf16>
    %32 = vector.extract_strided_slice %9 {offsets = [0, 0], sizes = [8, 32], strides = [1, 1]} : vector<8x128xbf16> to vector<8x32xbf16>
    %cst_16 = arith.constant dense<0.000000e+00> : vector<8x32xf32>
    %33 = tpu.matmul %31, %32, %cst_16 {dimension_numbers = #tpu.dot_dimension_numbers<[1], [0], [0], [1], [0, 0, 1, 1], [], []>} : vector<8x8xbf16>, vector<8x32xbf16>, vector<8x32xf32> -> vector<8x32xf32>
    %c0_17 = arith.constant 0 : index
    %c0_18 = arith.constant 0 : index
    %c0_19 = arith.constant 0 : index
    %34 = vector.load %arg6[%c0_17, %c0_18, %c0_19] : memref<1x8x128xf32, #tpu.memory_space<vmem>>, vector<1x8x32xf32>
    %35 = vector.shape_cast %34 : vector<1x8x32xf32> to vector<8x32xf32>
    %36 = vector.shape_cast %33 : vector<8x32xf32> to vector<1x8x32xf32>
    tpu.vector_store %arg6[%c0_17, %c0_18, %c0_19], %36 {strides = array<i32>} : memref<1x8x128xf32, #tpu.memory_space<vmem>>, vector<1x8x32xf32>,
    %37 = vector.extract_strided_slice %2 {offsets = [0, 32], sizes = [8, 32], strides = [1, 1]} : vector<8x128xbf16> to vector<8x32xbf16>
    %38 = vector.extract_strided_slice %6 {offsets = [32, 0], sizes = [32, 8], strides = [1, 1]} : vector<128x8xbf16> to vector<32x8xbf16>
    %cst_20 = arith.constant dense<0.000000e+00> : vector<8x8xf32>
    %39 = tpu.matmul %37, %38, %cst_20 {dimension_numbers = #tpu.dot_dimension_numbers<[1], [0], [0], [1], [0, 0, 1, 1], [], []>} : vector<8x32xbf16>, vector<32x8xbf16>, vector<8x8xf32> -> vector<8x8xf32>
    %cst_21 = arith.constant 0.176776692 : f32
    %40 = vector.broadcast %cst_21 : f32 to vector<8x8xf32>
    %41 = arith.mulf %39, %40 : vector<8x8xf32>
    %cst_22 = arith.constant -1.000000e+09 : f32
    %42 = vector.broadcast %cst_22 : f32 to vector<8x8xf32>
    %43 = arith.select %14, %41, %42 : vector<8x8xi1>, vector<8x8xf32>
    %cst_23 = arith.constant dense<0xFF800000> : vector<8xf32>
    %44 = vector.multi_reduction <maximumf>, %43, %cst_23 [1] : vector<8x8xf32> to vector<8xf32>
    %45 = vector.shape_cast %44 : vector<8xf32> to vector<8x1xf32>
    %46 = vector.broadcast %45 : vector<8x1xf32> to vector<8x8xf32>
    %47 = arith.subf %43, %46 : vector<8x8xf32>
    %48 = math.exp %47 : vector<8x8xf32>
    %cst_24 = arith.constant dense<0.000000e+00> : vector<8xf32>
    %49 = vector.multi_reduction <add>, %48, %cst_24 [1] : vector<8x8xf32> to vector<8xf32>
    %50 = vector.shape_cast %49 : vector<8xf32> to vector<8x1xf32>
    %51 = vector.broadcast %50 : vector<8x1xf32> to vector<8x8xf32>
    %52 = arith.divf %48, %51 : vector<8x8xf32>
    %53 = arith.truncf %52 : vector<8x8xf32> to vector<8x8xbf16>
    %54 = vector.extract_strided_slice %9 {offsets = [0, 32], sizes = [8, 32], strides = [1, 1]} : vector<8x128xbf16> to vector<8x32xbf16>
    %cst_25 = arith.constant dense<0.000000e+00> : vector<8x32xf32>
    %55 = tpu.matmul %53, %54, %cst_25 {dimension_numbers = #tpu.dot_dimension_numbers<[1], [0], [0], [1], [0, 0, 1, 1], [], []>} : vector<8x8xbf16>, vector<8x32xbf16>, vector<8x32xf32> -> vector<8x32xf32>
    %c0_26 = arith.constant 0 : index
    %c0_27 = arith.constant 0 : index
    %c32 = arith.constant 32 : index
    %56 = vector.load %arg6[%c0_26, %c0_27, %c32] : memref<1x8x128xf32, #tpu.memory_space<vmem>>, vector<1x8x32xf32>
    %57 = vector.shape_cast %56 : vector<1x8x32xf32> to vector<8x32xf32>
    %58 = vector.shape_cast %55 : vector<8x32xf32> to vector<1x8x32xf32>
    tpu.vector_store %arg6[%c0_26, %c0_27, %c32], %58 {strides = array<i32>} : memref<1x8x128xf32, #tpu.memory_space<vmem>>, vector<1x8x32xf32>,
    %59 = vector.extract_strided_slice %2 {offsets = [0, 64], sizes = [8, 32], strides = [1, 1]} : vector<8x128xbf16> to vector<8x32xbf16>
    %60 = vector.extract_strided_slice %6 {offsets = [64, 0], sizes = [32, 8], strides = [1, 1]} : vector<128x8xbf16> to vector<32x8xbf16>
    %cst_28 = arith.constant dense<0.000000e+00> : vector<8x8xf32>
    %61 = tpu.matmul %59, %60, %cst_28 {dimension_numbers = #tpu.dot_dimension_numbers<[1], [0], [0], [1], [0, 0, 1, 1], [], []>} : vector<8x32xbf16>, vector<32x8xbf16>, vector<8x8xf32> -> vector<8x8xf32>
    %cst_29 = arith.constant 0.176776692 : f32
    %62 = vector.broadcast %cst_29 : f32 to vector<8x8xf32>
    %63 = arith.mulf %61, %62 : vector<8x8xf32>
    %cst_30 = arith.constant -1.000000e+09 : f32
    %64 = vector.broadcast %cst_30 : f32 to vector<8x8xf32>
    %65 = arith.select %14, %63, %64 : vector<8x8xi1>, vector<8x8xf32>
    %cst_31 = arith.constant dense<0xFF800000> : vector<8xf32>
    %66 = vector.multi_reduction <maximumf>, %65, %cst_31 [1] : vector<8x8xf32> to vector<8xf32>
    %67 = vector.shape_cast %66 : vector<8xf32> to vector<8x1xf32>
    %68 = vector.broadcast %67 : vector<8x1xf32> to vector<8x8xf32>
    %69 = arith.subf %65, %68 : vector<8x8xf32>
    %70 = math.exp %69 : vector<8x8xf32>
    %cst_32 = arith.constant dense<0.000000e+00> : vector<8xf32>
    %71 = vector.multi_reduction <add>, %70, %cst_32 [1] : vector<8x8xf32> to vector<8xf32>
    %72 = vector.shape_cast %71 : vector<8xf32> to vector<8x1xf32>
    %73 = vector.broadcast %72 : vector<8x1xf32> to vector<8x8xf32>
    %74 = arith.divf %70, %73 : vector<8x8xf32>
    %75 = arith.truncf %74 : vector<8x8xf32> to vector<8x8xbf16>
    %76 = vector.extract_strided_slice %9 {offsets = [0, 64], sizes = [8, 32], strides = [1, 1]} : vector<8x128xbf16> to vector<8x32xbf16>
    %cst_33 = arith.constant dense<0.000000e+00> : vector<8x32xf32>
    %77 = tpu.matmul %75, %76, %cst_33 {dimension_numbers = #tpu.dot_dimension_numbers<[1], [0], [0], [1], [0, 0, 1, 1], [], []>} : vector<8x8xbf16>, vector<8x32xbf16>, vector<8x32xf32> -> vector<8x32xf32>
    %c0_34 = arith.constant 0 : index
    %c0_35 = arith.constant 0 : index
    %c64 = arith.constant 64 : index
    %78 = vector.load %arg6[%c0_34, %c0_35, %c64] : memref<1x8x128xf32, #tpu.memory_space<vmem>>, vector<1x8x32xf32>
    %79 = vector.shape_cast %78 : vector<1x8x32xf32> to vector<8x32xf32>
    %80 = vector.shape_cast %77 : vector<8x32xf32> to vector<1x8x32xf32>
    tpu.vector_store %arg6[%c0_34, %c0_35, %c64], %80 {strides = array<i32>} : memref<1x8x128xf32, #tpu.memory_space<vmem>>, vector<1x8x32xf32>,
    %81 = vector.extract_strided_slice %2 {offsets = [0, 96], sizes = [8, 32], strides = [1, 1]} : vector<8x128xbf16> to vector<8x32xbf16>
    %82 = vector.extract_strided_slice %6 {offsets = [96, 0], sizes = [32, 8], strides = [1, 1]} : vector<128x8xbf16> to vector<32x8xbf16>
    %cst_36 = arith.constant dense<0.000000e+00> : vector<8x8xf32>
    %83 = tpu.matmul %81, %82, %cst_36 {dimension_numbers = #tpu.dot_dimension_numbers<[1], [0], [0], [1], [0, 0, 1, 1], [], []>} : vector<8x32xbf16>, vector<32x8xbf16>, vector<8x8xf32> -> vector<8x8xf32>
    %cst_37 = arith.constant 0.176776692 : f32
    %84 = vector.broadcast %cst_37 : f32 to vector<8x8xf32>
    %85 = arith.mulf %83, %84 : vector<8x8xf32>
    %cst_38 = arith.constant -1.000000e+09 : f32
    %86 = vector.broadcast %cst_38 : f32 to vector<8x8xf32>
    %87 = arith.select %14, %85, %86 : vector<8x8xi1>, vector<8x8xf32>
    %cst_39 = arith.constant dense<0xFF800000> : vector<8xf32>
    %88 = vector.multi_reduction <maximumf>, %87, %cst_39 [1] : vector<8x8xf32> to vector<8xf32>
    %89 = vector.shape_cast %88 : vector<8xf32> to vector<8x1xf32>
    %90 = vector.broadcast %89 : vector<8x1xf32> to vector<8x8xf32>
    %91 = arith.subf %87, %90 : vector<8x8xf32>
    %92 = math.exp %91 : vector<8x8xf32>
    %cst_40 = arith.constant dense<0.000000e+00> : vector<8xf32>
    %93 = vector.multi_reduction <add>, %92, %cst_40 [1] : vector<8x8xf32> to vector<8xf32>
    %94 = vector.shape_cast %93 : vector<8xf32> to vector<8x1xf32>
    %95 = vector.broadcast %94 : vector<8x1xf32> to vector<8x8xf32>
    %96 = arith.divf %92, %95 : vector<8x8xf32>
    %97 = arith.truncf %96 : vector<8x8xf32> to vector<8x8xbf16>
    %98 = vector.extract_strided_slice %9 {offsets = [0, 96], sizes = [8, 32], strides = [1, 1]} : vector<8x128xbf16> to vector<8x32xbf16>
    %cst_41 = arith.constant dense<0.000000e+00> : vector<8x32xf32>
    %99 = tpu.matmul %97, %98, %cst_41 {dimension_numbers = #tpu.dot_dimension_numbers<[1], [0], [0], [1], [0, 0, 1, 1], [], []>} : vector<8x8xbf16>, vector<8x32xbf16>, vector<8x32xf32> -> vector<8x32xf32>
    %c0_42 = arith.constant 0 : index
    %c0_43 = arith.constant 0 : index
    %c96 = arith.constant 96 : index
    %100 = vector.load %arg6[%c0_42, %c0_43, %c96] : memref<1x8x128xf32, #tpu.memory_space<vmem>>, vector<1x8x32xf32>
    %101 = vector.shape_cast %100 : vector<1x8x32xf32> to vector<8x32xf32>
    %102 = vector.shape_cast %99 : vector<8x32xf32> to vector<1x8x32xf32>
    tpu.vector_store %arg6[%c0_42, %c0_43, %c96], %102 {strides = array<i32>} : memref<1x8x128xf32, #tpu.memory_space<vmem>>, vector<1x8x32xf32>,
    return
  }
  func.func @transform_0(%arg0: i32, %arg1: i32) -> (i32, i32, i32) {
    %c0_i32 = arith.constant 0 : i32
    %c0_i32_0 = arith.constant 0 : i32
    return %arg0, %arg1, %c0_i32 : i32, i32, i32
  }
  func.func @transform_1(%arg0: i32, %arg1: i32) -> (i32, i32, i32) {
    %c0_i32 = arith.constant 0 : i32
    %c0_i32_0 = arith.constant 0 : i32
    %c0_i32_1 = arith.constant 0 : i32
    return %arg0, %c0_i32, %c0_i32_0 : i32, i32, i32
  }
  func.func @transform_2(%arg0: i32, %arg1: i32) -> (i32, i32, i32) {
    %c0_i32 = arith.constant 0 : i32
    %c1_i32 = arith.constant 1 : i32
    %c0_i32_0 = arith.constant 0 : i32
    return %arg0, %c0_i32, %c1_i32 : i32, i32, i32
  }
  func.func @transform_3(%arg0: i32, %arg1: i32) -> (i32, i32, i32) {
    %c0_i32 = arith.constant 0 : i32
    %c0_i32_0 = arith.constant 0 : i32
    return %arg0, %arg1, %c0_i32 : i32, i32, i32
  }
  func.func @transform_4(%arg0: i32, %arg1: i32) -> (i32, i32, i32) {
    %c0_i32 = arith.constant 0 : i32
    %c0_i32_0 = arith.constant 0 : i32
    return %arg0, %arg1, %c0_i32 : i32, i32, i32
  }
}

module attributes {stable_mosaic.version = 11 : i64} {
  func.func @_matmul_kernel(%arg0: i32, %arg1: i32, %arg2: i32, %arg3: memref<16x128xf32, #tpu.memory_space<vmem>>, %arg4: memref<128x100xf32, #tpu.memory_space<vmem>>, %arg5: memref<1x100xf32, #tpu.memory_space<vmem>>, %arg6: memref<16x100xf32, #tpu.memory_space<vmem>>, %arg7: memref<16x100xf32, #tpu.memory_space<vmem>>) attributes {dimension_semantics = [#tpu.dimension_semantics<parallel>, #tpu.dimension_semantics<parallel>, #tpu.dimension_semantics<arbitrary>], iteration_bounds = array<i64: 1, 1, 1>, scalar_prefetch = 0 : i64, scratch_operands = 1 : i64, tpu.core_type = #tpu.core_type<tc>, window_params = [{transform_indices = @transform_0, window_bounds = array<i64: 16, 128>}, {transform_indices = @transform_1, window_bounds = array<i64: 128, 100>}, {transform_indices = @transform_2, window_bounds = array<i64: 1, 100>}, {transform_indices = @transform_3, window_bounds = array<i64: 16, 100>}]} {
    %c0_i32 = arith.constant 0 : i32
    %0 = arith.cmpi eq, %arg2, %c0_i32 : i32
    %1 = arith.extui %0 : i1 to i32
    %c0_i32_0 = arith.constant 0 : i32
    %2 = arith.cmpi ne, %1, %c0_i32_0 : i32
    scf.if %2 {
      %cst_10 = arith.constant 0.000000e+00 : f32
      %14 = vector.broadcast %cst_10 : f32 to vector<16x100xf32>
      %c0_11 = arith.constant 0 : index
      %c0_12 = arith.constant 0 : index
      %15 = vector.load %arg7[%c0_11, %c0_12] : memref<16x100xf32, #tpu.memory_space<vmem>>, vector<16x100xf32>
      tpu.vector_store %arg7[%c0_11, %c0_12], %14 {strides = array<i32>} : memref<16x100xf32, #tpu.memory_space<vmem>>, vector<16x100xf32>,
    } else {
    }
    %c0 = arith.constant 0 : index
    %c0_1 = arith.constant 0 : index
    %3 = vector.load %arg7[%c0, %c0_1] : memref<16x100xf32, #tpu.memory_space<vmem>>, vector<16x100xf32>
    %c0_2 = arith.constant 0 : index
    %c0_3 = arith.constant 0 : index
    %4 = vector.load %arg3[%c0_2, %c0_3] : memref<16x128xf32, #tpu.memory_space<vmem>>, vector<16x128xf32>
    %5 = arith.truncf %4 : vector<16x128xf32> to vector<16x128xbf16>
    %c0_4 = arith.constant 0 : index
    %c0_5 = arith.constant 0 : index
    %6 = vector.load %arg4[%c0_4, %c0_5] : memref<128x100xf32, #tpu.memory_space<vmem>>, vector<128x100xf32>
    %7 = arith.truncf %6 : vector<128x100xf32> to vector<128x100xbf16>
    %cst = arith.constant dense<0.000000e+00> : vector<16x100xf32>
    %8 = tpu.matmul %5, %7, %cst {dimension_numbers = #tpu.dot_dimension_numbers<[1], [0], [0], [1], [0, 0, 1, 1], [], []>} : vector<16x128xbf16>, vector<128x100xbf16>, vector<16x100xf32> -> vector<16x100xf32>
    %9 = arith.addf %3, %8 : vector<16x100xf32>
    %c0_6 = arith.constant 0 : index
    %c0_7 = arith.constant 0 : index
    %10 = vector.load %arg7[%c0_6, %c0_7] : memref<16x100xf32, #tpu.memory_space<vmem>>, vector<16x100xf32>
    tpu.vector_store %arg7[%c0_6, %c0_7], %9 {strides = array<i32>} : memref<16x100xf32, #tpu.memory_space<vmem>>, vector<16x100xf32>,
    %c0_i32_8 = arith.constant 0 : i32
    %11 = arith.cmpi eq, %arg2, %c0_i32_8 : i32
    %12 = arith.extui %11 : i1 to i32
    %c0_i32_9 = arith.constant 0 : i32
    %13 = arith.cmpi ne, %12, %c0_i32_9 : i32
    scf.if %13 {
      %c0_10 = arith.constant 0 : index
      %c0_11 = arith.constant 0 : index
      %14 = vector.load %arg7[%c0_10, %c0_11] : memref<16x100xf32, #tpu.memory_space<vmem>>, vector<16x100xf32>
      %c0_12 = arith.constant 0 : index
      %c0_13 = arith.constant 0 : index
      %15 = vector.load %arg5[%c0_12, %c0_13] : memref<1x100xf32, #tpu.memory_space<vmem>>, vector<1x100xf32>
      %16 = vector.broadcast %15 : vector<1x100xf32> to vector<16x100xf32>
      %17 = arith.addf %14, %16 : vector<16x100xf32>
      %c0_14 = arith.constant 0 : index
      %c0_15 = arith.constant 0 : index
      %18 = vector.load %arg6[%c0_14, %c0_15] : memref<16x100xf32, #tpu.memory_space<vmem>>, vector<16x100xf32>
      tpu.vector_store %arg6[%c0_14, %c0_15], %17 {strides = array<i32>} : memref<16x100xf32, #tpu.memory_space<vmem>>, vector<16x100xf32>,
    } else {
    }
    return
  }
  func.func @transform_0(%arg0: i32, %arg1: i32, %arg2: i32) -> (i32, i32) {
    %c0_i32 = arith.constant 0 : i32
    return %arg0, %arg2 : i32, i32
  }
  func.func @transform_1(%arg0: i32, %arg1: i32, %arg2: i32) -> (i32, i32) {
    %c0_i32 = arith.constant 0 : i32
    return %arg2, %arg1 : i32, i32
  }
  func.func @transform_2(%arg0: i32, %arg1: i32, %arg2: i32) -> (i32, i32) {
    %c0_i32 = arith.constant 0 : i32
    %c0_i32_0 = arith.constant 0 : i32
    return %c0_i32, %arg1 : i32, i32
  }
  func.func @transform_3(%arg0: i32, %arg1: i32, %arg2: i32) -> (i32, i32) {
    %c0_i32 = arith.constant 0 : i32
    return %arg0, %arg1 : i32, i32
  }
}

</mosaic_0001>

<bundles_post_ra>
// kernel: transformer_forward.31
= control target key start
LH: loop header
LB: loop body
LE: loop exit
PB: predicated region body
PF: predicated region fallthrough
CT: control target
= control target key end

     0   :  { %v207_v0 = vmov 0.0   ;;  %vm208_vm0 = vmmov 0   ;;  %s319_s1 = inlined_call_operand.vmem [shape: f32[128,128], index: 1, kind: input, shape index: {}]   ;;  %s320_s0 = inlined_call_operand.vmem [shape: f32[16,128], index: 0, kind: input, shape index: {}]   ;;  %s321_s2 = inlined_call_operand.vmem [shape: f32[1,128], index: 2, kind: input, shape index: {}]   ;;  %s322_s3 = inlined_call_operand.vmem [shape: f32[16,128], index: 3, kind: input, shape index: {}]   ;;  %s323_s4 = inlined_call_operand.vmem [shape: f32[1,128], index: 4, kind: input, shape index: {}]   ;;  %s324_s5 = inlined_call_operand.vmem [shape: f32[1,128], index: 5, kind: input, shape index: {}]   ;;  %s325_s6 = inlined_call_operand.vmem [shape: f32[16,128], index: 6, kind: output, shape index: {}]  }
   0x1   :  { %181 = vmatprep.subr.bf16.mxu0 %v207_v0  ;;  %v35_v1 = vld [vmem:[%s319_s1] sm:$0xff]  ;;  %v36_v2 = vld [vmem:[%s319_s1 + $0x8] sm:$0xff]  ;;  %v37_v3 = vld [vmem:[%s319_s1 + $0x10] sm:$0xff]  ;;  %197 = vmatprep.mubr.msk.bf16.mxu0 %vm208_vm0, %v207_v0 }
   0x2   :  { %v51_v4 = vpack.c.bf16 %v36_v2, %v35_v1  ;;  %v38_v5 = vld [vmem:[%s319_s1 + $0x18] sm:$0xff]  ;;  %v39_v7 = vld [vmem:[%s319_s1 + $0x20] sm:$0xff]  ;;  %v40_v8 = vld [vmem:[%s319_s1 + $0x28] sm:$0xff] }
   0x3   :  { %v52_v6 = vpack.c.bf16 %v38_v5, %v37_v3  ;;  %v53_v9 = vpack.c.bf16 %v40_v8, %v39_v7  ;;  %v41_v10 = vld [vmem:[%s319_s1 + $0x30] sm:$0xff]  ;;  %v42_v11 = vld [vmem:[%s319_s1 + $0x38] sm:$0xff]  ;;  %v43_v13 = vld [vmem:[%s319_s1 + $0x40] sm:$0xff] }
   0x4   :  { %182 = vmatpush3.bf16.msra.mxu0 %v51_v4  ;;  %v54_v12 = vpack.c.bf16 %v42_v11, %v41_v10  ;;  %v44_v14 = vld [vmem:[%s319_s1 + $0x48] sm:$0xff]  ;;  %v45_v16 = vld [vmem:[%s319_s1 + $0x50] sm:$0xff]  ;;  %v46_v17 = vld [vmem:[%s319_s1 + $0x58] sm:$0xff] }
   0x5   :  { %183 = vmatprep.subr.bf16.mxu0 %v207_v0  ;;  %v55_v15 = vpack.c.bf16 %v44_v14, %v43_v13  ;;  %v56_v18 = vpack.c.bf16 %v46_v17, %v45_v16  ;;  %v47_v19 = vld [vmem:[%s319_s1 + $0x60] sm:$0xff]  ;;  %v48_v20 = vld [vmem:[%s319_s1 + $0x68] sm:$0xff]  ;;  %v49_v22 = vld [vmem:[%s319_s1 + $0x70] sm:$0xff] }
   0x6   :  { %v57_v21 = vpack.c.bf16 %v48_v20, %v47_v19  ;;  %v50_v23 = vld [vmem:[%s319_s1 + $0x78] sm:$0xff]  ;;  %v32_v25 = vld [vmem:[%s320_s0] sm:$0xff]  ;;  %v33_v26 = vld [vmem:[%s320_s0 + $0x8] sm:$0xff] }
   0x7   :  { %v58_v24 = vpack.c.bf16 %v50_v23, %v49_v22  ;;  %v34_v27 = vpack.c.bf16 %v33_v26, %v32_v25  ;;  %v169_v28 = vld [vmem:[%s321_s2] ss:$0 sm:$0xff]  ;;  %v119_v37 = vld [vmem:[%s322_s3 + $0x8] sm:$0xff] }
   0x8   :  { %184 = vmatpush3.bf16.msra.mxu0 %v52_v6  ;;  %v118_v30 = vld [vmem:[%s322_s3] sm:$0xff] }
   0x9   :  { %185 = vmatprep.subr.bf16.mxu0 %v207_v0  ;;  %v170_v54 = vld [vmem:[%s323_s4] ss:$0 sm:$0xff] }
   0xa   :  { %v171_v56 = vld [vmem:[%s324_s5] ss:$0 sm:$0xff] }
   0xc   :  { %186 = vmatpush3.bf16.msra.mxu0 %v53_v9 }
   0xd   :  { %187 = vmatprep.subr.bf16.mxu0 %v207_v0 }
  0x10   :  { %188 = vmatpush3.bf16.msra.mxu0 %v54_v12 }
  0x11   :  { %189 = vmatprep.subr.bf16.mxu0 %v207_v0 }
  0x14   :  { %190 = vmatpush3.bf16.msra.mxu0 %v55_v15 }
  0x15   :  { %191 = vmatprep.subr.bf16.mxu0 %v207_v0 }
  0x18   :  { %192 = vmatpush3.bf16.msra.mxu0 %v56_v18 }
  0x19   :  { %193 = vmatprep.subr.bf16.mxu0 %v207_v0 }
  0x1c   :  { %194 = vmatpush3.bf16.msra.mxu0 %v57_v21 }
  0x1d   :  { %195 = vmatprep.subr.bf16.mxu0 %v207_v0 }
  0x20   :  { %196 = vmatpush3.bf16.msra.mxu0 %v58_v24 }
  0x23   :  { %198 = vmatmul.mubr.bf16.vlgmr.msra.gmra.mrb[0].mxu0 %v34_v27 }
  0xf6   :  { %v93_v29 = vpop.f32.mrb[0].mxu0 }
  0xf7   :  { %v116_v31 = vadd.f32 %v169_v28, %v93_v29  ;;  %v199_v32 = vpop.f32.mrb[1].mxu0 }
  0xf8   :  { %v96_v33 = vpop.f32.mrb[2].mxu0 }
  0xf9   :  { %v117_v34 = vadd.f32 %v169_v28, %v96_v33  ;;  %v200_v35 = vpop.f32.mrb[3].mxu0  ;;  %v120_v36 = vadd.f32 %v118_v30, %v116_v31 }
  0xfb   :  { %122 = vadd.xlane.f32.xlu0 %v120_v36  ;;  %v121_v38 = vadd.f32 %v119_v37, %v117_v34 }
  0xff   :  { %124 = vadd.xlane.f32.xlu0 %v121_v38 }
 0x188   :  { %v123_v39 = vpop.xlane.xlu0 %122 }
 0x189   :  { %v127_v40 = vmul.f32 0.0078125, %v123_v39 }
 0x18b   :  { %v129_v41 = vsub.f32 %v120_v36, %v127_v40 }
 0x18c   :  { %v125_v42 = vpop.xlane.xlu0 %124 }
 0x18d   :  { %v128_v43 = vmul.f32 0.0078125, %v125_v42  ;;  %v131_v44 = vmul.f32 %v129_v41, %v129_v41 }
 0x18f   :  { %v130_v45 = vsub.f32 %v121_v38, %v128_v43  ;;  %133 = vadd.xlane.f32.xlu1 %v131_v44 }
 0x191   :  { %v132_v46 = vmul.f32 %v130_v45, %v130_v45 }
 0x193   :  { %135 = vadd.xlane.f32.xlu1 %v132_v46 }
 0x21c   :  { %v134_v47 = vpop.xlane.xlu1 %133 }
 0x21d   :  { %v137_v48 = vmul.f32 0.0078125, %v134_v47 }
 0x21f   :  { %v139_v49 = vadd.f32 1e-05, %v137_v48 }
 0x220   :  { %v136_v50 = vpop.xlane.xlu1 %135 }
 0x221   :  { %203 = vrsqrt.f32 %v139_v49  ;;  %v138_v51 = vmul.f32 0.0078125, %v136_v50 }
 0x223   :  { %v140_v52 = vadd.f32 1e-05, %v138_v51 }
 0x225   :  { %205 = vrsqrt.f32 %v140_v52 }
 0x22b   :  { %v204_v53 = vpop.eup %203 }
 0x22c   :  { %v143_v55 = vmul.f32 %v204_v53, %v129_v41 }
 0x22e   :  { %v152_v57 = vmul.f32 %v170_v54, %v143_v55 }
 0x22f   :  { %v206_v58 = vpop.eup %205 }
 0x230   :  { %v161_v59 = vadd.f32 %v171_v56, %v152_v57  ;;  %v144_v60 = vmul.f32 %v206_v58, %v130_v45 }
 0x232   :  { %163 = vst [vmem:[%s325_s6] sm:$0xff] %v161_v59  ;;  %v153_v61 = vmul.f32 %v170_v54, %v144_v60 }
 0x234   :  { %v162_v62 = vadd.f32 %v171_v56, %v153_v61 }
 0x236   :  { %164 = vst [vmem:[%s325_s6 + $0x8] sm:$0xff] %v162_v62 }

// kernel: transformer_forward.32
= control target key start
LH: loop header
LB: loop body
LE: loop exit
PB: predicated region body
PF: predicated region fallthrough
CT: control target
= control target key end

     0   :  { %v165_v3 = vmov 0   ;;  %v138_v52 = vlaneseq  ;;  %s303_s1 = inlined_call_operand.vmem [shape: f32[128,256], index: 1, kind: input, shape index: {}]   ;;  %s304_s0 = inlined_call_operand.vmem [shape: f32[16,128], index: 0, kind: input, shape index: {}]   ;;  %s305_s2 = inlined_call_operand.vmem [shape: f32[1,256], index: 2, kind: input, shape index: {}]   ;;  %s306_s3 = inlined_call_operand.vmem [shape: f32[16,256], index: 3, kind: output, shape index: {}]  }
   0x1   :  { %v31_v0 = vld [vmem:[%s303_s1 + $0x8] sm:$0xff]  ;;  %v33_v1 = vld [vmem:[%s303_s1 + $0x18] sm:$0xff]  ;;  %v30_v2 = vld [vmem:[%s303_s1] sm:$0xff]  ;;  %110 = vmatprep.mubr.bf16.mxu0 %v165_v3 }
   0x2   :  { %v63_v4 = vpack.c.bf16 %v33_v1, %v31_v0  ;;  %v32_v5 = vld [vmem:[%s303_s1 + $0x10] sm:$0xff]  ;;  %v35_v6 = vld [vmem:[%s303_s1 + $0x28] sm:$0xff]  ;;  %v37_v7 = vld [vmem:[%s303_s1 + $0x38] sm:$0xff]  ;;  %v139_v53 = vshrl.u32 %v138_v52, 7 }
   0x3   :  { %v62_v8 = vpack.c.bf16 %v32_v5, %v30_v2  ;;  %v65_v9 = vpack.c.bf16 %v37_v7, %v35_v6  ;;  %v34_v10 = vld [vmem:[%s303_s1 + $0x20] sm:$0xff]  ;;  %v36_v11 = vld [vmem:[%s303_s1 + $0x30] sm:$0xff]  ;;  %v39_v12 = vld [vmem:[%s303_s1 + $0x48] sm:$0xff] }
   0x4   :  { %78 = vmatprep.subr.bf16.mxu0 %v63_v4  ;;  %v41_v13 = vld [vmem:[%s303_s1 + $0x58] sm:$0xff]  ;;  %v64_v14 = vpack.c.bf16 %v36_v11, %v34_v10  ;;  %v38_v16 = vld [vmem:[%s303_s1 + $0x40] sm:$0xff]  ;;  %v40_v17 = vld [vmem:[%s303_s1 + $0x50] sm:$0xff]  ;;  %v140_v54 = vsub.s32 0, %v139_v53  ;;  %v144_v56 = vsub.s32 1, %v139_v53 }
   0x5   :  { %79 = vmatpush1.bf16.msra.mxu0 %v62_v8  ;;  %v67_v15 = vpack.c.bf16 %v41_v13, %v39_v12  ;;  %v43_v18 = vld [vmem:[%s303_s1 + $0x68] sm:$0xff]  ;;  %v45_v19 = vld [vmem:[%s303_s1 + $0x78] sm:$0xff]  ;;  %v66_v20 = vpack.c.bf16 %v40_v17, %v38_v16  ;;  %v42_v22 = vld [vmem:[%s303_s1 + $0x60] sm:$0xff] }
   0x6   :  { %80 = vmatprep.subr.bf16.mxu0 %v65_v9  ;;  %v69_v21 = vpack.c.bf16 %v45_v19, %v43_v18  ;;  %v44_v23 = vld [vmem:[%s303_s1 + $0x70] sm:$0xff]  ;;  %v47_v24 = vld [vmem:[%s303_s1 + $0x88] sm:$0xff]  ;;  %v49_v25 = vld [vmem:[%s303_s1 + $0x98] sm:$0xff] }
   0x7   :  { %v68_v26 = vpack.c.bf16 %v44_v23, %v42_v22  ;;  %v71_v27 = vpack.c.bf16 %v49_v25, %v47_v24  ;;  %v46_v28 = vld [vmem:[%s303_s1 + $0x80] sm:$0xff]  ;;  %v48_v29 = vld [vmem:[%s303_s1 + $0x90] sm:$0xff]  ;;  %v51_v30 = vld [vmem:[%s303_s1 + $0xa8] sm:$0xff] }
   0x8   :  { %v53_v31 = vld [vmem:[%s303_s1 + $0xb8] sm:$0xff]  ;;  %v70_v32 = vpack.c.bf16 %v48_v29, %v46_v28  ;;  %v50_v34 = vld [vmem:[%s303_s1 + $0xa0] sm:$0xff]  ;;  %v52_v35 = vld [vmem:[%s303_s1 + $0xb0] sm:$0xff] }
   0x9   :  { %81 = vmatpush1.bf16.msra.mxu0 %v64_v14  ;;  %v73_v33 = vpack.c.bf16 %v53_v31, %v51_v30  ;;  %v55_v36 = vld [vmem:[%s303_s1 + $0xc8] sm:$0xff]  ;;  %v57_v37 = vld [vmem:[%s303_s1 + $0xd8] sm:$0xff]  ;;  %v72_v38 = vpack.c.bf16 %v52_v35, %v50_v34  ;;  %v54_v40 = vld [vmem:[%s303_s1 + $0xc0] sm:$0xff] }
   0xa   :  { %82 = vmatprep.subr.bf16.mxu0 %v67_v15  ;;  %v75_v39 = vpack.c.bf16 %v57_v37, %v55_v36  ;;  %v56_v41 = vld [vmem:[%s303_s1 + $0xd0] sm:$0xff]  ;;  %v59_v42 = vld [vmem:[%s303_s1 + $0xe8] sm:$0xff]  ;;  %v61_v43 = vld [vmem:[%s303_s1 + $0xf8] sm:$0xff] }
   0xb   :  { %v74_v44 = vpack.c.bf16 %v56_v41, %v54_v40  ;;  %v77_v45 = vpack.c.bf16 %v61_v43, %v59_v42  ;;  %v58_v46 = vld [vmem:[%s303_s1 + $0xe0] sm:$0xff]  ;;  %v60_v47 = vld [vmem:[%s303_s1 + $0xf0] sm:$0xff]  ;;  %v28_v50 = vld [vmem:[%s304_s0 + $0x8] sm:$0xff] }
   0xc   :  { %v76_v48 = vpack.c.bf16 %v60_v47, %v58_v46  ;;  %v27_v49 = vld [vmem:[%s304_s0] sm:$0xff] }
   0xd   :  { %83 = vmatpush1.bf16.msra.mxu0 %v66_v20  ;;  %v29_v51 = vpack.c.bf16 %v28_v50, %v27_v49  ;;  %v136_v55 = vld [vmem:[%s305_s2] sm:$0x3] }
   0xe   :  { %84 = vmatprep.subr.bf16.mxu0 %v69_v21  ;;  %v141_v57 = vrot.slane %v136_v55, %v140_v54  ;;  %v145_v58 = vrot.slane %v136_v55, %v144_v56 }
  0x11   :  { %85 = vmatpush1.bf16.msra.mxu0 %v68_v26 }
  0x12   :  { %86 = vmatprep.subr.bf16.mxu0 %v71_v27 }
  0x15   :  { %87 = vmatpush1.bf16.msra.mxu0 %v70_v32 }
  0x16   :  { %88 = vmatprep.subr.bf16.mxu0 %v73_v33 }
  0x19   :  { %89 = vmatpush1.bf16.msra.mxu0 %v72_v38 }
  0x1a   :  { %90 = vmatprep.subr.bf16.mxu0 %v75_v39 }
  0x1d   :  { %91 = vmatpush1.bf16.msra.mxu0 %v74_v44 }
  0x1e   :  { %92 = vmatprep.subr.bf16.mxu0 %v77_v45 }
  0x21   :  { %93 = vmatpush1.bf16.msra.mxu0 %v76_v48 }
  0x24   :  { %111 = vmatmul.mubr.bf16.vlgmr.msra.gmra.mrb[0].mxu0 %v29_v51 }
  0xf7   :  { %v112_v59 = vpop.f32.mrb[0].mxu0 }
  0xf8   :  { %v148_v60 = vadd.f32 %v141_v57, %v112_v59  ;;  %v114_v61 = vpop.f32.mrb[1].mxu0 }
  0xf9   :  { %v149_v62 = vadd.f32 %v145_v58, %v114_v61  ;;  %v116_v63 = vpop.f32.mrb[2].mxu0 }
  0xfa   :  { %v152_v0 = vmax.f32 %v148_v60, 0.0  ;;  %v150_v1 = vadd.f32 %v141_v57, %v116_v63  ;;  %v118_v2 = vpop.f32.mrb[3].mxu0 }
  0xfb   :  { %v153_v3 = vmax.f32 %v149_v62, 0.0  ;;  %v151_v4 = vadd.f32 %v145_v58, %v118_v2 }
  0xfc   :  { %156 = vst [vmem:[%s306_s3] sm:$0xff] %v152_v0  ;;  %v154_v5 = vmax.f32 %v150_v1, 0.0 }
  0xfd   :  { %157 = vst [vmem:[%s306_s3 + $0x8] sm:$0xff] %v153_v3  ;;  %v155_v6 = vmax.f32 %v151_v4, 0.0 }
  0xfe   :  { %158 = vst [vmem:[%s306_s3 + $0x10] sm:$0xff] %v154_v5 }
  0xff   :  { %159 = vst [vmem:[%s306_s3 + $0x18] sm:$0xff] %v155_v6 }

// kernel: transformer_forward.29
= control target key start
LH: loop header
LB: loop body
LE: loop exit
PB: predicated region body
PF: predicated region fallthrough
CT: control target
= control target key end

     0   :  { %v276_v0 = vmov 0.0   ;;  %vm277_vm0 = vmmov 0   ;;  %v278_v8 = vmov 0   ;;  %s479_s1 = inlined_call_operand.vmem [shape: f32[128,384], index: 1, kind: input, shape index: {}]   ;;  %s480_s0 = inlined_call_operand.vmem [shape: f32[16,128], index: 0, kind: input, shape index: {}]   ;;  %s481_s2 = inlined_call_operand.vmem [shape: f32[1,384], index: 2, kind: input, shape index: {}]   ;;  %s482_s3 = inlined_call_operand.vmem [shape: f32[16,384], index: 3, kind: output, shape index: {}]  }
   0x1   :  { %253 = vmatprep.subr.bf16.mxu1 %v276_v0  ;;  %v35_v1 = vld [vmem:[%s479_s1 + $0x8] sm:$0xff]  ;;  %v38_v2 = vld [vmem:[%s479_s1 + $0x20] sm:$0xff]  ;;  %v36_v3 = vld [vmem:[%s479_s1 + $0x10] sm:$0xff]  ;;  %269 = vmatprep.mubr.msk.bf16.mxu1 %vm277_vm0, %v276_v0 }
   0x2   :  { %v83_v4 = vpack.c.bf16 %v38_v2, %v35_v1  ;;  %v39_v5 = vld [vmem:[%s479_s1 + $0x28] sm:$0xff]  ;;  %v34_v6 = vld [vmem:[%s479_s1] sm:$0xff]  ;;  %v37_v7 = vld [vmem:[%s479_s1 + $0x18] sm:$0xff]  ;;  %138 = vmatprep.mubr.bf16.mxu0 %v278_v8 }
   0x3   :  { %v84_v9 = vpack.c.bf16 %v39_v5, %v36_v3  ;;  %v82_v10 = vpack.c.bf16 %v37_v7, %v34_v6  ;;  %v41_v11 = vld [vmem:[%s479_s1 + $0x38] sm:$0xff]  ;;  %v44_v12 = vld [vmem:[%s479_s1 + $0x50] sm:$0xff]  ;;  %v42_v13 = vld [vmem:[%s479_s1 + $0x40] sm:$0xff] }
   0x4   :  { %106 = vmatprep.subr.bf16.mxu0 %v83_v4  ;;  %v86_v14 = vpack.c.bf16 %v44_v12, %v41_v11  ;;  %v45_v15 = vld [vmem:[%s479_s1 + $0x58] sm:$0xff]  ;;  %v40_v16 = vld [vmem:[%s479_s1 + $0x30] sm:$0xff]  ;;  %v43_v17 = vld [vmem:[%s479_s1 + $0x48] sm:$0xff] }
   0x5   :  { %254 = vmatpush3.bf16.msra.mxu1 %v84_v9  ;;  %107 = vmatpush1.bf16.msra.mxu0 %v82_v10  ;;  %v87_v18 = vpack.c.bf16 %v45_v15, %v42_v13  ;;  %v85_v19 = vpack.c.bf16 %v43_v17, %v40_v16  ;;  %v47_v20 = vld [vmem:[%s479_s1 + $0x68] sm:$0xff]  ;;  %v50_v21 = vld [vmem:[%s479_s1 + $0x80] sm:$0xff]  ;;  %v48_v22 = vld [vmem:[%s479_s1 + $0x70] sm:$0xff] }
   0x6   :  { %255 = vmatprep.subr.bf16.mxu1 %v276_v0  ;;  %108 = vmatprep.subr.bf16.mxu0 %v86_v14  ;;  %v89_v23 = vpack.c.bf16 %v50_v21, %v47_v20  ;;  %v51_v24 = vld [vmem:[%s479_s1 + $0x88] sm:$0xff]  ;;  %v46_v25 = vld [vmem:[%s479_s1 + $0x60] sm:$0xff]  ;;  %v49_v26 = vld [vmem:[%s479_s1 + $0x78] sm:$0xff]  ;;  %v213_v14 = vlaneseq }
   0x7   :  { %v53_v27 = vld [vmem:[%s479_s1 + $0x98] sm:$0xff]  ;;  %v56_v28 = vld [vmem:[%s479_s1 + $0xb0] sm:$0xff]  ;;  %v90_v29 = vpack.c.bf16 %v51_v24, %v48_v22  ;;  %v88_v30 = vpack.c.bf16 %v49_v26, %v46_v25  ;;  %v54_v31 = vld [vmem:[%s479_s1 + $0xa0] sm:$0xff] }
   0x8   :  { %v92_v32 = vpack.c.bf16 %v56_v28, %v53_v27  ;;  %v57_v33 = vld [vmem:[%s479_s1 + $0xb8] sm:$0xff]  ;;  %v52_v34 = vld [vmem:[%s479_s1 + $0x90] sm:$0xff]  ;;  %v55_v35 = vld [vmem:[%s479_s1 + $0xa8] sm:$0xff]  ;;  %v214_v15 = vshrl.u32 %v213_v14, 7 }
   0x9   :  { %256 = vmatpush3.bf16.msra.mxu1 %v87_v18  ;;  %109 = vmatpush1.bf16.msra.mxu0 %v85_v19  ;;  %v59_v36 = vld [vmem:[%s479_s1 + $0xc8] sm:$0xff]  ;;  %v62_v37 = vld [vmem:[%s479_s1 + $0xe0] sm:$0xff]  ;;  %v93_v38 = vpack.c.bf16 %v57_v33, %v54_v31  ;;  %v91_v39 = vpack.c.bf16 %v55_v35, %v52_v34  ;;  %v60_v40 = vld [vmem:[%s479_s1 + $0xd0] sm:$0xff] }
   0xa   :  { %257 = vmatprep.subr.bf16.mxu1 %v276_v0  ;;  %110 = vmatprep.subr.bf16.mxu0 %v89_v23  ;;  %v95_v41 = vpack.c.bf16 %v62_v37, %v59_v36  ;;  %v63_v42 = vld [vmem:[%s479_s1 + $0xe8] sm:$0xff]  ;;  %v58_v43 = vld [vmem:[%s479_s1 + $0xc0] sm:$0xff]  ;;  %v61_v44 = vld [vmem:[%s479_s1 + $0xd8] sm:$0xff]  ;;  %v223_v16 = vsub.s32 2, %v214_v15  ;;  %v215_v17 = vsub.s32 0, %v214_v15  ;;  %v219_v19 = vsub.s32 1, %v214_v15 }
   0xb   :  { %v65_v45 = vld [vmem:[%s479_s1 + $0xf8] sm:$0xff]  ;;  %v68_v46 = vld [vmem:[%s479_s1 + $0x110] sm:$0xff]  ;;  %v96_v47 = vpack.c.bf16 %v63_v42, %v60_v40  ;;  %v94_v48 = vpack.c.bf16 %v61_v44, %v58_v43  ;;  %v66_v49 = vld [vmem:[%s479_s1 + $0x100] sm:$0xff] }
   0xc   :  { %v98_v50 = vpack.c.bf16 %v68_v46, %v65_v45  ;;  %v69_v51 = vld [vmem:[%s479_s1 + $0x118] sm:$0xff]  ;;  %v64_v52 = vld [vmem:[%s479_s1 + $0xf0] sm:$0xff]  ;;  %v67_v53 = vld [vmem:[%s479_s1 + $0x108] sm:$0xff] }
   0xd   :  { %258 = vmatpush3.bf16.msra.mxu1 %v90_v29  ;;  %111 = vmatpush1.bf16.msra.mxu0 %v88_v30  ;;  %v71_v54 = vld [vmem:[%s479_s1 + $0x128] sm:$0xff]  ;;  %v74_v55 = vld [vmem:[%s479_s1 + $0x140] sm:$0xff]  ;;  %v99_v56 = vpack.c.bf16 %v69_v51, %v66_v49  ;;  %v97_v57 = vpack.c.bf16 %v67_v53, %v64_v52  ;;  %v72_v58 = vld [vmem:[%s479_s1 + $0x130] sm:$0xff] }
   0xe   :  { %259 = vmatprep.subr.bf16.mxu1 %v276_v0  ;;  %112 = vmatprep.subr.bf16.mxu0 %v92_v32  ;;  %v101_v59 = vpack.c.bf16 %v74_v55, %v71_v54  ;;  %v75_v60 = vld [vmem:[%s479_s1 + $0x148] sm:$0xff]  ;;  %v70_v61 = vld [vmem:[%s479_s1 + $0x120] sm:$0xff]  ;;  %v73_v62 = vld [vmem:[%s479_s1 + $0x138] sm:$0xff] }
   0xf   :  { %v77_v63 = vld [vmem:[%s479_s1 + $0x158] sm:$0xff]  ;;  %v80_v1 = vld [vmem:[%s479_s1 + $0x170] sm:$0xff]  ;;  %v102_v2 = vpack.c.bf16 %v75_v60, %v72_v58  ;;  %v100_v3 = vpack.c.bf16 %v73_v62, %v70_v61  ;;  %v78_v4 = vld [vmem:[%s479_s1 + $0x160] sm:$0xff] }
  0x10   :  { %v104_v5 = vpack.c.bf16 %v80_v1, %v77_v63  ;;  %v81_v6 = vld [vmem:[%s479_s1 + $0x178] sm:$0xff]  ;;  %v76_v7 = vld [vmem:[%s479_s1 + $0x150] sm:$0xff]  ;;  %v79_v8 = vld [vmem:[%s479_s1 + $0x168] sm:$0xff] }
  0x11   :  { %260 = vmatpush3.bf16.msra.mxu1 %v93_v38  ;;  %113 = vmatpush1.bf16.msra.mxu0 %v91_v39  ;;  %v105_v9 = vpack.c.bf16 %v81_v6, %v78_v4  ;;  %v103_v10 = vpack.c.bf16 %v79_v8, %v76_v7  ;;  %v31_v11 = vld [vmem:[%s480_s0] sm:$0xff]  ;;  %v32_v12 = vld [vmem:[%s480_s0 + $0x8] sm:$0xff] }
  0x12   :  { %261 = vmatprep.subr.bf16.mxu1 %v276_v0  ;;  %114 = vmatprep.subr.bf16.mxu0 %v95_v41  ;;  %v33_v13 = vpack.c.bf16 %v32_v12, %v31_v11  ;;  %v211_v18 = vld [vmem:[%s481_s2] sm:$0x7] }
  0x13   :  { %v224_v20 = vrot.slane %v211_v18, %v223_v16  ;;  %v216_v21 = vrot.slane %v211_v18, %v215_v17  ;;  %v220_v22 = vrot.slane %v211_v18, %v219_v19 }
  0x15   :  { %262 = vmatpush3.bf16.msra.mxu1 %v96_v47  ;;  %115 = vmatpush1.bf16.msra.mxu0 %v94_v48 }
  0x16   :  { %263 = vmatprep.subr.bf16.mxu1 %v276_v0  ;;  %116 = vmatprep.subr.bf16.mxu0 %v98_v50 }
  0x19   :  { %264 = vmatpush3.bf16.msra.mxu1 %v99_v56  ;;  %117 = vmatpush1.bf16.msra.mxu0 %v97_v57 }
  0x1a   :  { %265 = vmatprep.subr.bf16.mxu1 %v276_v0  ;;  %118 = vmatprep.subr.bf16.mxu0 %v101_v59 }
  0x1d   :  { %266 = vmatpush3.bf16.msra.mxu1 %v102_v2  ;;  %119 = vmatpush1.bf16.msra.mxu0 %v100_v3 }
  0x1e   :  { %267 = vmatprep.subr.bf16.mxu1 %v276_v0  ;;  %120 = vmatprep.subr.bf16.mxu0 %v104_v5 }
  0x21   :  { %268 = vmatpush3.bf16.msra.mxu1 %v105_v9  ;;  %121 = vmatpush1.bf16.msra.mxu0 %v103_v10 }
  0x24   :  { %270 = vmatmul.mubr.bf16.vlgmr.msra.gmra.mrb[0].mxu1 %v33_v13  ;;  %139 = vmatmul.mubr.bf16.vlgmr.msra.gmra.mrb[0].mxu0 %v33_v13 }
  0xf7   :  { %v183_v23 = vpop.f32.mrb[0].mxu1  ;;  %v140_v0 = vpop.f32.mrb[0].mxu0 }
  0xf8   :  { %v230_v24 = vadd.f32 %v224_v20, %v183_v23  ;;  %v228_v25 = vadd.f32 %v216_v21, %v140_v0  ;;  %v271_v26 = vpop.f32.mrb[1].mxu1  ;;  %v142_v27 = vpop.f32.mrb[1].mxu0 }
  0xf9   :  { %v229_v28 = vadd.f32 %v220_v22, %v142_v27  ;;  %v186_v29 = vpop.f32.mrb[2].mxu1  ;;  %v144_v30 = vpop.f32.mrb[2].mxu0 }
  0xfa   :  { %236 = vst [vmem:[%s482_s3 + $0x10] sm:$0xff] %v230_v24  ;;  %234 = vst [vmem:[%s482_s3] sm:$0xff] %v228_v25  ;;  %v233_v31 = vadd.f32 %v224_v20, %v186_v29  ;;  %v231_v32 = vadd.f32 %v216_v21, %v144_v30  ;;  %v272_v33 = vpop.f32.mrb[3].mxu1  ;;  %v146_v34 = vpop.f32.mrb[3].mxu0 }
  0xfb   :  { %235 = vst [vmem:[%s482_s3 + $0x8] sm:$0xff] %v229_v28  ;;  %v232_v35 = vadd.f32 %v220_v22, %v146_v34 }
  0xfc   :  { %239 = vst [vmem:[%s482_s3 + $0x28] sm:$0xff] %v233_v31  ;;  %237 = vst [vmem:[%s482_s3 + $0x18] sm:$0xff] %v231_v32 }
  0xfd   :  { %238 = vst [vmem:[%s482_s3 + $0x20] sm:$0xff] %v232_v35 }

// kernel: transformer_forward.30
= control target key start
LH: loop header
LB: loop body
LE: loop exit
PB: predicated region body
PF: predicated region fallthrough
CT: control target
= control target key end

     0   :  { %s1131_s15 = smov 0   ;;  %s1133_s16 = smov 0   ;;  %s1264_s0 = inlined_call_operand.vmem [shape: f32[2,8,384], index: 0, kind: input, shape index: {}, may-alias: {0,1,2}]   ;;  %s1265_s1 = inlined_call_operand.vmem [shape: f32[2,8,384], index: 1, kind: input, shape index: {}, may-alias: {0,1,2}]   ;;  %s1266_s2 = inlined_call_operand.vmem [shape: f32[2,8,384], index: 2, kind: input, shape index: {}, may-alias: {0,1,2}]   ;;  %s1267_s3 = inlined_call_operand.vmem [shape: s8[2,8,8], index: 3, kind: input, shape index: {}]   ;;  %s1268_s4 = inlined_call_operand.vmem [shape: f32[2,8,128], index: 4, kind: output, shape index: {}]  }
   0x1   :  { %s1135_s17 = smov 0  }
   0x2 LB: > { %s26_s18 = sadd.s32 1, %s1095_s16  ;;  %p937_p0 = scmp.ge.s32.totalorder %s1099_s17, 1  ;;  %s1099_s17 = sphi %s1135_s17, %s14_s17   ;;  %s1095_s16 = sphi %s1133_s16, %s1270_s16   ;;  %s1091_s15 = sphi %s1131_s15, %s1269_s15  }
   0x3   : > { %p28_p1 = scmp.ge.s32.totalorder %s26_s18, 2  ;;  %p218_p2 = scmp.lt.s32.totalorder %s1099_s17, 3 }
   0x5   : > { %s1272_s18 = smov (%p28_p1, %s26_s18), 0  ;;  %p219_p3 = pnand %p937_p0, %p218_p2 }
   0x6   : > { %p269_p4 = scmp.lt.s32.totalorder (!%p219_p3), %s1091_s15, 1  ;;  %v1101_v1 = vmov (!%p219_p3), 0.0   ;;  %vm1102_vm0 = vmmov (!%p219_p3), 0   ;;  %vm354_vm1 = vcmask (!%p219_p3), 261120   ;;  %vm400_vm3 = vcmask (!%p219_p3), 64512   ;;  %s1103_s7 = smov (!%p219_p3), 96  }
   0x7   : > { %222 = sbr.rel (%p219_p3) target bundleno = 1579 (0x62b), region = 36  ;;  %975 = vmatprep.subr.bf16.mxu0 (!%p219_p3), %v1101_v1  ;;  %983 = vmatprep.subr.bf16.mxu1 (!%p219_p3), %v1101_v1  ;;  %vm416_vm4 = vcmask (!%p219_p3), 1043456   ;;  %s1104_s8 = smov (!%p219_p3), 64   ;;  %vm574_vm5 = vcmask (!%p219_p3), 523520   ;;  %vm687_vm6 = vcmask (!%p219_p3), 785920   ;;  %vm800_vm7 = vcmask (!%p219_p3), 1048320  }
   0x8   : > { %979 = vmatprep.mubr.msk.bf16.mxu0 (!%p219_p3), %vm1102_vm0, %v1101_v1  ;;  %985 = vmatprep.mubr.msk.bf16.mxu1 (!%p219_p3), %vm1102_vm0, %v1101_v1  ;;  %s1105_s9 = smov (!%p219_p3), 32  }
   0xe   : > { %s1274_s15 = smov (!%p269_p4, %s1091_s15), 1 }
   0xf   : > { %s1152_s19 = smul.u32 24, %s1274_s15  ;;  %s941_s26 = sshll.u32 %s1274_s15, 1 }
  0x10   : > { %s296_s29 = scalar_lea.vmem %s1267_s3, %s941_s26  ;;  %s942_s10 = sshll.u32 %s1274_s15, 3 }
  0x11   : > { %s869_s22 = scalar_lea.vmem %s1265_s1, %s1152_s19  ;;  %s277_s25 = scalar_lea.vmem %s1264_s0, %s1152_s19  ;;  %v350_v25 = vld [vmem:[%s296_s29] sm:$0x3] }
  0x12   : > { %v943_v0 = vld [vmem:[%s869_s22 + $0x8] sm:$0xff]  ;;  %v305_v6 = vld [vmem:[%s277_s25] sm:$0xff]  ;;  %v351_v26 = vunpack.c.0.s8 %v350_v25  ;;  %s873_s6 = scalar_lea.vmem %s1266_s2, %s1152_s19  ;;  %s1215_s13 = scalar_lea.vmem %s1268_s4, %s942_s10 }
  0x13   : > { %308 = vxpose.xlu0.b32.start.end [1/1] (short) %v943_v0, 128  ;;  %v306_v9 = vpack.c.bf16 %v305_v6, %v305_v6  ;;  %v944_v42 = vld [vmem:[%s873_s6 + $0x10] sm:$0xff] }
  0x14   : > { %v1177_v27 = vcvt.s32.f32 %v351_v26  ;;  %v1188_v43 = vpack.c.bf16 %v944_v42, %v944_v42 }
  0x16   : > { %vm353_vm2 = vcmp.ne.f32.partialorder %v1177_v27, 0.0  ;;  %v418_v44 = vsel %vm416_vm4, %v1188_v43, 0 }
  0x17   : > { %984 = vmatpush3.bf16.msra.mxu1 %v418_v44 }
  0x18   : > { %989 = vmatprep.subr.bf16.mxu1 %v1101_v1 }
  0x93   : > { %v324_v2 = vpop.trf.xlu0 }
  0x97   : > { %v325_v3 = vpop.trf.xlu0 }
  0x98   : > { %v340_v4 = vpack.c.bf16 %v325_v3, %v324_v2 }
  0x9a   : > { %976 = vmatpush3.bf16.msra.mxu0 %v340_v4 }
  0x9b   : > { %v326_v5 = vpop.trf.xlu0  ;;  %977 = vmatprep.subr.bf16.mxu0 %v1101_v1 }
  0x9f   : > { %v327_v7 = vpop.trf.xlu0 }
  0xa0   : > { %v341_v8 = vpack.c.bf16 %v327_v7, %v326_v5 }
  0xa2   : > { %978 = vmatpush3.bf16.msra.mxu0 %v341_v8 }
  0xa3   : > { %997 = vmatprep.subr.bf16.mxu0 %v1101_v1  ;;  %v328_v10 = vpop.trf.xlu0 }
  0xa5   : > { %980 = vmatmul.mubr.msk.bf16.vlgmr.msra.gmra.mrb[0].mxu0 %vm354_vm1, %v306_v9 }
  0xa6   : > { %999 = vmatprep.mubr.msk.bf16.mxu0 %vm1102_vm0, %v1101_v1 }
  0xa7   : > { %v329_v11 = vpop.trf.xlu0 }
  0xa8   : > { %v342_v12 = vpack.c.bf16 %v329_v11, %v328_v10 }
  0xab   : > { %v330_v13 = vpop.trf.xlu0 }
  0xaf   : > { %v331_v14 = vpop.trf.xlu0 }
  0xb0   : > { %v343_v15 = vpack.c.bf16 %v331_v14, %v330_v13 }
  0xb3   : > { %v332_v16 = vpop.trf.xlu0 }
  0xb7   : > { %v333_v17 = vpop.trf.xlu0 }
  0xb8   : > { %v344_v18 = vpack.c.bf16 %v333_v17, %v332_v16 }
  0xbb   : > { %v334_v19 = vpop.trf.xlu0 }
  0xbf   : > { %v335_v20 = vpop.trf.xlu0 }
  0xc0   : > { %v345_v21 = vpack.c.bf16 %v335_v20, %v334_v19 }
  0xc3   : > { %v336_v22 = vpop.trf.xlu0 }
  0xc7   : > { %v337_v23 = vpop.trf.xlu0 }
  0xc8   : > { %v346_v24 = vpack.c.bf16 %v337_v23, %v336_v22 }
  0xcb   : > { %v338_v35 = vpop.trf.xlu0 }
  0xcf   : > { %v339_v36 = vpop.trf.xlu0 }
  0xd0   : > { %v347_v51 = vpack.c.bf16 %v339_v36, %v338_v35 }
 0x178   : > { %v392_v28 = vpop.f32.mrb[0].mxu0 }
 0x179   : > { %v398_v29 = vmul.f32 0.17677669, %v392_v28  ;;  %v981_v30 = vpop.f32.mrb[1].mxu0 }
 0x17a   : > { %v395_v31 = vpop.f32.mrb[2].mxu0 }
 0x17b   : > { %v982_v32 = vpop.f32.mrb[3].mxu0  ;;  %v399_v33 = vsel %vm353_vm2, %v398_v29, -1e+09 }
 0x17c   : > { %v401_v34 = vsel %vm400_vm3, %v399_v33, -inf }
 0x17d   : > { %402 = vmax.xlane.f32.xlu0 %v401_v34 }
 0x20a   : > { %v403_v37 = vpop.xlane.xlu0 %402 }
 0x20b   : > { %v404_v38 = vsub.f32 %v399_v33, %v403_v37 }
 0x20d   : > { %v405_v39 = vmul.f32 1.442695, %v404_v38 }
 0x20f   : > { %1061 = vpow2.f32 %v405_v39 }
 0x219   : > { %v1062_v40 = vpop.eup %1061 }
 0x21a   : > { %v407_v41 = vsel %vm400_vm3, %v1062_v40, 0.0 }
 0x21b   : > { %408 = vadd.xlane.f32.xlu1 %v407_v41 }
 0x22c   : > { %462 = vrot.lane.b32.xlu1 %v306_v9, %s1103_s7 }
 0x230   : > { %576 = vrot.lane.b32.xlu1 %v306_v9, %s1104_s8 }
 0x234   : > { %689 = vrot.lane.b32.xlu1 %v306_v9, %s1105_s9 }
 0x2a8   : > { %v409_v45 = vpop.xlane.xlu1 %408 }
 0x2a9   : > { %1063 = vrcp.f32 %v409_v45 }
 0x2ac   : > { %v463_v49 = vpop.permute.xlu1 %462 }
 0x2b0   : > { %v577_v50 = vpop.permute.xlu1 %576 }
 0x2b3   : > { %v1064_v46 = vpop.eup %1063 }
 0x2b4   : > { %v411_v47 = vmul.f32 %v1064_v46, %v1062_v40  ;;  %v690_v52 = vpop.permute.xlu1 %689 }
 0x2b6   : > { %v412_v48 = vpack.c.bf16 %v411_v47, %v411_v47 }
 0x2b8   : > { %986 = vmatmul.mubr.msk.bf16.vlgmr.msra.gmra.mrb[0].mxu1 %vm400_vm3, %v412_v48 }
 0x2b9   : > { %990 = vmatpush3.bf16.msra.mxu1 %v342_v12  ;;  %993 = vmatprep.mubr.msk.bf16.mxu1 %vm1102_vm0, %v1101_v1 }
 0x2ba   : > { %991 = vmatprep.subr.bf16.mxu1 %v1101_v1 }
 0x2bd   : > { %992 = vmatpush3.bf16.msra.mxu1 %v343_v15 }
 0x2be   : > { %1003 = vmatprep.subr.bf16.mxu1 %v1101_v1 }
 0x2c0   : > { %994 = vmatmul.mubr.msk.bf16.vlgmr.msra.gmra.mrb[4].mxu1 %vm354_vm1, %v463_v49 }
 0x2c1   : > { %1004 = vmatpush3.bf16.msra.mxu1 %v344_v18  ;;  %1007 = vmatprep.mubr.msk.bf16.mxu1 %vm1102_vm0, %v1101_v1 }
 0x2c2   : > { %1005 = vmatprep.subr.bf16.mxu1 %v1101_v1 }
 0x2c5   : > { %1006 = vmatpush3.bf16.msra.mxu1 %v345_v21 }
 0x2c6   : > { %1017 = vmatprep.subr.bf16.mxu1 %v1101_v1 }
 0x2c8   : > { %1008 = vmatmul.mubr.msk.bf16.vlgmr.msra.gmra.mrb[8].mxu1 %vm354_vm1, %v577_v50 }
 0x2c9   : > { %1018 = vmatpush3.bf16.msra.mxu1 %v346_v24  ;;  %1021 = vmatprep.mubr.msk.bf16.mxu1 %vm1102_vm0, %v1101_v1 }
 0x2ca   : > { %1019 = vmatprep.subr.bf16.mxu1 %v1101_v1 }
 0x2cd   : > { %1020 = vmatpush3.bf16.msra.mxu1 %v347_v51 }
 0x2d0   : > { %1022 = vmatmul.mubr.msk.bf16.vlgmr.msra.gmra.mrb[12].mxu1 %vm354_vm1, %v690_v52 }
 0x38b   : > { %v454_v53 = vpop.f32.mrb[0].mxu1 }
 0x38c   : > { %460 = vst.msk [vmem:[%s1215_s13] sm:$0xff] %vm354_vm1, %v454_v53  ;;  %v987_v54 = vpop.f32.mrb[1].mxu1 }
 0x38d   : > { %v457_v55 = vpop.f32.mrb[2].mxu1 }
 0x38e   : > { %v988_v56 = vpop.f32.mrb[3].mxu1 }
 0x393   : > { %v501_v57 = vpop.f32.mrb[4].mxu1 }
 0x394   : > { %v507_v58 = vmul.f32 0.17677669, %v501_v57  ;;  %v995_v59 = vpop.f32.mrb[5].mxu1 }
 0x395   : > { %v504_v60 = vpop.f32.mrb[6].mxu1 }
 0x396   : > { %v996_v61 = vpop.f32.mrb[7].mxu1  ;;  %v508_v62 = vsel %vm353_vm2, %v507_v58, -1e+09 }
 0x397   : > { %v509_v63 = vsel %vm400_vm3, %v508_v62, -inf }
 0x398   : > { %510 = vmax.xlane.f32.xlu1 %v509_v63 }
 0x39b   : > { %v615_v0 = vpop.f32.mrb[8].mxu1 }
 0x39c   : > { %v621_v2 = vmul.f32 0.17677669, %v615_v0  ;;  %v1009_v3 = vpop.f32.mrb[9].mxu1 }
 0x39d   : > { %v618_v4 = vpop.f32.mrb[10].mxu1 }
 0x39e   : > { %v1010_v5 = vpop.f32.mrb[11].mxu1  ;;  %v622_v6 = vsel %vm353_vm2, %v621_v2, -1e+09 }
 0x39f   : > { %v623_v7 = vsel %vm400_vm3, %v622_v6, -inf }
 0x3a0   : > { %624 = vmax.xlane.f32.xlu1 %v623_v7 }
 0x3a3   : > { %v728_v8 = vpop.f32.mrb[12].mxu1 }
 0x3a4   : > { %v734_v9 = vmul.f32 0.17677669, %v728_v8  ;;  %v1023_v10 = vpop.f32.mrb[13].mxu1 }
 0x3a5   : > { %v731_v11 = vpop.f32.mrb[14].mxu1 }
 0x3a6   : > { %v1024_v12 = vpop.f32.mrb[15].mxu1  ;;  %v735_v13 = vsel %vm353_vm2, %v734_v9, -1e+09 }
 0x3a7   : > { %v736_v14 = vsel %vm400_vm3, %v735_v13, -inf }
 0x3a8   : > { %737 = vmax.xlane.f32.xlu1 %v736_v14 }
 0x3b9   : > { %522 = vrot.lane.b32.xlu1 %v1188_v43, %s1103_s7 }
 0x3bd   : > { %635 = vrot.lane.b32.xlu1 %v1188_v43, %s1104_s8 }
 0x425   : > { %v511_v15 = vpop.xlane.xlu1 %510 }
 0x426   : > { %v512_v16 = vsub.f32 %v508_v62, %v511_v15 }
 0x428   : > { %v513_v17 = vmul.f32 1.442695, %v512_v16 }
 0x42a   : > { %1065 = vpow2.f32 %v513_v17 }
 0x42d   : > { %v625_v18 = vpop.xlane.xlu1 %624 }
 0x42e   : > { %v626_v19 = vsub.f32 %v622_v6, %v625_v18 }
 0x430   : > { %v627_v20 = vmul.f32 1.442695, %v626_v19 }
 0x432   : > { %1067 = vpow2.f32 %v627_v20 }
 0x434   : > { %v1066_v21 = vpop.eup %1065 }
 0x435   : > { %v738_v22 = vpop.xlane.xlu1 %737  ;;  %v515_v23 = vsel %vm400_vm3, %v1066_v21, 0.0 }
 0x436   : > { %v739_v24 = vsub.f32 %v735_v13, %v738_v22  ;;  %516 = vadd.xlane.f32.xlu1 %v515_v23 }
 0x438   : > { %v740_v25 = vmul.f32 1.442695, %v739_v24 }
 0x439   : > { %v523_v26 = vpop.permute.xlu1 %522 }
 0x43a   : > { %1069 = vpow2.f32 %v740_v25  ;;  %v528_v27 = vsel %vm416_vm4, %v523_v26, 0 }
 0x43b   : > { %998 = vmatpush3.bf16.msra.mxu0 %v528_v27 }
 0x43c   : > { %v1068_v28 = vpop.eup %1067  ;;  %1011 = vmatprep.subr.bf16.mxu0 %v1101_v1 }
 0x43d   : > { %v629_v29 = vsel %vm400_vm3, %v1068_v28, 0.0  ;;  %v636_v32 = vpop.permute.xlu1 %635 }
 0x43e   : > { %630 = vadd.xlane.f32.xlu1 %v629_v29  ;;  %v641_v38 = vsel %vm416_vm4, %v636_v32, 0 }
 0x444   : > { %v1070_v30 = vpop.eup %1069 }
 0x445   : > { %v742_v31 = vsel %vm400_vm3, %v1070_v30, 0.0 }
 0x446   : > { %743 = vadd.xlane.f32.xlu1 %v742_v31 }
 0x457   : > { %748 = vrot.lane.b32.xlu1 %v1188_v43, %s1105_s9 }
 0x4c3   : > { %v517_v33 = vpop.xlane.xlu1 %516 }
 0x4c4   : > { %1071 = vrcp.f32 %v517_v33 }
 0x4cb   : > { %v631_v34 = vpop.xlane.xlu1 %630 }
 0x4cc   : > { %1073 = vrcp.f32 %v631_v34 }
 0x4ce   : > { %v1072_v35 = vpop.eup %1071 }
 0x4cf   : > { %v519_v36 = vmul.f32 %v1072_v35, %v1066_v21 }
 0x4d1   : > { %v520_v37 = vpack.c.bf16 %v519_v36, %v519_v36 }
 0x4d3   : > { %1000 = vmatmul.mubr.msk.bf16.vlgmr.msra.gmra.mrb[4].mxu0 %vm400_vm3, %v520_v37  ;;  %v744_v39 = vpop.xlane.xlu1 %743 }
 0x4d4   : > { %1012 = vmatpush3.bf16.msra.mxu0 %v641_v38  ;;  %1075 = vrcp.f32 %v744_v39  ;;  %1013 = vmatprep.mubr.msk.bf16.mxu0 %vm1102_vm0, %v1101_v1 }
 0x4d5   : > { %1025 = vmatprep.subr.bf16.mxu0 %v1101_v1 }
 0x4d6   : > { %v1074_v40 = vpop.eup %1073 }
 0x4d7   : > { %v633_v41 = vmul.f32 %v1074_v40, %v1068_v28  ;;  %v749_v42 = vpop.permute.xlu1 %748 }
 0x4d8   : > { %v754_v43 = vsel %vm416_vm4, %v749_v42, 0 }
 0x4d9   : > { %v634_v44 = vpack.c.bf16 %v633_v41, %v633_v41 }
 0x4db   : > { %1014 = vmatmul.mubr.msk.bf16.vlgmr.msra.gmra.mrb[8].mxu0 %vm400_vm3, %v634_v44 }
 0x4dc   : > { %1026 = vmatpush3.bf16.msra.mxu0 %v754_v43  ;;  %1027 = vmatprep.mubr.msk.bf16.mxu0 %vm1102_vm0, %v1101_v1 }
 0x4de   : > { %v1076_v45 = vpop.eup %1075 }
 0x4df   : > { %v746_v46 = vmul.f32 %v1076_v45, %v1070_v30 }
 0x4e1   : > { %v747_v47 = vpack.c.bf16 %v746_v46, %v746_v46 }
 0x4e3   : > { %1028 = vmatmul.mubr.msk.bf16.vlgmr.msra.gmra.mrb[12].mxu0 %vm400_vm3, %v747_v47 }
 0x5a6   : > { %v564_v48 = vpop.f32.mrb[4].mxu0 }
 0x5a7   : > { %571 = vrot.lane.b32.xlu0 %v564_v48, %s1105_s9  ;;  %v1001_v49 = vpop.f32.mrb[5].mxu0 }
 0x5a8   : > { %v567_v50 = vpop.f32.mrb[6].mxu0 }
 0x5a9   : > { %v1002_v51 = vpop.f32.mrb[7].mxu0 }
 0x5ae   : > { %v677_v52 = vpop.f32.mrb[8].mxu0 }
 0x5af   : > { %684 = vrot.lane.b32.xlu1 %v677_v52, %s1104_s8  ;;  %v1015_v53 = vpop.f32.mrb[9].mxu0 }
 0x5b0   : > { %v680_v54 = vpop.f32.mrb[10].mxu0 }
 0x5b1   : > { %v1016_v1 = vpop.f32.mrb[11].mxu0 }
 0x5b6   : > { %v790_v55 = vpop.f32.mrb[12].mxu0 }
 0x5b7   : > { %797 = vrot.lane.b32.xlu1 %v790_v55, %s1103_s7  ;;  %v1029_v56 = vpop.f32.mrb[13].mxu0 }
 0x5b8   : > { %v793_v57 = vpop.f32.mrb[14].mxu0 }
 0x5b9   : > { %v1030_v58 = vpop.f32.mrb[15].mxu0 }
 0x619   : > { %v572_v59 = vpop.permute.xlu0 %571 }
 0x61a   : > { %575 = vst.msk [vmem:[%s1215_s13] sm:$0xff] %vm574_vm5, %v572_v59 }
 0x621   : > { %v685_v60 = vpop.permute.xlu1 %684 }
 0x622   : > { %688 = vst.msk [vmem:[%s1215_s13] sm:$0xff] %vm687_vm6, %v685_v60 }
 0x629   : > { %v798_v61 = vpop.permute.xlu1 %797 }
 0x62a   : > { %801 = vst.msk [vmem:[%s1215_s13] sm:$0xff] %vm800_vm7, %v798_v61 }
 0x62b PF: > { %s14_s17 = sadd.s32 1, %s1099_s17   ;;  %s1269_s15 = smov %s1095_s16 }
 0x62c   : > { %p11_p5 = scmp.ge.s32.totalorder %s14_s17, 4   ;;  %s1270_s16 = smov %s1272_s18 }
 0x62e   :  { %13 = sbr.rel (!%p11_p5) target bundleno = 2 (0x2), region = 75 }

// kernel: transformer_forward.42
= control target key start
LH: loop header
LB: loop body
LE: loop exit
PB: predicated region body
PF: predicated region fallthrough
CT: control target
= control target key end

     0   :  { %v147_v0 = vmov 0.0   ;;  %vm148_vm0 = vmmov 0   ;;  %s232_s1 = inlined_call_operand.vmem [shape: f32[128,128], index: 1, kind: input, shape index: {}]   ;;  %s233_s0 = inlined_call_operand.vmem [shape: f32[16,128], index: 0, kind: input, shape index: {}]   ;;  %s234_s2 = inlined_call_operand.vmem [shape: f32[1,128], index: 2, kind: input, shape index: {}]   ;;  %s235_s3 = inlined_call_operand.vmem [shape: f32[16,128], index: 3, kind: output, shape index: {}]  }
   0x1   :  { %125 = vmatprep.subr.bf16.mxu0 %v147_v0  ;;  %v26_v1 = vld [vmem:[%s232_s1] sm:$0xff]  ;;  %v27_v2 = vld [vmem:[%s232_s1 + $0x8] sm:$0xff]  ;;  %v28_v3 = vld [vmem:[%s232_s1 + $0x10] sm:$0xff]  ;;  %141 = vmatprep.mubr.msk.bf16.mxu0 %vm148_vm0, %v147_v0 }
   0x2   :  { %v42_v4 = vpack.c.bf16 %v27_v2, %v26_v1  ;;  %v29_v5 = vld [vmem:[%s232_s1 + $0x18] sm:$0xff]  ;;  %v30_v7 = vld [vmem:[%s232_s1 + $0x20] sm:$0xff]  ;;  %v31_v8 = vld [vmem:[%s232_s1 + $0x28] sm:$0xff] }
   0x3   :  { %v43_v6 = vpack.c.bf16 %v29_v5, %v28_v3  ;;  %v44_v9 = vpack.c.bf16 %v31_v8, %v30_v7  ;;  %v32_v10 = vld [vmem:[%s232_s1 + $0x30] sm:$0xff]  ;;  %v33_v11 = vld [vmem:[%s232_s1 + $0x38] sm:$0xff]  ;;  %v34_v13 = vld [vmem:[%s232_s1 + $0x40] sm:$0xff] }
   0x4   :  { %126 = vmatpush3.bf16.msra.mxu0 %v42_v4  ;;  %v45_v12 = vpack.c.bf16 %v33_v11, %v32_v10  ;;  %v35_v14 = vld [vmem:[%s232_s1 + $0x48] sm:$0xff]  ;;  %v36_v16 = vld [vmem:[%s232_s1 + $0x50] sm:$0xff]  ;;  %v37_v17 = vld [vmem:[%s232_s1 + $0x58] sm:$0xff] }
   0x5   :  { %127 = vmatprep.subr.bf16.mxu0 %v147_v0  ;;  %v46_v15 = vpack.c.bf16 %v35_v14, %v34_v13  ;;  %v47_v18 = vpack.c.bf16 %v37_v17, %v36_v16  ;;  %v38_v19 = vld [vmem:[%s232_s1 + $0x60] sm:$0xff]  ;;  %v39_v20 = vld [vmem:[%s232_s1 + $0x68] sm:$0xff]  ;;  %v40_v22 = vld [vmem:[%s232_s1 + $0x70] sm:$0xff] }
   0x6   :  { %v48_v21 = vpack.c.bf16 %v39_v20, %v38_v19  ;;  %v41_v23 = vld [vmem:[%s232_s1 + $0x78] sm:$0xff]  ;;  %v23_v25 = vld [vmem:[%s233_s0] sm:$0xff]  ;;  %v24_v26 = vld [vmem:[%s233_s0 + $0x8] sm:$0xff] }
   0x7   :  { %v49_v24 = vpack.c.bf16 %v41_v23, %v40_v22  ;;  %v25_v27 = vpack.c.bf16 %v24_v26, %v23_v25  ;;  %v115_v28 = vld [vmem:[%s234_s2] ss:$0 sm:$0xff] }
   0x8   :  { %128 = vmatpush3.bf16.msra.mxu0 %v43_v6 }
   0x9   :  { %129 = vmatprep.subr.bf16.mxu0 %v147_v0 }
   0xc   :  { %130 = vmatpush3.bf16.msra.mxu0 %v44_v9 }
   0xd   :  { %131 = vmatprep.subr.bf16.mxu0 %v147_v0 }
  0x10   :  { %132 = vmatpush3.bf16.msra.mxu0 %v45_v12 }
  0x11   :  { %133 = vmatprep.subr.bf16.mxu0 %v147_v0 }
  0x14   :  { %134 = vmatpush3.bf16.msra.mxu0 %v46_v15 }
  0x15   :  { %135 = vmatprep.subr.bf16.mxu0 %v147_v0 }
  0x18   :  { %136 = vmatpush3.bf16.msra.mxu0 %v47_v18 }
  0x19   :  { %137 = vmatprep.subr.bf16.mxu0 %v147_v0 }
  0x1c   :  { %138 = vmatpush3.bf16.msra.mxu0 %v48_v21 }
  0x1d   :  { %139 = vmatprep.subr.bf16.mxu0 %v147_v0 }
  0x20   :  { %140 = vmatpush3.bf16.msra.mxu0 %v49_v24 }
  0x23   :  { %142 = vmatmul.mubr.bf16.vlgmr.msra.gmra.mrb[0].mxu0 %v25_v27 }
  0xf6   :  { %v84_v29 = vpop.f32.mrb[0].mxu0 }
  0xf7   :  { %v107_v30 = vadd.f32 %v115_v28, %v84_v29  ;;  %v143_v31 = vpop.f32.mrb[1].mxu0 }
  0xf8   :  { %v87_v32 = vpop.f32.mrb[2].mxu0 }
  0xf9   :  { %109 = vst [vmem:[%s235_s3] sm:$0xff] %v107_v30  ;;  %v108_v33 = vadd.f32 %v115_v28, %v87_v32  ;;  %v144_v34 = vpop.f32.mrb[3].mxu0 }
  0xfb   :  { %110 = vst [vmem:[%s235_s3 + $0x8] sm:$0xff] %v108_v33 }

// kernel: transformer_forward.52
= control target key start
LH: loop header
LB: loop body
LE: loop exit
PB: predicated region body
PF: predicated region fallthrough
CT: control target
= control target key end

     0   :  { %v161_v3 = vmov 0   ;;  %v138_v52 = vlaneseq  ;;  %s299_s1 = inlined_call_operand.vmem [shape: f32[128,256], index: 1, kind: input, shape index: {}]   ;;  %s300_s0 = inlined_call_operand.vmem [shape: f32[16,128], index: 0, kind: input, shape index: {}]   ;;  %s301_s2 = inlined_call_operand.vmem [shape: f32[1,256], index: 2, kind: input, shape index: {}]   ;;  %s302_s3 = inlined_call_operand.vmem [shape: f32[16,256], index: 3, kind: output, shape index: {}]  }
   0x1   :  { %v31_v0 = vld [vmem:[%s299_s1 + $0x8] sm:$0xff]  ;;  %v33_v1 = vld [vmem:[%s299_s1 + $0x18] sm:$0xff]  ;;  %v30_v2 = vld [vmem:[%s299_s1] sm:$0xff]  ;;  %110 = vmatprep.mubr.bf16.mxu0 %v161_v3 }
   0x2   :  { %v63_v4 = vpack.c.bf16 %v33_v1, %v31_v0  ;;  %v32_v5 = vld [vmem:[%s299_s1 + $0x10] sm:$0xff]  ;;  %v35_v6 = vld [vmem:[%s299_s1 + $0x28] sm:$0xff]  ;;  %v37_v7 = vld [vmem:[%s299_s1 + $0x38] sm:$0xff]  ;;  %v139_v53 = vshrl.u32 %v138_v52, 7 }
   0x3   :  { %v62_v8 = vpack.c.bf16 %v32_v5, %v30_v2  ;;  %v65_v9 = vpack.c.bf16 %v37_v7, %v35_v6  ;;  %v34_v10 = vld [vmem:[%s299_s1 + $0x20] sm:$0xff]  ;;  %v36_v11 = vld [vmem:[%s299_s1 + $0x30] sm:$0xff]  ;;  %v39_v12 = vld [vmem:[%s299_s1 + $0x48] sm:$0xff] }
   0x4   :  { %78 = vmatprep.subr.bf16.mxu0 %v63_v4  ;;  %v41_v13 = vld [vmem:[%s299_s1 + $0x58] sm:$0xff]  ;;  %v64_v14 = vpack.c.bf16 %v36_v11, %v34_v10  ;;  %v38_v16 = vld [vmem:[%s299_s1 + $0x40] sm:$0xff]  ;;  %v40_v17 = vld [vmem:[%s299_s1 + $0x50] sm:$0xff]  ;;  %v140_v54 = vsub.s32 0, %v139_v53  ;;  %v144_v56 = vsub.s32 1, %v139_v53 }
   0x5   :  { %79 = vmatpush1.bf16.msra.mxu0 %v62_v8  ;;  %v67_v15 = vpack.c.bf16 %v41_v13, %v39_v12  ;;  %v43_v18 = vld [vmem:[%s299_s1 + $0x68] sm:$0xff]  ;;  %v45_v19 = vld [vmem:[%s299_s1 + $0x78] sm:$0xff]  ;;  %v66_v20 = vpack.c.bf16 %v40_v17, %v38_v16  ;;  %v42_v22 = vld [vmem:[%s299_s1 + $0x60] sm:$0xff] }
   0x6   :  { %80 = vmatprep.subr.bf16.mxu0 %v65_v9  ;;  %v69_v21 = vpack.c.bf16 %v45_v19, %v43_v18  ;;  %v44_v23 = vld [vmem:[%s299_s1 + $0x70] sm:$0xff]  ;;  %v47_v24 = vld [vmem:[%s299_s1 + $0x88] sm:$0xff]  ;;  %v49_v25 = vld [vmem:[%s299_s1 + $0x98] sm:$0xff] }
   0x7   :  { %v68_v26 = vpack.c.bf16 %v44_v23, %v42_v22  ;;  %v71_v27 = vpack.c.bf16 %v49_v25, %v47_v24  ;;  %v46_v28 = vld [vmem:[%s299_s1 + $0x80] sm:$0xff]  ;;  %v48_v29 = vld [vmem:[%s299_s1 + $0x90] sm:$0xff]  ;;  %v51_v30 = vld [vmem:[%s299_s1 + $0xa8] sm:$0xff] }
   0x8   :  { %v53_v31 = vld [vmem:[%s299_s1 + $0xb8] sm:$0xff]  ;;  %v70_v32 = vpack.c.bf16 %v48_v29, %v46_v28  ;;  %v50_v34 = vld [vmem:[%s299_s1 + $0xa0] sm:$0xff]  ;;  %v52_v35 = vld [vmem:[%s299_s1 + $0xb0] sm:$0xff] }
   0x9   :  { %81 = vmatpush1.bf16.msra.mxu0 %v64_v14  ;;  %v73_v33 = vpack.c.bf16 %v53_v31, %v51_v30  ;;  %v55_v36 = vld [vmem:[%s299_s1 + $0xc8] sm:$0xff]  ;;  %v57_v37 = vld [vmem:[%s299_s1 + $0xd8] sm:$0xff]  ;;  %v72_v38 = vpack.c.bf16 %v52_v35, %v50_v34  ;;  %v54_v40 = vld [vmem:[%s299_s1 + $0xc0] sm:$0xff] }
   0xa   :  { %82 = vmatprep.subr.bf16.mxu0 %v67_v15  ;;  %v75_v39 = vpack.c.bf16 %v57_v37, %v55_v36  ;;  %v56_v41 = vld [vmem:[%s299_s1 + $0xd0] sm:$0xff]  ;;  %v59_v42 = vld [vmem:[%s299_s1 + $0xe8] sm:$0xff]  ;;  %v61_v43 = vld [vmem:[%s299_s1 + $0xf8] sm:$0xff] }
   0xb   :  { %v74_v44 = vpack.c.bf16 %v56_v41, %v54_v40  ;;  %v77_v45 = vpack.c.bf16 %v61_v43, %v59_v42  ;;  %v58_v46 = vld [vmem:[%s299_s1 + $0xe0] sm:$0xff]  ;;  %v60_v47 = vld [vmem:[%s299_s1 + $0xf0] sm:$0xff]  ;;  %v28_v50 = vld [vmem:[%s300_s0 + $0x8] sm:$0xff] }
   0xc   :  { %v76_v48 = vpack.c.bf16 %v60_v47, %v58_v46  ;;  %v27_v49 = vld [vmem:[%s300_s0] sm:$0xff] }
   0xd   :  { %83 = vmatpush1.bf16.msra.mxu0 %v66_v20  ;;  %v29_v51 = vpack.c.bf16 %v28_v50, %v27_v49  ;;  %v136_v55 = vld [vmem:[%s301_s2] sm:$0x3] }
   0xe   :  { %84 = vmatprep.subr.bf16.mxu0 %v69_v21  ;;  %v141_v57 = vrot.slane %v136_v55, %v140_v54  ;;  %v145_v58 = vrot.slane %v136_v55, %v144_v56 }
  0x11   :  { %85 = vmatpush1.bf16.msra.mxu0 %v68_v26 }
  0x12   :  { %86 = vmatprep.subr.bf16.mxu0 %v71_v27 }
  0x15   :  { %87 = vmatpush1.bf16.msra.mxu0 %v70_v32 }
  0x16   :  { %88 = vmatprep.subr.bf16.mxu0 %v73_v33 }
  0x19   :  { %89 = vmatpush1.bf16.msra.mxu0 %v72_v38 }
  0x1a   :  { %90 = vmatprep.subr.bf16.mxu0 %v75_v39 }
  0x1d   :  { %91 = vmatpush1.bf16.msra.mxu0 %v74_v44 }
  0x1e   :  { %92 = vmatprep.subr.bf16.mxu0 %v77_v45 }
  0x21   :  { %93 = vmatpush1.bf16.msra.mxu0 %v76_v48 }
  0x24   :  { %111 = vmatmul.mubr.bf16.vlgmr.msra.gmra.mrb[0].mxu0 %v29_v51 }
  0xf7   :  { %v112_v59 = vpop.f32.mrb[0].mxu0 }
  0xf8   :  { %v148_v60 = vadd.f32 %v141_v57, %v112_v59  ;;  %v114_v61 = vpop.f32.mrb[1].mxu0 }
  0xf9   :  { %v149_v62 = vadd.f32 %v145_v58, %v114_v61  ;;  %v116_v63 = vpop.f32.mrb[2].mxu0 }
  0xfa   :  { %152 = vst [vmem:[%s302_s3] sm:$0xff] %v148_v60  ;;  %v150_v0 = vadd.f32 %v141_v57, %v116_v63  ;;  %v118_v1 = vpop.f32.mrb[3].mxu0 }
  0xfb   :  { %153 = vst [vmem:[%s302_s3 + $0x8] sm:$0xff] %v149_v62  ;;  %v151_v2 = vadd.f32 %v145_v58, %v118_v1 }
  0xfc   :  { %154 = vst [vmem:[%s302_s3 + $0x10] sm:$0xff] %v150_v0 }
  0xfd   :  { %155 = vst [vmem:[%s302_s3 + $0x18] sm:$0xff] %v151_v2 }

// kernel: transformer_forward.33
= control target key start
LH: loop header
LB: loop body
LE: loop exit
PB: predicated region body
PF: predicated region fallthrough
CT: control target
= control target key end

     0   :  { %s389_s1 = inlined_call_operand.vmem [shape: f32[256,128], index: 1, kind: input, shape index: {}]   ;;  %s390_s0 = inlined_call_operand.vmem [shape: f32[16,256], index: 0, kind: input, shape index: {}]   ;;  %s391_s2 = inlined_call_operand.vmem [shape: f32[1,128], index: 2, kind: input, shape index: {}]   ;;  %s392_s3 = inlined_call_operand.vmem [shape: f32[16,128], index: 3, kind: input, shape index: {}]   ;;  %s393_s4 = inlined_call_operand.vmem [shape: f32[1,128], index: 4, kind: input, shape index: {}]   ;;  %s394_s5 = inlined_call_operand.vmem [shape: f32[1,128], index: 5, kind: input, shape index: {}]   ;;  %s395_s6 = inlined_call_operand.vmem [shape: f32[16,128], index: 6, kind: output, shape index: {}]  }
   0x1   :  { %v54_v0 = vld [vmem:[%s389_s1 + $0x80] sm:$0xff]  ;;  %v55_v1 = vld [vmem:[%s389_s1 + $0x88] sm:$0xff]  ;;  %v56_v5 = vld [vmem:[%s389_s1 + $0x90] sm:$0xff] }
   0x2   :  { %v38_v2 = vld [vmem:[%s389_s1] sm:$0xff]  ;;  %v78_v3 = vpack.c.bf16 %v55_v1, %v54_v0  ;;  %v39_v4 = vld [vmem:[%s389_s1 + $0x8] sm:$0xff]  ;;  %v57_v6 = vld [vmem:[%s389_s1 + $0x98] sm:$0xff] }
   0x3   :  { %v70_v7 = vpack.c.bf16 %v39_v4, %v38_v2  ;;  %v79_v8 = vpack.c.bf16 %v57_v6, %v56_v5  ;;  %v40_v9 = vld [vmem:[%s389_s1 + $0x10] sm:$0xff]  ;;  %v41_v10 = vld [vmem:[%s389_s1 + $0x18] sm:$0xff]  ;;  %v58_v11 = vld [vmem:[%s389_s1 + $0xa0] sm:$0xff] }
   0x4   :  { %199 = vmatprep.subr.bf16.mxu0 %v78_v3  ;;  %v59_v12 = vld [vmem:[%s389_s1 + $0xa8] sm:$0xff]  ;;  %v71_v13 = vpack.c.bf16 %v41_v10, %v40_v9  ;;  %v42_v15 = vld [vmem:[%s389_s1 + $0x20] sm:$0xff]  ;;  %v60_v17 = vld [vmem:[%s389_s1 + $0xb0] sm:$0xff] }
   0x5   :  { %200 = vmatpush3.bf16.msra.mxu0 %v70_v7  ;;  %v80_v14 = vpack.c.bf16 %v59_v12, %v58_v11  ;;  %v43_v16 = vld [vmem:[%s389_s1 + $0x28] sm:$0xff]  ;;  %v61_v18 = vld [vmem:[%s389_s1 + $0xb8] sm:$0xff]  ;;  %v44_v21 = vld [vmem:[%s389_s1 + $0x30] sm:$0xff] }
   0x6   :  { %201 = vmatprep.subr.bf16.mxu0 %v79_v8  ;;  %v72_v19 = vpack.c.bf16 %v43_v16, %v42_v15  ;;  %v81_v20 = vpack.c.bf16 %v61_v18, %v60_v17  ;;  %v45_v22 = vld [vmem:[%s389_s1 + $0x38] sm:$0xff]  ;;  %v62_v23 = vld [vmem:[%s389_s1 + $0xc0] sm:$0xff]  ;;  %v63_v24 = vld [vmem:[%s389_s1 + $0xc8] sm:$0xff] }
   0x7   :  { %v33_v25 = vld [vmem:[%s390_s0 + $0x8] sm:$0xff]  ;;  %v35_v26 = vld [vmem:[%s390_s0 + $0x18] sm:$0xff]  ;;  %v73_v27 = vpack.c.bf16 %v45_v22, %v44_v21  ;;  %v82_v29 = vpack.c.bf16 %v63_v24, %v62_v23  ;;  %v46_v30 = vld [vmem:[%s389_s1 + $0x40] sm:$0xff] }
   0x8   :  { %v37_v28 = vpack.c.bf16 %v35_v26, %v33_v25  ;;  %v47_v31 = vld [vmem:[%s389_s1 + $0x48] sm:$0xff]  ;;  %v64_v32 = vld [vmem:[%s389_s1 + $0xd0] sm:$0xff]  ;;  %v65_v33 = vld [vmem:[%s389_s1 + $0xd8] sm:$0xff] }
   0x9   :  { %202 = vmatpush3.bf16.msra.mxu0 %v71_v13  ;;  %v74_v34 = vpack.c.bf16 %v47_v31, %v46_v30  ;;  %v83_v35 = vpack.c.bf16 %v65_v33, %v64_v32  ;;  %v48_v36 = vld [vmem:[%s389_s1 + $0x50] sm:$0xff]  ;;  %v49_v37 = vld [vmem:[%s389_s1 + $0x58] sm:$0xff]  ;;  %v66_v38 = vld [vmem:[%s389_s1 + $0xe0] sm:$0xff] }
   0xa   :  { %203 = vmatprep.subr.bf16.mxu0 %v80_v14  ;;  %118 = vmatprep.mubr.bf16.mxu0 %v37_v28  ;;  %v67_v39 = vld [vmem:[%s389_s1 + $0xe8] sm:$0xff]  ;;  %v75_v40 = vpack.c.bf16 %v49_v37, %v48_v36  ;;  %v50_v42 = vld [vmem:[%s389_s1 + $0x60] sm:$0xff]  ;;  %v68_v44 = vld [vmem:[%s389_s1 + $0xf0] sm:$0xff] }
   0xb   :  { %v84_v41 = vpack.c.bf16 %v67_v39, %v66_v38  ;;  %v51_v43 = vld [vmem:[%s389_s1 + $0x68] sm:$0xff]  ;;  %v69_v45 = vld [vmem:[%s389_s1 + $0xf8] sm:$0xff]  ;;  %v52_v48 = vld [vmem:[%s389_s1 + $0x70] sm:$0xff] }
   0xc   :  { %v76_v46 = vpack.c.bf16 %v51_v43, %v50_v42  ;;  %v85_v47 = vpack.c.bf16 %v69_v45, %v68_v44  ;;  %v53_v49 = vld [vmem:[%s389_s1 + $0x78] sm:$0xff]  ;;  %v32_v51 = vld [vmem:[%s390_s0] sm:$0xff]  ;;  %v34_v52 = vld [vmem:[%s390_s0 + $0x10] sm:$0xff] }
   0xd   :  { %204 = vmatpush3.bf16.msra.mxu0 %v72_v19  ;;  %v77_v50 = vpack.c.bf16 %v53_v49, %v52_v48  ;;  %v36_v53 = vpack.c.bf16 %v34_v52, %v32_v51  ;;  %v196_v56 = vld [vmem:[%s391_s2] ss:$0 sm:$0xff]  ;;  %v146_v1 = vld [vmem:[%s392_s3 + $0x8] sm:$0xff] }
   0xe   :  { %205 = vmatprep.subr.bf16.mxu0 %v81_v20  ;;  %v145_v60 = vld [vmem:[%s392_s3] sm:$0xff] }
   0xf   :  { %v197_v18 = vld [vmem:[%s393_s4] ss:$0 sm:$0xff] }
  0x10   :  { %v198_v20 = vld [vmem:[%s394_s5] ss:$0 sm:$0xff] }
  0x11   :  { %206 = vmatpush3.bf16.msra.mxu0 %v73_v27 }
  0x12   :  { %207 = vmatprep.subr.bf16.mxu0 %v82_v29 }
  0x15   :  { %208 = vmatpush3.bf16.msra.mxu0 %v74_v34 }
  0x16   :  { %209 = vmatprep.subr.bf16.mxu0 %v83_v35 }
  0x19   :  { %210 = vmatpush3.bf16.msra.mxu0 %v75_v40 }
  0x1a   :  { %211 = vmatprep.subr.bf16.mxu0 %v84_v41 }
  0x1d   :  { %212 = vmatpush3.bf16.msra.mxu0 %v76_v46 }
  0x1e   :  { %213 = vmatprep.subr.bf16.mxu0 %v85_v47 }
  0x21   :  { %214 = vmatpush3.bf16.msra.mxu0 %v77_v50 }
  0x24   :  { %119 = vmatmul.mubr.bf16.vlgmr.msra.gmra.mrb[0].mxu0 %v36_v53 }
  0xf7   :  { %v215_v54 = vpop.f32.mrb[0].mxu0 }
  0xf8   :  { %v216_v55 = vpop.f32.mrb[1].mxu0 }
  0xf9   :  { %v217_v57 = vadd.f32 %v216_v55, %v215_v54  ;;  %v218_v58 = vpop.f32.mrb[2].mxu0 }
  0xfa   :  { %v219_v59 = vpop.f32.mrb[3].mxu0 }
  0xfb   :  { %v143_v61 = vadd.f32 %v217_v57, %v196_v56  ;;  %v220_v62 = vadd.f32 %v219_v59, %v218_v58 }
  0xfd   :  { %v144_v63 = vadd.f32 %v220_v62, %v196_v56  ;;  %v147_v0 = vadd.f32 %v145_v60, %v143_v61 }
  0xff   :  { %149 = vadd.xlane.f32.xlu0 %v147_v0  ;;  %v148_v2 = vadd.f32 %v146_v1, %v144_v63 }
 0x103   :  { %151 = vadd.xlane.f32.xlu0 %v148_v2 }
 0x18c   :  { %v150_v3 = vpop.xlane.xlu0 %149 }
 0x18d   :  { %v154_v4 = vmul.f32 0.0078125, %v150_v3 }
 0x18f   :  { %v156_v5 = vsub.f32 %v147_v0, %v154_v4 }
 0x190   :  { %v152_v6 = vpop.xlane.xlu0 %151 }
 0x191   :  { %v155_v7 = vmul.f32 0.0078125, %v152_v6  ;;  %v158_v8 = vmul.f32 %v156_v5, %v156_v5 }
 0x193   :  { %v157_v9 = vsub.f32 %v148_v2, %v155_v7  ;;  %160 = vadd.xlane.f32.xlu1 %v158_v8 }
 0x195   :  { %v159_v10 = vmul.f32 %v157_v9, %v157_v9 }
 0x197   :  { %162 = vadd.xlane.f32.xlu1 %v159_v10 }
 0x220   :  { %v161_v11 = vpop.xlane.xlu1 %160 }
 0x221   :  { %v164_v12 = vmul.f32 0.0078125, %v161_v11 }
 0x223   :  { %v166_v13 = vadd.f32 1e-05, %v164_v12 }
 0x224   :  { %v163_v14 = vpop.xlane.xlu1 %162 }
 0x225   :  { %221 = vrsqrt.f32 %v166_v13  ;;  %v165_v15 = vmul.f32 0.0078125, %v163_v14 }
 0x227   :  { %v167_v16 = vadd.f32 1e-05, %v165_v15 }
 0x229   :  { %223 = vrsqrt.f32 %v167_v16 }
 0x22f   :  { %v222_v17 = vpop.eup %221 }
 0x230   :  { %v170_v19 = vmul.f32 %v222_v17, %v156_v5 }
 0x232   :  { %v179_v21 = vmul.f32 %v197_v18, %v170_v19 }
 0x233   :  { %v224_v22 = vpop.eup %223 }
 0x234   :  { %v188_v23 = vadd.f32 %v198_v20, %v179_v21  ;;  %v171_v24 = vmul.f32 %v224_v22, %v157_v9 }
 0x236   :  { %190 = vst [vmem:[%s395_s6] sm:$0xff] %v188_v23  ;;  %v180_v25 = vmul.f32 %v197_v18, %v171_v24 }
 0x238   :  { %v189_v26 = vadd.f32 %v198_v20, %v180_v25 }
 0x23a   :  { %191 = vst [vmem:[%s395_s6 + $0x8] sm:$0xff] %v189_v26 }

// kernel: transformer_forward.44
= control target key start
LH: loop header
LB: loop body
LE: loop exit
PB: predicated region body
PF: predicated region fallthrough
CT: control target
= control target key end

     0   :  { %s1112_s15 = smov 0   ;;  %s1114_s16 = smov 0   ;;  %s1248_s0 = inlined_call_operand.vmem [shape: f32[2,8,128], index: 0, kind: input, shape index: {}]   ;;  %s1249_s1 = inlined_call_operand.vmem [shape: f32[2,8,256], index: 1, kind: input, shape index: {}, may-alias: {1,2}]   ;;  %s1250_s2 = inlined_call_operand.vmem [shape: f32[2,8,256], index: 2, kind: input, shape index: {}, may-alias: {1,2}]   ;;  %s1251_s3 = inlined_call_operand.vmem [shape: s8[2,8,8], index: 3, kind: input, shape index: {}]   ;;  %s1252_s4 = inlined_call_operand.vmem [shape: f32[2,8,128], index: 4, kind: output, shape index: {}]  }
   0x1   :  { %s1116_s17 = smov 0  }
   0x2 LB: > { %s26_s18 = sadd.s32 1, %s1076_s16  ;;  %p916_p0 = scmp.ge.s32.totalorder %s1080_s17, 1  ;;  %s1080_s17 = sphi %s1116_s17, %s14_s17   ;;  %s1076_s16 = sphi %s1114_s16, %s1254_s16   ;;  %s1072_s15 = sphi %s1112_s15, %s1253_s15  }
   0x3   : > { %p28_p1 = scmp.ge.s32.totalorder %s26_s18, 2  ;;  %p215_p2 = scmp.lt.s32.totalorder %s1080_s17, 3 }
   0x5   : > { %s1256_s18 = smov (%p28_p1, %s26_s18), 0  ;;  %p216_p3 = pnand %p916_p0, %p215_p2 }
   0x6   : > { %p263_p4 = scmp.lt.s32.totalorder (!%p216_p3), %s1072_s15, 1  ;;  %v1082_v1 = vmov (!%p216_p3), 0.0   ;;  %vm1083_vm0 = vmmov (!%p216_p3), 0   ;;  %vm345_vm1 = vcmask (!%p216_p3), 261120   ;;  %vm391_vm3 = vcmask (!%p216_p3), 64512   ;;  %s1084_s8 = smov (!%p216_p3), 96  }
   0x7   : > { %219 = sbr.rel (%p216_p3) target bundleno = 1578 (0x62a), region = 36  ;;  %957 = vmatprep.subr.bf16.mxu0 (!%p216_p3), %v1082_v1  ;;  %965 = vmatprep.subr.bf16.mxu1 (!%p216_p3), %v1082_v1  ;;  %vm407_vm4 = vcmask (!%p216_p3), 1043456   ;;  %s1085_s9 = smov (!%p216_p3), 64   ;;  %vm565_vm5 = vcmask (!%p216_p3), 523520   ;;  %vm678_vm6 = vcmask (!%p216_p3), 785920   ;;  %vm791_vm7 = vcmask (!%p216_p3), 1048320  }
   0x8   : > { %961 = vmatprep.mubr.msk.bf16.mxu0 (!%p216_p3), %vm1083_vm0, %v1082_v1  ;;  %967 = vmatprep.mubr.msk.bf16.mxu1 (!%p216_p3), %vm1083_vm0, %v1082_v1  ;;  %s1086_s10 = smov (!%p216_p3), 32  }
   0xe   : > { %s1258_s15 = smov (!%p263_p4, %s1072_s15), 1 }
   0xf   : > { %s935_s19 = sshll.u32 %s1258_s15, 4  ;;  %s917_s23 = sshll.u32 %s1258_s15, 3 }
  0x10   : > { %s274_s22 = scalar_lea.vmem %s1249_s1, %s935_s19  ;;  %s269_s26 = scalar_lea.vmem %s1248_s0, %s917_s23 }
  0x11   : > { %v298_v0 = vld [vmem:[%s274_s22] sm:$0xff]  ;;  %s922_s27 = sshll.u32 %s1258_s15, 1  ;;  %s852_s7 = scalar_lea.vmem %s1250_s2, %s935_s19 }
  0x12   : > { %299 = vxpose.xlu0.b32.start.end [1/1] (short) %v298_v0, 128  ;;  %v296_v6 = vld [vmem:[%s269_s26] sm:$0xff]  ;;  %s287_s30 = scalar_lea.vmem %s1251_s3, %s922_s27  ;;  %v924_v42 = vld [vmem:[%s852_s7 + $0x8] sm:$0xff]  ;;  %s1199_s13 = scalar_lea.vmem %s1252_s4, %s917_s23 }
  0x13   : > { %v297_v9 = vpack.c.bf16 %v296_v6, %v296_v6  ;;  %v341_v25 = vld [vmem:[%s287_s30] sm:$0x3]  ;;  %v1171_v43 = vpack.c.bf16 %v924_v42, %v924_v42 }
  0x14   : > { %v342_v26 = vunpack.c.0.s8 %v341_v25 }
  0x15   : > { %v409_v44 = vsel %vm407_vm4, %v1171_v43, 0 }
  0x16   : > { %v1159_v27 = vcvt.s32.f32 %v342_v26  ;;  %966 = vmatpush3.bf16.msra.mxu1 %v409_v44 }
  0x17   : > { %971 = vmatprep.subr.bf16.mxu1 %v1082_v1 }
  0x18   : > { %vm344_vm2 = vcmp.ne.f32.partialorder %v1159_v27, 0.0 }
  0x92   : > { %v315_v2 = vpop.trf.xlu0 }
  0x96   : > { %v316_v3 = vpop.trf.xlu0 }
  0x97   : > { %v331_v4 = vpack.c.bf16 %v316_v3, %v315_v2 }
  0x99   : > { %958 = vmatpush3.bf16.msra.mxu0 %v331_v4 }
  0x9a   : > { %v317_v5 = vpop.trf.xlu0  ;;  %959 = vmatprep.subr.bf16.mxu0 %v1082_v1 }
  0x9e   : > { %v318_v7 = vpop.trf.xlu0 }
  0x9f   : > { %v332_v8 = vpack.c.bf16 %v318_v7, %v317_v5 }
  0xa1   : > { %960 = vmatpush3.bf16.msra.mxu0 %v332_v8 }
  0xa2   : > { %979 = vmatprep.subr.bf16.mxu0 %v1082_v1  ;;  %v319_v10 = vpop.trf.xlu0 }
  0xa4   : > { %962 = vmatmul.mubr.msk.bf16.vlgmr.msra.gmra.mrb[0].mxu0 %vm345_vm1, %v297_v9 }
  0xa5   : > { %981 = vmatprep.mubr.msk.bf16.mxu0 %vm1083_vm0, %v1082_v1 }
  0xa6   : > { %v320_v11 = vpop.trf.xlu0 }
  0xa7   : > { %v333_v12 = vpack.c.bf16 %v320_v11, %v319_v10 }
  0xaa   : > { %v321_v13 = vpop.trf.xlu0 }
  0xae   : > { %v322_v14 = vpop.trf.xlu0 }
  0xaf   : > { %v334_v15 = vpack.c.bf16 %v322_v14, %v321_v13 }
  0xb2   : > { %v323_v16 = vpop.trf.xlu0 }
  0xb6   : > { %v324_v17 = vpop.trf.xlu0 }
  0xb7   : > { %v335_v18 = vpack.c.bf16 %v324_v17, %v323_v16 }
  0xba   : > { %v325_v19 = vpop.trf.xlu0 }
  0xbe   : > { %v326_v20 = vpop.trf.xlu0 }
  0xbf   : > { %v336_v21 = vpack.c.bf16 %v326_v20, %v325_v19 }
  0xc2   : > { %v327_v22 = vpop.trf.xlu0 }
  0xc6   : > { %v328_v23 = vpop.trf.xlu0 }
  0xc7   : > { %v337_v24 = vpack.c.bf16 %v328_v23, %v327_v22 }
  0xca   : > { %v329_v35 = vpop.trf.xlu0 }
  0xce   : > { %v330_v36 = vpop.trf.xlu0 }
  0xcf   : > { %v338_v51 = vpack.c.bf16 %v330_v36, %v329_v35 }
 0x177   : > { %v383_v28 = vpop.f32.mrb[0].mxu0 }
 0x178   : > { %v389_v29 = vmul.f32 0.17677669, %v383_v28  ;;  %v963_v30 = vpop.f32.mrb[1].mxu0 }
 0x179   : > { %v386_v31 = vpop.f32.mrb[2].mxu0 }
 0x17a   : > { %v964_v32 = vpop.f32.mrb[3].mxu0  ;;  %v390_v33 = vsel %vm344_vm2, %v389_v29, -1e+09 }
 0x17b   : > { %v392_v34 = vsel %vm391_vm3, %v390_v33, -inf }
 0x17c   : > { %393 = vmax.xlane.f32.xlu0 %v392_v34 }
 0x209   : > { %v394_v37 = vpop.xlane.xlu0 %393 }
 0x20a   : > { %v395_v38 = vsub.f32 %v390_v33, %v394_v37 }
 0x20c   : > { %v396_v39 = vmul.f32 1.442695, %v395_v38 }
 0x20e   : > { %1042 = vpow2.f32 %v396_v39 }
 0x218   : > { %v1043_v40 = vpop.eup %1042 }
 0x219   : > { %v398_v41 = vsel %vm391_vm3, %v1043_v40, 0.0 }
 0x21a   : > { %399 = vadd.xlane.f32.xlu1 %v398_v41 }
 0x22b   : > { %453 = vrot.lane.b32.xlu1 %v297_v9, %s1084_s8 }
 0x22f   : > { %567 = vrot.lane.b32.xlu1 %v297_v9, %s1085_s9 }
 0x233   : > { %680 = vrot.lane.b32.xlu1 %v297_v9, %s1086_s10 }
 0x2a7   : > { %v400_v45 = vpop.xlane.xlu1 %399 }
 0x2a8   : > { %1044 = vrcp.f32 %v400_v45 }
 0x2ab   : > { %v454_v49 = vpop.permute.xlu1 %453 }
 0x2af   : > { %v568_v50 = vpop.permute.xlu1 %567 }
 0x2b2   : > { %v1045_v46 = vpop.eup %1044 }
 0x2b3   : > { %v402_v47 = vmul.f32 %v1045_v46, %v1043_v40  ;;  %v681_v52 = vpop.permute.xlu1 %680 }
 0x2b5   : > { %v403_v48 = vpack.c.bf16 %v402_v47, %v402_v47 }
 0x2b7   : > { %968 = vmatmul.mubr.msk.bf16.vlgmr.msra.gmra.mrb[0].mxu1 %vm391_vm3, %v403_v48 }
 0x2b8   : > { %972 = vmatpush3.bf16.msra.mxu1 %v333_v12  ;;  %975 = vmatprep.mubr.msk.bf16.mxu1 %vm1083_vm0, %v1082_v1 }
 0x2b9   : > { %973 = vmatprep.subr.bf16.mxu1 %v1082_v1 }
 0x2bc   : > { %974 = vmatpush3.bf16.msra.mxu1 %v334_v15 }
 0x2bd   : > { %985 = vmatprep.subr.bf16.mxu1 %v1082_v1 }
 0x2bf   : > { %976 = vmatmul.mubr.msk.bf16.vlgmr.msra.gmra.mrb[4].mxu1 %vm345_vm1, %v454_v49 }
 0x2c0   : > { %986 = vmatpush3.bf16.msra.mxu1 %v335_v18  ;;  %989 = vmatprep.mubr.msk.bf16.mxu1 %vm1083_vm0, %v1082_v1 }
 0x2c1   : > { %987 = vmatprep.subr.bf16.mxu1 %v1082_v1 }
 0x2c4   : > { %988 = vmatpush3.bf16.msra.mxu1 %v336_v21 }
 0x2c5   : > { %999 = vmatprep.subr.bf16.mxu1 %v1082_v1 }
 0x2c7   : > { %990 = vmatmul.mubr.msk.bf16.vlgmr.msra.gmra.mrb[8].mxu1 %vm345_vm1, %v568_v50 }
 0x2c8   : > { %1000 = vmatpush3.bf16.msra.mxu1 %v337_v24  ;;  %1003 = vmatprep.mubr.msk.bf16.mxu1 %vm1083_vm0, %v1082_v1 }
 0x2c9   : > { %1001 = vmatprep.subr.bf16.mxu1 %v1082_v1 }
 0x2cc   : > { %1002 = vmatpush3.bf16.msra.mxu1 %v338_v51 }
 0x2cf   : > { %1004 = vmatmul.mubr.msk.bf16.vlgmr.msra.gmra.mrb[12].mxu1 %vm345_vm1, %v681_v52 }
 0x38a   : > { %v445_v53 = vpop.f32.mrb[0].mxu1 }
 0x38b   : > { %451 = vst.msk [vmem:[%s1199_s13] sm:$0xff] %vm345_vm1, %v445_v53  ;;  %v969_v54 = vpop.f32.mrb[1].mxu1 }
 0x38c   : > { %v448_v55 = vpop.f32.mrb[2].mxu1 }
 0x38d   : > { %v970_v56 = vpop.f32.mrb[3].mxu1 }
 0x392   : > { %v492_v57 = vpop.f32.mrb[4].mxu1 }
 0x393   : > { %v498_v58 = vmul.f32 0.17677669, %v492_v57  ;;  %v977_v59 = vpop.f32.mrb[5].mxu1 }
 0x394   : > { %v495_v60 = vpop.f32.mrb[6].mxu1 }
 0x395   : > { %v978_v61 = vpop.f32.mrb[7].mxu1  ;;  %v499_v62 = vsel %vm344_vm2, %v498_v58, -1e+09 }
 0x396   : > { %v500_v63 = vsel %vm391_vm3, %v499_v62, -inf }
 0x397   : > { %501 = vmax.xlane.f32.xlu1 %v500_v63 }
 0x39a   : > { %v606_v0 = vpop.f32.mrb[8].mxu1 }
 0x39b   : > { %v612_v2 = vmul.f32 0.17677669, %v606_v0  ;;  %v991_v3 = vpop.f32.mrb[9].mxu1 }
 0x39c   : > { %v609_v4 = vpop.f32.mrb[10].mxu1 }
 0x39d   : > { %v992_v5 = vpop.f32.mrb[11].mxu1  ;;  %v613_v6 = vsel %vm344_vm2, %v612_v2, -1e+09 }
 0x39e   : > { %v614_v7 = vsel %vm391_vm3, %v613_v6, -inf }
 0x39f   : > { %615 = vmax.xlane.f32.xlu1 %v614_v7 }
 0x3a2   : > { %v719_v8 = vpop.f32.mrb[12].mxu1 }
 0x3a3   : > { %v725_v9 = vmul.f32 0.17677669, %v719_v8  ;;  %v1005_v10 = vpop.f32.mrb[13].mxu1 }
 0x3a4   : > { %v722_v11 = vpop.f32.mrb[14].mxu1 }
 0x3a5   : > { %v1006_v12 = vpop.f32.mrb[15].mxu1  ;;  %v726_v13 = vsel %vm344_vm2, %v725_v9, -1e+09 }
 0x3a6   : > { %v727_v14 = vsel %vm391_vm3, %v726_v13, -inf }
 0x3a7   : > { %728 = vmax.xlane.f32.xlu1 %v727_v14 }
 0x3b8   : > { %513 = vrot.lane.b32.xlu1 %v1171_v43, %s1084_s8 }
 0x3bc   : > { %626 = vrot.lane.b32.xlu1 %v1171_v43, %s1085_s9 }
 0x424   : > { %v502_v15 = vpop.xlane.xlu1 %501 }
 0x425   : > { %v503_v16 = vsub.f32 %v499_v62, %v502_v15 }
 0x427   : > { %v504_v17 = vmul.f32 1.442695, %v503_v16 }
 0x429   : > { %1046 = vpow2.f32 %v504_v17 }
 0x42c   : > { %v616_v18 = vpop.xlane.xlu1 %615 }
 0x42d   : > { %v617_v19 = vsub.f32 %v613_v6, %v616_v18 }
 0x42f   : > { %v618_v20 = vmul.f32 1.442695, %v617_v19 }
 0x431   : > { %1048 = vpow2.f32 %v618_v20 }
 0x433   : > { %v1047_v21 = vpop.eup %1046 }
 0x434   : > { %v729_v22 = vpop.xlane.xlu1 %728  ;;  %v506_v23 = vsel %vm391_vm3, %v1047_v21, 0.0 }
 0x435   : > { %v730_v24 = vsub.f32 %v726_v13, %v729_v22  ;;  %507 = vadd.xlane.f32.xlu1 %v506_v23 }
 0x437   : > { %v731_v25 = vmul.f32 1.442695, %v730_v24 }
 0x438   : > { %v514_v26 = vpop.permute.xlu1 %513 }
 0x439   : > { %1050 = vpow2.f32 %v731_v25  ;;  %v519_v27 = vsel %vm407_vm4, %v514_v26, 0 }
 0x43a   : > { %980 = vmatpush3.bf16.msra.mxu0 %v519_v27 }
 0x43b   : > { %v1049_v28 = vpop.eup %1048  ;;  %993 = vmatprep.subr.bf16.mxu0 %v1082_v1 }
 0x43c   : > { %v620_v29 = vsel %vm391_vm3, %v1049_v28, 0.0  ;;  %v627_v32 = vpop.permute.xlu1 %626 }
 0x43d   : > { %621 = vadd.xlane.f32.xlu1 %v620_v29  ;;  %v632_v38 = vsel %vm407_vm4, %v627_v32, 0 }
 0x443   : > { %v1051_v30 = vpop.eup %1050 }
 0x444   : > { %v733_v31 = vsel %vm391_vm3, %v1051_v30, 0.0 }
 0x445   : > { %734 = vadd.xlane.f32.xlu1 %v733_v31 }
 0x456   : > { %739 = vrot.lane.b32.xlu1 %v1171_v43, %s1086_s10 }
 0x4c2   : > { %v508_v33 = vpop.xlane.xlu1 %507 }
 0x4c3   : > { %1052 = vrcp.f32 %v508_v33 }
 0x4ca   : > { %v622_v34 = vpop.xlane.xlu1 %621 }
 0x4cb   : > { %1054 = vrcp.f32 %v622_v34 }
 0x4cd   : > { %v1053_v35 = vpop.eup %1052 }
 0x4ce   : > { %v510_v36 = vmul.f32 %v1053_v35, %v1047_v21 }
 0x4d0   : > { %v511_v37 = vpack.c.bf16 %v510_v36, %v510_v36 }
 0x4d2   : > { %982 = vmatmul.mubr.msk.bf16.vlgmr.msra.gmra.mrb[4].mxu0 %vm391_vm3, %v511_v37  ;;  %v735_v39 = vpop.xlane.xlu1 %734 }
 0x4d3   : > { %994 = vmatpush3.bf16.msra.mxu0 %v632_v38  ;;  %1056 = vrcp.f32 %v735_v39  ;;  %995 = vmatprep.mubr.msk.bf16.mxu0 %vm1083_vm0, %v1082_v1 }
 0x4d4   : > { %1007 = vmatprep.subr.bf16.mxu0 %v1082_v1 }
 0x4d5   : > { %v1055_v40 = vpop.eup %1054 }
 0x4d6   : > { %v624_v41 = vmul.f32 %v1055_v40, %v1049_v28  ;;  %v740_v42 = vpop.permute.xlu1 %739 }
 0x4d7   : > { %v745_v43 = vsel %vm407_vm4, %v740_v42, 0 }
 0x4d8   : > { %v625_v44 = vpack.c.bf16 %v624_v41, %v624_v41 }
 0x4da   : > { %996 = vmatmul.mubr.msk.bf16.vlgmr.msra.gmra.mrb[8].mxu0 %vm391_vm3, %v625_v44 }
 0x4db   : > { %1008 = vmatpush3.bf16.msra.mxu0 %v745_v43  ;;  %1009 = vmatprep.mubr.msk.bf16.mxu0 %vm1083_vm0, %v1082_v1 }
 0x4dd   : > { %v1057_v45 = vpop.eup %1056 }
 0x4de   : > { %v737_v46 = vmul.f32 %v1057_v45, %v1051_v30 }
 0x4e0   : > { %v738_v47 = vpack.c.bf16 %v737_v46, %v737_v46 }
 0x4e2   : > { %1010 = vmatmul.mubr.msk.bf16.vlgmr.msra.gmra.mrb[12].mxu0 %vm391_vm3, %v738_v47 }
 0x5a5   : > { %v555_v48 = vpop.f32.mrb[4].mxu0 }
 0x5a6   : > { %562 = vrot.lane.b32.xlu0 %v555_v48, %s1086_s10  ;;  %v983_v49 = vpop.f32.mrb[5].mxu0 }
 0x5a7   : > { %v558_v50 = vpop.f32.mrb[6].mxu0 }
 0x5a8   : > { %v984_v51 = vpop.f32.mrb[7].mxu0 }
 0x5ad   : > { %v668_v52 = vpop.f32.mrb[8].mxu0 }
 0x5ae   : > { %675 = vrot.lane.b32.xlu1 %v668_v52, %s1085_s9  ;;  %v997_v53 = vpop.f32.mrb[9].mxu0 }
 0x5af   : > { %v671_v54 = vpop.f32.mrb[10].mxu0 }
 0x5b0   : > { %v998_v1 = vpop.f32.mrb[11].mxu0 }
 0x5b5   : > { %v781_v55 = vpop.f32.mrb[12].mxu0 }
 0x5b6   : > { %788 = vrot.lane.b32.xlu1 %v781_v55, %s1084_s8  ;;  %v1011_v56 = vpop.f32.mrb[13].mxu0 }
 0x5b7   : > { %v784_v57 = vpop.f32.mrb[14].mxu0 }
 0x5b8   : > { %v1012_v58 = vpop.f32.mrb[15].mxu0 }
 0x618   : > { %v563_v59 = vpop.permute.xlu0 %562 }
 0x619   : > { %566 = vst.msk [vmem:[%s1199_s13] sm:$0xff] %vm565_vm5, %v563_v59 }
 0x620   : > { %v676_v60 = vpop.permute.xlu1 %675 }
 0x621   : > { %679 = vst.msk [vmem:[%s1199_s13] sm:$0xff] %vm678_vm6, %v676_v60 }
 0x628   : > { %v789_v61 = vpop.permute.xlu1 %788 }
 0x629   : > { %792 = vst.msk [vmem:[%s1199_s13] sm:$0xff] %vm791_vm7, %v789_v61 }
 0x62a PF: > { %s14_s17 = sadd.s32 1, %s1080_s17   ;;  %s1253_s15 = smov %s1076_s16 }
 0x62b   : > { %p11_p5 = scmp.ge.s32.totalorder %s14_s17, 4   ;;  %s1254_s16 = smov %s1256_s18 }
 0x62d   :  { %13 = sbr.rel (!%p11_p5) target bundleno = 2 (0x2), region = 75 }

// kernel: transformer_forward.57
= control target key start
LH: loop header
LB: loop body
LE: loop exit
PB: predicated region body
PF: predicated region fallthrough
CT: control target
= control target key end

     0   :  { %vm20_vm0 = vcmask 818176   ;;  %v189_v3 = vmov 0.0   ;;  %vm190_vm1 = vmmov 0   ;;  %s289_s0 = inlined_call_operand.vmem [shape: f32[16,128], index: 0, kind: input, shape index: {}]   ;;  %s290_s1 = inlined_call_operand.vmem [shape: f32[128,100], index: 1, kind: input, shape index: {}]   ;;  %s291_s2 = inlined_call_operand.vmem [shape: f32[1,100], index: 2, kind: input, shape index: {}]   ;;  %s292_s3 = inlined_call_operand.hbm [shape: f32[16,100], index: 3, kind: output, shape index: {}]  }
   0x1   :  { %v28_v0 = vld [vmem:[%s290_s1] sm:$0xff]  ;;  %v29_v1 = vld [vmem:[%s290_s1 + $0x8] sm:$0xff]  ;;  %v30_v2 = vld [vmem:[%s290_s1 + $0x10] sm:$0xff]  ;;  %140 = vmatprep.subr.bf16.mxu0 %v189_v3  ;;  %156 = vmatprep.mubr.msk.bf16.mxu0 %vm190_vm1, %v189_v3  ;;  %21 = vst.msk [vmem:[#allocation2] sm:$0xff] %vm20_vm0, %v189_v3 }
   0x2   :  { %v44_v4 = vpack.c.bf16 %v29_v1, %v28_v0  ;;  %v31_v5 = vld [vmem:[%s290_s1 + $0x18] sm:$0xff]  ;;  %22 = vst.msk [vmem:[#allocation2 + $0x8] sm:$0xff] %vm20_vm0, %v189_v3  ;;  %v32_v7 = vld [vmem:[%s290_s1 + $0x20] sm:$0xff]  ;;  %v33_v8 = vld [vmem:[%s290_s1 + $0x28] sm:$0xff] }
   0x3   :  { %v45_v6 = vpack.c.bf16 %v31_v5, %v30_v2 }
   0x4   :  { %141 = vmatpush3.bf16.msra.mxu0 %v44_v4 }
   0x5   :  { %142 = vmatprep.subr.bf16.mxu0 %v189_v3 }
   0x6   :  { %8 = vsyncpa [#allocation4], 0  ;;  %v46_v9 = vpack.c.bf16 %v33_v8, %v32_v7  ;;  %v34_v10 = vld [vmem:[%s290_s1 + $0x30] sm:$0xff]  ;;  %v35_v11 = vld [vmem:[%s290_s1 + $0x38] sm:$0xff] }
   0x7   :  { %v47_v12 = vpack.c.bf16 %v35_v11, %v34_v10  ;;  %v36_v13 = vld [vmem:[%s290_s1 + $0x40] sm:$0xff]  ;;  %v37_v14 = vld [vmem:[%s290_s1 + $0x48] sm:$0xff]  ;;  %v38_v16 = vld [vmem:[%s290_s1 + $0x50] sm:$0xff] }
   0x8   :  { %143 = vmatpush3.bf16.msra.mxu0 %v45_v6  ;;  %v48_v15 = vpack.c.bf16 %v37_v14, %v36_v13  ;;  %v39_v17 = vld [vmem:[%s290_s1 + $0x58] sm:$0xff]  ;;  %v40_v19 = vld [vmem:[%s290_s1 + $0x60] sm:$0xff]  ;;  %v41_v20 = vld [vmem:[%s290_s1 + $0x68] sm:$0xff] }
   0x9   :  { %144 = vmatprep.subr.bf16.mxu0 %v189_v3  ;;  %v49_v18 = vpack.c.bf16 %v39_v17, %v38_v16  ;;  %v50_v21 = vpack.c.bf16 %v41_v20, %v40_v19  ;;  %v42_v22 = vld [vmem:[%s290_s1 + $0x70] sm:$0xff]  ;;  %v43_v23 = vld [vmem:[%s290_s1 + $0x78] sm:$0xff]  ;;  %v25_v25 = vld [vmem:[%s289_s0] sm:$0xff] }
   0xa   :  { %v51_v24 = vpack.c.bf16 %v43_v23, %v42_v22  ;;  %v26_v26 = vld [vmem:[%s289_s0 + $0x8] sm:$0xff]  ;;  %v23_v28 = vld [vmem:[#allocation2] sm:$0xff]  ;;  %s191_s0 = smov [#allocation3]  }
   0xb   :  { %v27_v27 = vpack.c.bf16 %v26_v26, %v25_v25  ;;  %v24_v30 = vld [vmem:[#allocation2 + $0x8] sm:$0xff]  ;;  %v130_v36 = vld [vmem:[%s291_s2] ss:$0 sm:$0xff]  ;;  %s119_s22 = sshll.u32 %s191_s0, 4  ;;  %s120_s22 = int_to_ptr.vmem [resolvable:$true] %s119_s22 }
   0xc   :  { %145 = vmatpush3.bf16.msra.mxu0 %v46_v9  ;;  %s165_s23 = scalar_lea.vmem %s120_s22, 256  ;;  %p170_p1 = scmp.lt.s32.totalorder %s120_s22, %s120_s22 }
   0xd   :  { %146 = vmatprep.subr.bf16.mxu0 %v189_v3  ;;  %p166_p0 = scmp.ne.s32.totalorder %s120_s22, %s165_s23  ;;  %p171_p2 = scmp.lt.s32.totalorder %s165_s23, %s165_s23 }
   0xf   :  { %p172_p3 = por %p171_p2, %p170_p1 }
  0x10   :  { %147 = vmatpush3.bf16.msra.mxu0 %v47_v12 }
  0x11   :  { %148 = vmatprep.subr.bf16.mxu0 %v189_v3  ;;  %p173_p4 = pnand %p172_p3, %p166_p0 }
  0x14   :  { %149 = vmatpush3.bf16.msra.mxu0 %v48_v15 }
  0x15   :  { %150 = vmatprep.subr.bf16.mxu0 %v189_v3 }
  0x18   :  { %151 = vmatpush3.bf16.msra.mxu0 %v49_v18 }
  0x19   :  { %152 = vmatprep.subr.bf16.mxu0 %v189_v3 }
  0x1c   :  { %153 = vmatpush3.bf16.msra.mxu0 %v50_v21 }
  0x1d   :  { %154 = vmatprep.subr.bf16.mxu0 %v189_v3 }
  0x20   :  { %155 = vmatpush3.bf16.msra.mxu0 %v51_v24 }
  0x23   :  { %157 = vmatmul.mubr.bf16.vlgmr.msra.gmra.mrb[0].mxu0 %v27_v27 }
  0xf6   :  { %v86_v29 = vpop.f32.mrb[0].mxu0 }
  0xf7   :  { %v93_v31 = vadd.f32 %v86_v29, %v23_v28  ;;  %v158_v32 = vpop.f32.mrb[1].mxu0 }
  0xf8   :  { %v89_v33 = vpop.f32.mrb[2].mxu0 }
  0xf9   :  { %96 = vst.msk [vmem:[#allocation2] sm:$0xff] %vm20_vm0, %v93_v31  ;;  %v94_v34 = vadd.f32 %v89_v33, %v24_v30  ;;  %v159_v35 = vpop.f32.mrb[3].mxu0 }
  0xfb   :  { %97 = vst.msk [vmem:[#allocation2 + $0x8] sm:$0xff] %vm20_vm0, %v94_v34 }
 0x100   :  { %v101_v37 = vld [vmem:[#allocation2] sm:$0xff] }
 0x101   :  { %v110_v38 = vadd.f32 %v130_v36, %v101_v37 }
 0x102   :  { %v102_v39 = vld [vmem:[#allocation2 + $0x8] sm:$0xff] }
 0x103   :  { %v111_v40 = vadd.f32 %v130_v36, %v102_v39  ;;  %112 = vst.msk [vmem:[#allocation3] sm:$0xff] %vm20_vm0, %v110_v38 }
 0x105   :  { %113 = vst.msk [vmem:[#allocation3 + $0x8] sm:$0xff] %vm20_vm0, %v111_v40 }
 0x106   :  { %176 = shalt.err (!%p173_p4)
}
 0x107   :  { %s177_s25 = scalar_lea.hbm %s292_s3, 256 }
 0x108   :  { %p178_p5 = scmp.ne.s32.totalorder %s292_s3, %s177_s25  ;;  %p181_p6 = scmp.lt.u32.totalorder %s177_s25, %s292_s3 }
 0x10a   :  { %p183_p7 = pnand %p181_p6, %p178_p5 }
 0x10c   :  { %186 = shalt.err (!%p183_p7)
}
 0x10d   :  { %s192_s30 = smov 128   ;;  %s193_s4 = smov 8  }
 0x10e   :  { %125 = dma.vmem_to_hbm [thread:$0]  %s120_s22, 256, %s292_s3, [#allocation4], %s192_s30, %s192_s30, %s193_s4  }
 0x10f   :  { %187 = dma.done.wait [#allocation4], 256  }
 0x110   :  { %188 = vsyncadd [#allocation4], 4294967040 }
 0x111   :  { %129 = vsyncpa [#allocation4], 1 }

</bundles_post_ra>
